<compile_context>
chip_gen: v6e
topology: v6e:2x2x1
jax: 0.10.0
libtpu: 0.0.40
codegen_flags: <defaults>
</compile_context>

<pallas_src>
import jax
import jax.numpy as jnp
from jax.experimental import pallas as pl
from jax.experimental.pallas import tpu as pltpu


def _round_up(x, m):
    return ((x + m - 1) // m) * m


def _tpu_hardware_info():
    """Best-effort (VMEM capacity bytes, TensorCores per chip) with safe fallbacks."""
    kind = ""
    try:
        kind = jax.devices()[0].device_kind.lower()
    except Exception:
        pass
    # Only v7x has 2 TensorCores per chip; splitting the batch anywhere else
    # just serializes the recurrence, so default to 1.
    num_tc = 2 if "v7" in kind else 1
    vmem_bytes = None
    try:
        info = pltpu.get_tpu_info()
        v = getattr(info, "vmem_capacity_bytes", None)
        if v:
            vmem_bytes = int(v)
    except Exception:
        pass
    if vmem_bytes is None:
        vmem_bytes = (64 if "v7" in kind else 128) * 2 ** 20
    return vmem_bytes, num_tc


def _choose_time_chunk(seq_len, cap):
    """Pick time-steps-per-grid-step T and the padded sequence length.

    T is either the full sequence (single chunk; a full-dim block is always a
    legal block shape) or a multiple of 16 (keeps bf16 sublane tiles of the
    (tb, T, *) blocks packed). Ragged sequences are padded — never T=1.
    """
    cap = max(1, int(cap))
    if seq_len <= cap:
        return seq_len, seq_len
    cands = list(range(16, cap + 1, 16)) or list(range(8, cap + 1, 8)) or [cap]
    divisors = [t for t in cands if seq_len % t == 0]
    if divisors:
        T = max(divisors)                                  # no padding needed
    else:
        T = min(cands, key=lambda t: ((seq_len + t - 1) // t * t, -t))
    seq_pad = (seq_len + T - 1) // T * T
    return T, seq_pad


def _make_lstm_chunk_kernel(T, hp, n_inter, sub_b, seq_len, needs_mask, out_dtype):
    """One grid step == one (batch block, chunk of T time steps).

    Inputs : xw (tb,T,4hp) bf16 | W_hh HBM (hp,4hp) bf16 | h0,c0 (tb,hp) f32
    Outputs: out (tb,T,hp) bf16 | hf,cf (tb,hp) f32  (hf/cf double as the carry)
    Scratch: whh_vmem (hp,4hp) bf16 single copy + its DMA semaphore.
    """

    def kernel(xw_ref, whh_hbm, h0_ref, c0_ref, out_ref, hf_ref, cf_ref,
               whh_vmem, whh_sem):
        # First chunk of this batch block: pull the single VMEM copy of W_hh
        # (guaranteed one copy — no double buffering) and seed the carry.
        @pl.when(pl.program_id(1) == 0)
        def _():
            cp = pltpu.make_async_copy(whh_hbm, whh_vmem, whh_sem)
            cp.start()
            hf_ref[...] = h0_ref[...]
            cf_ref[...] = c0_ref[...]
            cp.wait()

        whh = whh_vmem[...]                      # (hp, 4hp) bf16, weight-stationary
        t0 = pl.program_id(1) * T

        hs, cs = [], []
        for s in range(n_inter):
            rows = pl.ds(s * sub_b, sub_b)
            hs.append(hf_ref[rows, :])           # f32 carries
            cs.append(cf_ref[rows, :])

        for tt in range(T):
            # Phase 1: issue the independent recurrent matmuls of every batch
            # sub-block for this step. The chains are independent, so the
            # scheduler can hide one sub-block's matmul->tanh->update latency
            # behind the other's.
            gates = []
            for s in range(n_inter):
                rows = pl.ds(s * sub_b, sub_b)
                g = xw_ref[rows, tt, :].astype(jnp.float32) + jnp.dot(
                    hs[s].astype(jnp.bfloat16), whh,
                    preferred_element_type=jnp.float32)      # (sub_b, 4hp) f32
                gates.append(g)

            # Phase 2: gate math, one hp-wide slab per gate (bounds vreg
            # liveness at large hidden sizes).
            for s in range(n_inter):
                rows = pl.ds(s * sub_b, sub_b)
                g = gates[s]
                # sigmoid(z) = 0.5*tanh(0.5 z) + 0.5; the 0.5 pre-scale of the
                # i/f/o gates is folded into the weights/bias in the wrapper.
                i_g = jnp.tanh(g[:, 0 * hp:1 * hp]) * 0.5 + 0.5
                f_g = jnp.tanh(g[:, 1 * hp:2 * hp]) * 0.5 + 0.5
                g_g = jnp.tanh(g[:, 2 * hp:3 * hp])
                c_new = f_g * cs[s] + i_g * g_g
                o_g = jnp.tanh(g[:, 3 * hp:4 * hp]) * 0.5 + 0.5
                h_new = o_g * jnp.tanh(c_new)
                out_ref[rows, tt, :] = h_new.astype(out_dtype)
                if needs_mask:
                    # Padded tail steps (sequence padded up to a multiple of T):
                    # freeze the carry so the final (h, c) is the state after
                    # the last *real* step.
                    valid = (t0 + tt) < seq_len
                    cs[s] = jnp.where(valid, c_new, cs[s])
                    hs[s] = jnp.where(valid, h_new, hs[s])
                else:
                    cs[s] = c_new
                    hs[s] = h_new

        for s in range(n_inter):
            rows = pl.ds(s * sub_b, sub_b)
            hf_ref[rows, :] = hs[s]
            cf_ref[rows, :] = cs[s]

    return kernel


def lstm_layer_forward(inputs, weight_ih, weight_hh, bias_ih, bias_hh,
                       hc_0=None, *, max_time_chunk=None):
    """Forward pass of LSTMLayer (nn.LSTMCell unrolled over the sequence).

    inputs     : (batch, seq, input_dim)
    weight_ih  : (4*hidden, input_dim)   PyTorch layout, gate order [i, f, g, o]
    weight_hh  : (4*hidden, hidden)
    bias_ih/hh : (4*hidden,)
    hc_0       : optional ((batch, hidden), (batch, hidden)) initial state
    Returns (outputs (batch, seq, hidden), (h, c)) in float32.
    """
    batch, seq_len, input_dim = inputs.shape
    hidden_dim = weight_hh.shape[1]
    assert weight_ih.shape == (4 * hidden_dim, input_dim)
    f32, bf16 = jnp.float32, jnp.bfloat16

    if hc_0 is None:
        h0 = jnp.zeros((batch, hidden_dim), f32)
        c0 = jnp.zeros((batch, hidden_dim), f32)
    else:
        h0 = hc_0[0].astype(f32)
        c0 = hc_0[1].astype(f32)

    vmem_bytes, num_tc = _tpu_hardware_info()

    # ---- hardware-tile padding: hidden -> mult of 128 (lane), batch -> 8/16 ----
    hp = _round_up(hidden_dim, 128)
    bp = _round_up(batch, 8)
    if bp > 8:
        bp = _round_up(bp, 16)        # enables the megacore split OR the in-kernel interleave
    if num_tc >= 2 and bp >= 16:
        n_bb, tb = 2, bp // 2         # one batch block per TensorCore (v7x only)
    else:
        n_bb, tb = 1, bp              # single-TC chips: never split the serial recurrence
    n_inter = 2 if (tb >= 16 and tb % 16 == 0) else 1
    sub_b = tb // n_inter

    # ---- time-chunk sizing from the per-generation VMEM budget -----------------
    gen_cap = 32 if vmem_bytes <= 64 * 2 ** 20 else 64       # v7x vs v5e/v6e
    if n_inter == 2:
        gen_cap = max(16, gen_cap // 2)                      # bound unrolled code size
    if max_time_chunk is not None:
        gen_cap = min(gen_cap, int(max_time_chunk))
    fixed_vmem = hp * 4 * hp * 2 + 12 * tb * hp * 4          # W_hh copy + state blocks
    per_step_vmem = tb * hp * (16 + 4)                       # 2x bf16 xw + 2x bf16 out
    t_budget = max(8, (int(vmem_bytes * 0.70) - fixed_vmem) // per_step_vmem)
    T, seq_pad = _choose_time_chunk(seq_len, min(gen_cap, t_budget))
    n_chunks = seq_pad // T
    needs_mask = seq_pad != seq_len

    # ---- one-time weight prep: gate-blocked zero padding keeps [i|f|g|o] slices
    # 128-lane aligned; fold the 0.5 of sigmoid(z)=0.5*tanh(0.5z)+0.5 into the
    # i/f/o rows; bf16 for the MXU.
    gate_scale = jnp.array([0.5, 0.5, 1.0, 0.5], f32)        # i, f, g, o

    def prep_weight(w, in_dim, in_pad):
        w4 = w.astype(f32).reshape(4, hidden_dim, in_dim) * gate_scale[:, None, None]
        w4 = jnp.pad(w4, ((0, 0), (0, hp - hidden_dim), (0, in_pad - in_dim)))
        return w4.reshape(4 * hp, in_pad).T.astype(bf16)     # (in_pad, 4*hp)

    wih = prep_weight(weight_ih, input_dim, input_dim)       # (I,  4hp) bf16
    whh = prep_weight(weight_hh, hidden_dim, hp)             # (hp, 4hp) bf16
    b4 = (bias_ih + bias_hh).astype(f32).reshape(4, hidden_dim) * gate_scale[:, None]
    bias = jnp.pad(b4, ((0, 0), (0, hp - hidden_dim))).reshape(4 * hp)

    x_p = jnp.pad(inputs.astype(bf16),
                  ((0, bp - batch), (0, seq_pad - seq_len), (0, 0)))
    h0_p = jnp.pad(h0, ((0, bp - batch), (0, hp - hidden_dim)))
    c0_p = jnp.pad(c0, ((0, bp - batch), (0, hp - hidden_dim)))

    # ---- hoisted non-recurrent projection: one MXU-efficient matmul over the
    # whole (padded) sequence, bias folded in; stored bf16.
    xw = jnp.einsum("bsi,ig->bsg", x_p, wih,
                    preferred_element_type=f32) + bias       # (bp, seq_pad, 4hp)
    xw = xw.astype(bf16)

    # ---- advisory cost for XLA scheduling around the sequential kernel ---------
    flops = 2 * bp * seq_pad * hp * 4 * hp
    transcendentals = 5 * bp * seq_pad * hp
    bytes_accessed = (xw.size * 2 + whh.size * 2
                      + bp * seq_pad * hp * 2 + 8 * bp * hp * 4)
    cost = pl.CostEstimate(flops=int(flops), transcendentals=int(transcendentals),
                           bytes_accessed=int(bytes_accessed))

    # rough VMEM need (xw/out double-buffered, W_hh single scratch copy); raise
    # the scoped limit only when needed and stay well below physical capacity.
    vmem_need = (2 * tb * T * 4 * hp * 2 + 2 * tb * T * hp * 2
                 + hp * 4 * hp * 2 + 12 * tb * hp * 4)
    vmem_limit = None
    if vmem_need + (vmem_need >> 2) > 16 * 2 ** 20:
        vmem_limit = int(min(vmem_need + (vmem_need >> 1) + (4 << 20),
                             int(vmem_bytes * 0.80)))

    kernel = _make_lstm_chunk_kernel(T, hp, n_inter, sub_b, seq_len,
                                     needs_mask, bf16)

    out_shapes = (
        jax.ShapeDtypeStruct((bp, seq_pad, hp), bf16),       # per-step hidden states
        jax.ShapeDtypeStruct((bp, hp), f32),                 # final h
        jax.ShapeDtypeStruct((bp, hp), f32),                 # final c
    )

    out_p, h_f, c_f = pl.pallas_call(
        kernel,
        out_shape=out_shapes,
        grid=(n_bb, n_chunks),
        in_specs=[
            pl.BlockSpec((tb, T, 4 * hp), lambda bb, t: (bb, t, 0)),   # xw chunk
            pl.BlockSpec(memory_space=pl.ANY),                         # W_hh stays in HBM
            pl.BlockSpec((tb, hp), lambda bb, t: (bb, 0)),             # h0
            pl.BlockSpec((tb, hp), lambda bb, t: (bb, 0)),             # c0
        ],
        out_specs=[
            pl.BlockSpec((tb, T, hp), lambda bb, t: (bb, t, 0)),       # outputs (bf16)
            pl.BlockSpec((tb, hp), lambda bb, t: (bb, 0)),             # final h (carry)
            pl.BlockSpec((tb, hp), lambda bb, t: (bb, 0)),             # final c (carry)
        ],
        scratch_shapes=[
            pltpu.VMEM((hp, 4 * hp), bf16),       # guaranteed single W_hh copy
            pltpu.SemaphoreType.DMA,              # its one-shot DMA semaphore
        ],
        compiler_params=pltpu.CompilerParams(
            dimension_semantics=("parallel", "arbitrary"),   # batch blocks || , time serial
            vmem_limit_bytes=vmem_limit,
        ),
        cost_estimate=cost,
    )(xw, whh, h0_p, c0_p)

    outputs = out_p[:batch, :seq_len, :hidden_dim].astype(f32)
    h_f = h_f[:batch, :hidden_dim]
    c_f = c_f[:batch, :hidden_dim]
    return outputs, (h_f, c_f)


def _lstm_reference(inputs, weight_ih, weight_hh, bias_ih, bias_hh, hc_0=None):
    """Pure-JAX f32 reference replicating nn.LSTMCell unrolled (gate order i,f,g,o)."""
    batch, seq_len, _ = inputs.shape
    hidden_dim = weight_hh.shape[1]
    if hc_0 is None:
        h = jnp.zeros((batch, hidden_dim), jnp.float32)
        c = jnp.zeros((batch, hidden_dim), jnp.float32)
    else:
        h, c = hc_0
    outs = []
    for t in range(seq_len):
        x = inputs[:, t, :]
        gates = x @ weight_ih.T + bias_ih + h @ weight_hh.T + bias_hh
        i_g, f_g, g_g, o_g = jnp.split(gates, 4, axis=-1)
        i_g = jax.nn.sigmoid(i_g)
        f_g = jax.nn.sigmoid(f_g)
        g_g = jnp.tanh(g_g)
        o_g = jax.nn.sigmoid(o_g)
        c = f_g * c + i_g * g_g
        h = o_g * jnp.tanh(c)
        outs.append(h)
    return jnp.stack(outs, axis=1), (h, c)


def _make_params(key, input_dim, hidden_dim):
    k_wih, k_whh, k_bih, k_bhh = jax.random.split(key, 4)
    bound = 1.0 / (hidden_dim ** 0.5)   # PyTorch LSTMCell init range
    weight_ih = jax.random.uniform(k_wih, (4 * hidden_dim, input_dim),
                                   jnp.float32, -bound, bound)
    weight_hh = jax.random.uniform(k_whh, (4 * hidden_dim, hidden_dim),
                                   jnp.float32, -bound, bound)
    bias_ih = jax.random.uniform(k_bih, (4 * hidden_dim,), jnp.float32, -bound, bound)
    bias_hh = jax.random.uniform(k_bhh, (4 * hidden_dim,), jnp.float32, -bound, bound)
    return weight_ih, weight_hh, bias_ih, bias_hh


if __name__ == "__main__":
    key = jax.random.PRNGKey(0)
    k_p, k_x, k_h, k_c, k_x2 = jax.random.split(key, 5)

    # ---- test 1: zero initial state, small canonical shape --------------------
    batch, seq_len, input_dim, hidden_dim = 2, 8, 16, 32
    weight_ih, weight_hh, bias_ih, bias_hh = _make_params(k_p, input_dim, hidden_dim)
    inputs = jax.random.normal(k_x, (batch, seq_len, input_dim), jnp.float32)

    tol = dict(atol=3e-2, rtol=3e-2)   # bf16 MXU operands + bf16 output storage

    outputs, (h_f, c_f) = lstm_layer_forward(inputs, weight_ih, weight_hh,
                                             bias_ih, bias_hh)
    jax.block_until_ready((outputs, h_f, c_f))
    ref_out, (ref_h, ref_c) = _lstm_reference(inputs, weight_ih, weight_hh,
                                              bias_ih, bias_hh)
    assert outputs.shape == (batch, seq_len, hidden_dim)
    assert h_f.shape == (batch, hidden_dim) and c_f.shape == (batch, hidden_dim)
    assert jnp.allclose(outputs, ref_out, **tol), float(jnp.max(jnp.abs(outputs - ref_out)))
    assert jnp.allclose(h_f, ref_h, **tol)
    assert jnp.allclose(c_f, ref_c, **tol)

    # ---- test 2: explicit (h0, c0) initial state -------------------------------
    h0 = 0.1 * jax.random.normal(k_h, (batch, hidden_dim), jnp.float32)
    c0 = 0.1 * jax.random.normal(k_c, (batch, hidden_dim), jnp.float32)
    outputs2, (h_f2, c_f2) = lstm_layer_forward(inputs, weight_ih, weight_hh,
                                                bias_ih, bias_hh, hc_0=(h0, c0))
    jax.block_until_ready((outputs2, h_f2, c_f2))
    ref_out2, (ref_h2, ref_c2) = _lstm_reference(inputs, weight_ih, weight_hh,
                                                 bias_ih, bias_hh, hc_0=(h0, c0))
    assert jnp.allclose(outputs2, ref_out2, **tol)
    assert jnp.allclose(h_f2, ref_h2, **tol)
    assert jnp.allclose(c_f2, ref_c2, **tol)

    # ---- test 3: exercises multi-chunk pipelining, ragged-sequence padding mask
    # and the 2-way in-kernel batch interleave (batch 10 -> padded 16 -> 2x8 rows).
    b3, s3 = 10, 24
    inputs3 = jax.random.normal(k_x2, (b3, s3, input_dim), jnp.float32)
    outputs3, (h_f3, c_f3) = lstm_layer_forward(inputs3, weight_ih, weight_hh,
                                                bias_ih, bias_hh, max_time_chunk=16)
    jax.block_until_ready((outputs3, h_f3, c_f3))
    ref_out3, (ref_h3, ref_c3) = _lstm_reference(inputs3, weight_ih, weight_hh,
                                                 bias_ih, bias_hh)
    tol3 = dict(atol=5e-2, rtol=5e-2)   # longer sequence -> more bf16 accumulation
    assert outputs3.shape == (b3, s3, hidden_dim)
    assert jnp.allclose(outputs3, ref_out3, **tol3), \
        float(jnp.max(jnp.abs(outputs3 - ref_out3)))
    assert jnp.allclose(h_f3, ref_h3, **tol3)
    assert jnp.allclose(c_f3, ref_c3, **tol3)

    print("KERNEL_OK")
</pallas_src>

<mosaic_0001>
module attributes {stable_mosaic.version = 11 : i64} {
  func.func @kernel(%arg0: i32, %arg1: i32, %arg2: memref<8x8x512xbf16, #tpu.memory_space<vmem>>, %arg3: memref<128x512xbf16, #tpu.memory_space<any>>, %arg4: memref<8x128xf32, #tpu.memory_space<vmem>>, %arg5: memref<8x128xf32, #tpu.memory_space<vmem>>, %arg6: memref<8x8x128xbf16, #tpu.memory_space<vmem>>, %arg7: memref<8x128xf32, #tpu.memory_space<vmem>>, %arg8: memref<8x128xf32, #tpu.memory_space<vmem>>, %arg9: memref<128x512xbf16, #tpu.memory_space<vmem>>, %arg10: memref<!tpu.dma_semaphore, #tpu.memory_space<semaphore_mem>>) attributes {dimension_semantics = [#tpu.dimension_semantics<parallel>, #tpu.dimension_semantics<arbitrary>], iteration_bounds = array<i64: 1, 1>, scalar_prefetch = 0 : i64, scratch_operands = 2 : i64, tpu.core_type = #tpu.core_type<tc>, window_params = [{transform_indices = @transform_0, window_bounds = array<i64: 8, 8, 512>}, {}, {transform_indices = @transform_2, window_bounds = array<i64: 8, 128>}, {transform_indices = @transform_3, window_bounds = array<i64: 8, 128>}, {transform_indices = @transform_4, window_bounds = array<i64: 8, 8, 128>}, {transform_indices = @transform_5, window_bounds = array<i64: 8, 128>}, {transform_indices = @transform_6, window_bounds = array<i64: 8, 128>}]} {
    %c0_i32 = arith.constant 0 : i32
    %0 = arith.cmpi eq, %arg1, %c0_i32 : i32
    %1 = arith.extui %0 : i1 to i32
    %c0_i32_0 = arith.constant 0 : i32
    %2 = arith.cmpi ne, %1, %c0_i32_0 : i32
    scf.if %2 {
      tpu.enqueue_dma source(%arg3 : memref<128x512xbf16, #tpu.memory_space<any>>) target(%arg9 : memref<128x512xbf16, #tpu.memory_space<vmem>>) target_semaphore(%arg10 : memref<!tpu.dma_semaphore, #tpu.memory_space<semaphore_mem>>)
      %c0_106 = arith.constant 0 : index
      %c0_107 = arith.constant 0 : index
      %288 = vector.load %arg4[%c0_106, %c0_107] : memref<8x128xf32, #tpu.memory_space<vmem>>, vector<8x128xf32>
      %c0_108 = arith.constant 0 : index
      %c0_109 = arith.constant 0 : index
      %289 = vector.load %arg7[%c0_108, %c0_109] : memref<8x128xf32, #tpu.memory_space<vmem>>, vector<8x128xf32>
      tpu.vector_store %arg7[%c0_108, %c0_109], %288 {strides = array<i32>} : memref<8x128xf32, #tpu.memory_space<vmem>>, vector<8x128xf32>,
      %c0_110 = arith.constant 0 : index
      %c0_111 = arith.constant 0 : index
      %290 = vector.load %arg5[%c0_110, %c0_111] : memref<8x128xf32, #tpu.memory_space<vmem>>, vector<8x128xf32>
      %c0_112 = arith.constant 0 : index
      %c0_113 = arith.constant 0 : index
      %291 = vector.load %arg8[%c0_112, %c0_113] : memref<8x128xf32, #tpu.memory_space<vmem>>, vector<8x128xf32>
      tpu.vector_store %arg8[%c0_112, %c0_113], %290 {strides = array<i32>} : memref<8x128xf32, #tpu.memory_space<vmem>>, vector<8x128xf32>,
      tpu.wait_dma2 semaphore(%arg10 : memref<!tpu.dma_semaphore, #tpu.memory_space<semaphore_mem>>) src(%arg3 : memref<128x512xbf16, #tpu.memory_space<any>>) dst(%arg9 : memref<128x512xbf16, #tpu.memory_space<vmem>>)
    } else {
    }
    %c0 = arith.constant 0 : index
    %c0_1 = arith.constant 0 : index
    %3 = vector.load %arg9[%c0, %c0_1] : memref<128x512xbf16, #tpu.memory_space<vmem>>, vector<128x512xbf16>
    %c0_2 = arith.constant 0 : index
    %c0_3 = arith.constant 0 : index
    %4 = vector.load %arg7[%c0_2, %c0_3] : memref<8x128xf32, #tpu.memory_space<vmem>>, vector<8x128xf32>
    %c0_4 = arith.constant 0 : index
    %c0_5 = arith.constant 0 : index
    %5 = vector.load %arg8[%c0_4, %c0_5] : memref<8x128xf32, #tpu.memory_space<vmem>>, vector<8x128xf32>
    %c0_6 = arith.constant 0 : index
    %c0_7 = arith.constant 0 : index
    %c0_8 = arith.constant 0 : index
    %6 = vector.load %arg2[%c0_6, %c0_7, %c0_8] : memref<8x8x512xbf16, #tpu.memory_space<vmem>>, vector<8x1x512xbf16>
    %7 = vector.shape_cast %6 : vector<8x1x512xbf16> to vector<8x512xbf16>
    %8 = arith.extf %7 : vector<8x512xbf16> to vector<8x512xf32>
    %9 = arith.truncf %4 : vector<8x128xf32> to vector<8x128xbf16>
    %cst = arith.constant dense<0.000000e+00> : vector<8x512xf32>
    %10 = tpu.matmul %9, %3, %cst {dimension_numbers = #tpu.dot_dimension_numbers<[1], [0], [0], [1], [0, 0, 1, 1], [], []>} : vector<8x128xbf16>, vector<128x512xbf16>, vector<8x512xf32> -> vector<8x512xf32>
    %11 = arith.addf %8, %10 : vector<8x512xf32>
    %12 = vector.extract_strided_slice %11 {offsets = [0, 0], sizes = [8, 128], strides = [1, 1]} : vector<8x512xf32> to vector<8x128xf32>
    %13 = math.tanh %12 : vector<8x128xf32>
    %cst_9 = arith.constant 5.000000e-01 : f32
    %14 = vector.broadcast %cst_9 : f32 to vector<8x128xf32>
    %15 = arith.mulf %13, %14 : vector<8x128xf32>
    %cst_10 = arith.constant 5.000000e-01 : f32
    %16 = vector.broadcast %cst_10 : f32 to vector<8x128xf32>
    %17 = arith.addf %15, %16 : vector<8x128xf32>
    %18 = vector.extract_strided_slice %11 {offsets = [0, 128], sizes = [8, 128], strides = [1, 1]} : vector<8x512xf32> to vector<8x128xf32>
    %19 = math.tanh %18 : vector<8x128xf32>
    %cst_11 = arith.constant 5.000000e-01 : f32
    %20 = vector.broadcast %cst_11 : f32 to vector<8x128xf32>
    %21 = arith.mulf %19, %20 : vector<8x128xf32>
    %cst_12 = arith.constant 5.000000e-01 : f32
    %22 = vector.broadcast %cst_12 : f32 to vector<8x128xf32>
    %23 = arith.addf %21, %22 : vector<8x128xf32>
    %24 = vector.extract_strided_slice %11 {offsets = [0, 256], sizes = [8, 128], strides = [1, 1]} : vector<8x512xf32> to vector<8x128xf32>
    %25 = math.tanh %24 : vector<8x128xf32>
    %26 = arith.mulf %23, %5 : vector<8x128xf32>
    %27 = arith.mulf %17, %25 : vector<8x128xf32>
    %28 = arith.addf %26, %27 : vector<8x128xf32>
    %29 = vector.extract_strided_slice %11 {offsets = [0, 384], sizes = [8, 128], strides = [1, 1]} : vector<8x512xf32> to vector<8x128xf32>
    %30 = math.tanh %29 : vector<8x128xf32>
    %cst_13 = arith.constant 5.000000e-01 : f32
    %31 = vector.broadcast %cst_13 : f32 to vector<8x128xf32>
    %32 = arith.mulf %30, %31 : vector<8x128xf32>
    %cst_14 = arith.constant 5.000000e-01 : f32
    %33 = vector.broadcast %cst_14 : f32 to vector<8x128xf32>
    %34 = arith.addf %32, %33 : vector<8x128xf32>
    %35 = math.tanh %28 : vector<8x128xf32>
    %36 = arith.mulf %34, %35 : vector<8x128xf32>
    %37 = arith.truncf %36 : vector<8x128xf32> to vector<8x128xbf16>
    %c0_15 = arith.constant 0 : index
    %c0_16 = arith.constant 0 : index
    %c0_17 = arith.constant 0 : index
    %38 = vector.load %arg6[%c0_15, %c0_16, %c0_17] : memref<8x8x128xbf16, #tpu.memory_space<vmem>>, vector<8x1x128xbf16>
    %39 = vector.shape_cast %38 : vector<8x1x128xbf16> to vector<8x128xbf16>
    %40 = vector.shape_cast %37 : vector<8x128xbf16> to vector<8x1x128xbf16>
    tpu.vector_store %arg6[%c0_15, %c0_16, %c0_17], %40 {strides = array<i32>} : memref<8x8x128xbf16, #tpu.memory_space<vmem>>, vector<8x1x128xbf16>,
    %c0_18 = arith.constant 0 : index
    %c1 = arith.constant 1 : index
    %c0_19 = arith.constant 0 : index
    %41 = vector.load %arg2[%c0_18, %c1, %c0_19] : memref<8x8x512xbf16, #tpu.memory_space<vmem>>, vector<8x1x512xbf16>
    %42 = vector.shape_cast %41 : vector<8x1x512xbf16> to vector<8x512xbf16>
    %43 = arith.extf %42 : vector<8x512xbf16> to vector<8x512xf32>
    %44 = arith.truncf %36 : vector<8x128xf32> to vector<8x128xbf16>
    %cst_20 = arith.constant dense<0.000000e+00> : vector<8x512xf32>
    %45 = tpu.matmul %44, %3, %cst_20 {dimension_numbers = #tpu.dot_dimension_numbers<[1], [0], [0], [1], [0, 0, 1, 1], [], []>} : vector<8x128xbf16>, vector<128x512xbf16>, vector<8x512xf32> -> vector<8x512xf32>
    %46 = arith.addf %43, %45 : vector<8x512xf32>
    %47 = vector.extract_strided_slice %46 {offsets = [0, 0], sizes = [8, 128], strides = [1, 1]} : vector<8x512xf32> to vector<8x128xf32>
    %48 = math.tanh %47 : vector<8x128xf32>
    %cst_21 = arith.constant 5.000000e-01 : f32
    %49 = vector.broadcast %cst_21 : f32 to vector<8x128xf32>
    %50 = arith.mulf %48, %49 : vector<8x128xf32>
    %cst_22 = arith.constant 5.000000e-01 : f32
    %51 = vector.broadcast %cst_22 : f32 to vector<8x128xf32>
    %52 = arith.addf %50, %51 : vector<8x128xf32>
    %53 = vector.extract_strided_slice %46 {offsets = [0, 128], sizes = [8, 128], strides = [1, 1]} : vector<8x512xf32> to vector<8x128xf32>
    %54 = math.tanh %53 : vector<8x128xf32>
    %cst_23 = arith.constant 5.000000e-01 : f32
    %55 = vector.broadcast %cst_23 : f32 to vector<8x128xf32>
    %56 = arith.mulf %54, %55 : vector<8x128xf32>
    %cst_24 = arith.constant 5.000000e-01 : f32
    %57 = vector.broadcast %cst_24 : f32 to vector<8x128xf32>
    %58 = arith.addf %56, %57 : vector<8x128xf32>
    %59 = vector.extract_strided_slice %46 {offsets = [0, 256], sizes = [8, 128], strides = [1, 1]} : vector<8x512xf32> to vector<8x128xf32>
    %60 = math.tanh %59 : vector<8x128xf32>
    %61 = arith.mulf %58, %28 : vector<8x128xf32>
    %62 = arith.mulf %52, %60 : vector<8x128xf32>
    %63 = arith.addf %61, %62 : vector<8x128xf32>
    %64 = vector.extract_strided_slice %46 {offsets = [0, 384], sizes = [8, 128], strides = [1, 1]} : vector<8x512xf32> to vector<8x128xf32>
    %65 = math.tanh %64 : vector<8x128xf32>
    %cst_25 = arith.constant 5.000000e-01 : f32
    %66 = vector.broadcast %cst_25 : f32 to vector<8x128xf32>
    %67 = arith.mulf %65, %66 : vector<8x128xf32>
    %cst_26 = arith.constant 5.000000e-01 : f32
    %68 = vector.broadcast %cst_26 : f32 to vector<8x128xf32>
    %69 = arith.addf %67, %68 : vector<8x128xf32>
    %70 = math.tanh %63 : vector<8x128xf32>
    %71 = arith.mulf %69, %70 : vector<8x128xf32>
    %72 = arith.truncf %71 : vector<8x128xf32> to vector<8x128xbf16>
    %c0_27 = arith.constant 0 : index
    %c1_28 = arith.constant 1 : index
    %c0_29 = arith.constant 0 : index
    %73 = vector.load %arg6[%c0_27, %c1_28, %c0_29] : memref<8x8x128xbf16, #tpu.memory_space<vmem>>, vector<8x1x128xbf16>
    %74 = vector.shape_cast %73 : vector<8x1x128xbf16> to vector<8x128xbf16>
    %75 = vector.shape_cast %72 : vector<8x128xbf16> to vector<8x1x128xbf16>
    tpu.vector_store %arg6[%c0_27, %c1_28, %c0_29], %75 {strides = array<i32>} : memref<8x8x128xbf16, #tpu.memory_space<vmem>>, vector<8x1x128xbf16>,
    %c0_30 = arith.constant 0 : index
    %c2 = arith.constant 2 : index
    %c0_31 = arith.constant 0 : index
    %76 = vector.load %arg2[%c0_30, %c2, %c0_31] : memref<8x8x512xbf16, #tpu.memory_space<vmem>>, vector<8x1x512xbf16>
    %77 = vector.shape_cast %76 : vector<8x1x512xbf16> to vector<8x512xbf16>
    %78 = arith.extf %77 : vector<8x512xbf16> to vector<8x512xf32>
    %79 = arith.truncf %71 : vector<8x128xf32> to vector<8x128xbf16>
    %cst_32 = arith.constant dense<0.000000e+00> : vector<8x512xf32>
    %80 = tpu.matmul %79, %3, %cst_32 {dimension_numbers = #tpu.dot_dimension_numbers<[1], [0], [0], [1], [0, 0, 1, 1], [], []>} : vector<8x128xbf16>, vector<128x512xbf16>, vector<8x512xf32> -> vector<8x512xf32>
    %81 = arith.addf %78, %80 : vector<8x512xf32>
    %82 = vector.extract_strided_slice %81 {offsets = [0, 0], sizes = [8, 128], strides = [1, 1]} : vector<8x512xf32> to vector<8x128xf32>
    %83 = math.tanh %82 : vector<8x128xf32>
    %cst_33 = arith.constant 5.000000e-01 : f32
    %84 = vector.broadcast %cst_33 : f32 to vector<8x128xf32>
    %85 = arith.mulf %83, %84 : vector<8x128xf32>
    %cst_34 = arith.constant 5.000000e-01 : f32
    %86 = vector.broadcast %cst_34 : f32 to vector<8x128xf32>
    %87 = arith.addf %85, %86 : vector<8x128xf32>
    %88 = vector.extract_strided_slice %81 {offsets = [0, 128], sizes = [8, 128], strides = [1, 1]} : vector<8x512xf32> to vector<8x128xf32>
    %89 = math.tanh %88 : vector<8x128xf32>
    %cst_35 = arith.constant 5.000000e-01 : f32
    %90 = vector.broadcast %cst_35 : f32 to vector<8x128xf32>
    %91 = arith.mulf %89, %90 : vector<8x128xf32>
    %cst_36 = arith.constant 5.000000e-01 : f32
    %92 = vector.broadcast %cst_36 : f32 to vector<8x128xf32>
    %93 = arith.addf %91, %92 : vector<8x128xf32>
    %94 = vector.extract_strided_slice %81 {offsets = [0, 256], sizes = [8, 128], strides = [1, 1]} : vector<8x512xf32> to vector<8x128xf32>
    %95 = math.tanh %94 : vector<8x128xf32>
    %96 = arith.mulf %93, %63 : vector<8x128xf32>
    %97 = arith.mulf %87, %95 : vector<8x128xf32>
    %98 = arith.addf %96, %97 : vector<8x128xf32>
    %99 = vector.extract_strided_slice %81 {offsets = [0, 384], sizes = [8, 128], strides = [1, 1]} : vector<8x512xf32> to vector<8x128xf32>
    %100 = math.tanh %99 : vector<8x128xf32>
    %cst_37 = arith.constant 5.000000e-01 : f32
    %101 = vector.broadcast %cst_37 : f32 to vector<8x128xf32>
    %102 = arith.mulf %100, %101 : vector<8x128xf32>
    %cst_38 = arith.constant 5.000000e-01 : f32
    %103 = vector.broadcast %cst_38 : f32 to vector<8x128xf32>
    %104 = arith.addf %102, %103 : vector<8x128xf32>
    %105 = math.tanh %98 : vector<8x128xf32>
    %106 = arith.mulf %104, %105 : vector<8x128xf32>
    %107 = arith.truncf %106 : vector<8x128xf32> to vector<8x128xbf16>
    %c0_39 = arith.constant 0 : index
    %c2_40 = arith.constant 2 : index
    %c0_41 = arith.constant 0 : index
    %108 = vector.load %arg6[%c0_39, %c2_40, %c0_41] : memref<8x8x128xbf16, #tpu.memory_space<vmem>>, vector<8x1x128xbf16>
    %109 = vector.shape_cast %108 : vector<8x1x128xbf16> to vector<8x128xbf16>
    %110 = vector.shape_cast %107 : vector<8x128xbf16> to vector<8x1x128xbf16>
    tpu.vector_store %arg6[%c0_39, %c2_40, %c0_41], %110 {strides = array<i32>} : memref<8x8x128xbf16, #tpu.memory_space<vmem>>, vector<8x1x128xbf16>,
    %c0_42 = arith.constant 0 : index
    %c3 = arith.constant 3 : index
    %c0_43 = arith.constant 0 : index
    %111 = vector.load %arg2[%c0_42, %c3, %c0_43] : memref<8x8x512xbf16, #tpu.memory_space<vmem>>, vector<8x1x512xbf16>
    %112 = vector.shape_cast %111 : vector<8x1x512xbf16> to vector<8x512xbf16>
    %113 = arith.extf %112 : vector<8x512xbf16> to vector<8x512xf32>
    %114 = arith.truncf %106 : vector<8x128xf32> to vector<8x128xbf16>
    %cst_44 = arith.constant dense<0.000000e+00> : vector<8x512xf32>
    %115 = tpu.matmul %114, %3, %cst_44 {dimension_numbers = #tpu.dot_dimension_numbers<[1], [0], [0], [1], [0, 0, 1, 1], [], []>} : vector<8x128xbf16>, vector<128x512xbf16>, vector<8x512xf32> -> vector<8x512xf32>
    %116 = arith.addf %113, %115 : vector<8x512xf32>
    %117 = vector.extract_strided_slice %116 {offsets = [0, 0], sizes = [8, 128], strides = [1, 1]} : vector<8x512xf32> to vector<8x128xf32>
    %118 = math.tanh %117 : vector<8x128xf32>
    %cst_45 = arith.constant 5.000000e-01 : f32
    %119 = vector.broadcast %cst_45 : f32 to vector<8x128xf32>
    %120 = arith.mulf %118, %119 : vector<8x128xf32>
    %cst_46 = arith.constant 5.000000e-01 : f32
    %121 = vector.broadcast %cst_46 : f32 to vector<8x128xf32>
    %122 = arith.addf %120, %121 : vector<8x128xf32>
    %123 = vector.extract_strided_slice %116 {offsets = [0, 128], sizes = [8, 128], strides = [1, 1]} : vector<8x512xf32> to vector<8x128xf32>
    %124 = math.tanh %123 : vector<8x128xf32>
    %cst_47 = arith.constant 5.000000e-01 : f32
    %125 = vector.broadcast %cst_47 : f32 to vector<8x128xf32>
    %126 = arith.mulf %124, %125 : vector<8x128xf32>
    %cst_48 = arith.constant 5.000000e-01 : f32
    %127 = vector.broadcast %cst_48 : f32 to vector<8x128xf32>
    %128 = arith.addf %126, %127 : vector<8x128xf32>
    %129 = vector.extract_strided_slice %116 {offsets = [0, 256], sizes = [8, 128], strides = [1, 1]} : vector<8x512xf32> to vector<8x128xf32>
    %130 = math.tanh %129 : vector<8x128xf32>
    %131 = arith.mulf %128, %98 : vector<8x128xf32>
    %132 = arith.mulf %122, %130 : vector<8x128xf32>
    %133 = arith.addf %131, %132 : vector<8x128xf32>
    %134 = vector.extract_strided_slice %116 {offsets = [0, 384], sizes = [8, 128], strides = [1, 1]} : vector<8x512xf32> to vector<8x128xf32>
    %135 = math.tanh %134 : vector<8x128xf32>
    %cst_49 = arith.constant 5.000000e-01 : f32
    %136 = vector.broadcast %cst_49 : f32 to vector<8x128xf32>
    %137 = arith.mulf %135, %136 : vector<8x128xf32>
    %cst_50 = arith.constant 5.000000e-01 : f32
    %138 = vector.broadcast %cst_50 : f32 to vector<8x128xf32>
    %139 = arith.addf %137, %138 : vector<8x128xf32>
    %140 = math.tanh %133 : vector<8x128xf32>
    %141 = arith.mulf %139, %140 : vector<8x128xf32>
    %142 = arith.truncf %141 : vector<8x128xf32> to vector<8x128xbf16>
    %c0_51 = arith.constant 0 : index
    %c3_52 = arith.constant 3 : index
    %c0_53 = arith.constant 0 : index
    %143 = vector.load %arg6[%c0_51, %c3_52, %c0_53] : memref<8x8x128xbf16, #tpu.memory_space<vmem>>, vector<8x1x128xbf16>
    %144 = vector.shape_cast %143 : vector<8x1x128xbf16> to vector<8x128xbf16>
    %145 = vector.shape_cast %142 : vector<8x128xbf16> to vector<8x1x128xbf16>
    tpu.vector_store %arg6[%c0_51, %c3_52, %c0_53], %145 {strides = array<i32>} : memref<8x8x128xbf16, #tpu.memory_space<vmem>>, vector<8x1x128xbf16>,
    %c0_54 = arith.constant 0 : index
    %c4 = arith.constant 4 : index
    %c0_55 = arith.constant 0 : index
    %146 = vector.load %arg2[%c0_54, %c4, %c0_55] : memref<8x8x512xbf16, #tpu.memory_space<vmem>>, vector<8x1x512xbf16>
    %147 = vector.shape_cast %146 : vector<8x1x512xbf16> to vector<8x512xbf16>
    %148 = arith.extf %147 : vector<8x512xbf16> to vector<8x512xf32>
    %149 = arith.truncf %141 : vector<8x128xf32> to vector<8x128xbf16>
    %cst_56 = arith.constant dense<0.000000e+00> : vector<8x512xf32>
    %150 = tpu.matmul %149, %3, %cst_56 {dimension_numbers = #tpu.dot_dimension_numbers<[1], [0], [0], [1], [0, 0, 1, 1], [], []>} : vector<8x128xbf16>, vector<128x512xbf16>, vector<8x512xf32> -> vector<8x512xf32>
    %151 = arith.addf %148, %150 : vector<8x512xf32>
    %152 = vector.extract_strided_slice %151 {offsets = [0, 0], sizes = [8, 128], strides = [1, 1]} : vector<8x512xf32> to vector<8x128xf32>
    %153 = math.tanh %152 : vector<8x128xf32>
    %cst_57 = arith.constant 5.000000e-01 : f32
    %154 = vector.broadcast %cst_57 : f32 to vector<8x128xf32>
    %155 = arith.mulf %153, %154 : vector<8x128xf32>
    %cst_58 = arith.constant 5.000000e-01 : f32
    %156 = vector.broadcast %cst_58 : f32 to vector<8x128xf32>
    %157 = arith.addf %155, %156 : vector<8x128xf32>
    %158 = vector.extract_strided_slice %151 {offsets = [0, 128], sizes = [8, 128], strides = [1, 1]} : vector<8x512xf32> to vector<8x128xf32>
    %159 = math.tanh %158 : vector<8x128xf32>
    %cst_59 = arith.constant 5.000000e-01 : f32
    %160 = vector.broadcast %cst_59 : f32 to vector<8x128xf32>
    %161 = arith.mulf %159, %160 : vector<8x128xf32>
    %cst_60 = arith.constant 5.000000e-01 : f32
    %162 = vector.broadcast %cst_60 : f32 to vector<8x128xf32>
    %163 = arith.addf %161, %162 : vector<8x128xf32>
    %164 = vector.extract_strided_slice %151 {offsets = [0, 256], sizes = [8, 128], strides = [1, 1]} : vector<8x512xf32> to vector<8x128xf32>
    %165 = math.tanh %164 : vector<8x128xf32>
    %166 = arith.mulf %163, %133 : vector<8x128xf32>
    %167 = arith.mulf %157, %165 : vector<8x128xf32>
    %168 = arith.addf %166, %167 : vector<8x128xf32>
    %169 = vector.extract_strided_slice %151 {offsets = [0, 384], sizes = [8, 128], strides = [1, 1]} : vector<8x512xf32> to vector<8x128xf32>
    %170 = math.tanh %169 : vector<8x128xf32>
    %cst_61 = arith.constant 5.000000e-01 : f32
    %171 = vector.broadcast %cst_61 : f32 to vector<8x128xf32>
    %172 = arith.mulf %170, %171 : vector<8x128xf32>
    %cst_62 = arith.constant 5.000000e-01 : f32
    %173 = vector.broadcast %cst_62 : f32 to vector<8x128xf32>
    %174 = arith.addf %172, %173 : vector<8x128xf32>
    %175 = math.tanh %168 : vector<8x128xf32>
    %176 = arith.mulf %174, %175 : vector<8x128xf32>
    %177 = arith.truncf %176 : vector<8x128xf32> to vector<8x128xbf16>
    %c0_63 = arith.constant 0 : index
    %c4_64 = arith.constant 4 : index
    %c0_65 = arith.constant 0 : index
    %178 = vector.load %arg6[%c0_63, %c4_64, %c0_65] : memref<8x8x128xbf16, #tpu.memory_space<vmem>>, vector<8x1x128xbf16>
    %179 = vector.shape_cast %178 : vector<8x1x128xbf16> to vector<8x128xbf16>
    %180 = vector.shape_cast %177 : vector<8x128xbf16> to vector<8x1x128xbf16>
    tpu.vector_store %arg6[%c0_63, %c4_64, %c0_65], %180 {strides = array<i32>} : memref<8x8x128xbf16, #tpu.memory_space<vmem>>, vector<8x1x128xbf16>,
    %c0_66 = arith.constant 0 : index
    %c5 = arith.constant 5 : index
    %c0_67 = arith.constant 0 : index
    %181 = vector.load %arg2[%c0_66, %c5, %c0_67] : memref<8x8x512xbf16, #tpu.memory_space<vmem>>, vector<8x1x512xbf16>
    %182 = vector.shape_cast %181 : vector<8x1x512xbf16> to vector<8x512xbf16>
    %183 = arith.extf %182 : vector<8x512xbf16> to vector<8x512xf32>
    %184 = arith.truncf %176 : vector<8x128xf32> to vector<8x128xbf16>
    %cst_68 = arith.constant dense<0.000000e+00> : vector<8x512xf32>
    %185 = tpu.matmul %184, %3, %cst_68 {dimension_numbers = #tpu.dot_dimension_numbers<[1], [0], [0], [1], [0, 0, 1, 1], [], []>} : vector<8x128xbf16>, vector<128x512xbf16>, vector<8x512xf32> -> vector<8x512xf32>
    %186 = arith.addf %183, %185 : vector<8x512xf32>
    %187 = vector.extract_strided_slice %186 {offsets = [0, 0], sizes = [8, 128], strides = [1, 1]} : vector<8x512xf32> to vector<8x128xf32>
    %188 = math.tanh %187 : vector<8x128xf32>
    %cst_69 = arith.constant 5.000000e-01 : f32
    %189 = vector.broadcast %cst_69 : f32 to vector<8x128xf32>
    %190 = arith.mulf %188, %189 : vector<8x128xf32>
    %cst_70 = arith.constant 5.000000e-01 : f32
    %191 = vector.broadcast %cst_70 : f32 to vector<8x128xf32>
    %192 = arith.addf %190, %191 : vector<8x128xf32>
    %193 = vector.extract_strided_slice %186 {offsets = [0, 128], sizes = [8, 128], strides = [1, 1]} : vector<8x512xf32> to vector<8x128xf32>
    %194 = math.tanh %193 : vector<8x128xf32>
    %cst_71 = arith.constant 5.000000e-01 : f32
    %195 = vector.broadcast %cst_71 : f32 to vector<8x128xf32>
    %196 = arith.mulf %194, %195 : vector<8x128xf32>
    %cst_72 = arith.constant 5.000000e-01 : f32
    %197 = vector.broadcast %cst_72 : f32 to vector<8x128xf32>
    %198 = arith.addf %196, %197 : vector<8x128xf32>
    %199 = vector.extract_strided_slice %186 {offsets = [0, 256], sizes = [8, 128], strides = [1, 1]} : vector<8x512xf32> to vector<8x128xf32>
    %200 = math.tanh %199 : vector<8x128xf32>
    %201 = arith.mulf %198, %168 : vector<8x128xf32>
    %202 = arith.mulf %192, %200 : vector<8x128xf32>
    %203 = arith.addf %201, %202 : vector<8x128xf32>
    %204 = vector.extract_strided_slice %186 {offsets = [0, 384], sizes = [8, 128], strides = [1, 1]} : vector<8x512xf32> to vector<8x128xf32>
    %205 = math.tanh %204 : vector<8x128xf32>
    %cst_73 = arith.constant 5.000000e-01 : f32
    %206 = vector.broadcast %cst_73 : f32 to vector<8x128xf32>
    %207 = arith.mulf %205, %206 : vector<8x128xf32>
    %cst_74 = arith.constant 5.000000e-01 : f32
    %208 = vector.broadcast %cst_74 : f32 to vector<8x128xf32>
    %209 = arith.addf %207, %208 : vector<8x128xf32>
    %210 = math.tanh %203 : vector<8x128xf32>
    %211 = arith.mulf %209, %210 : vector<8x128xf32>
    %212 = arith.truncf %211 : vector<8x128xf32> to vector<8x128xbf16>
    %c0_75 = arith.constant 0 : index
    %c5_76 = arith.constant 5 : index
    %c0_77 = arith.constant 0 : index
    %213 = vector.load %arg6[%c0_75, %c5_76, %c0_77] : memref<8x8x128xbf16, #tpu.memory_space<vmem>>, vector<8x1x128xbf16>
    %214 = vector.shape_cast %213 : vector<8x1x128xbf16> to vector<8x128xbf16>
    %215 = vector.shape_cast %212 : vector<8x128xbf16> to vector<8x1x128xbf16>
    tpu.vector_store %arg6[%c0_75, %c5_76, %c0_77], %215 {strides = array<i32>} : memref<8x8x128xbf16, #tpu.memory_space<vmem>>, vector<8x1x128xbf16>,
    %c0_78 = arith.constant 0 : index
    %c6 = arith.constant 6 : index
    %c0_79 = arith.constant 0 : index
    %216 = vector.load %arg2[%c0_78, %c6, %c0_79] : memref<8x8x512xbf16, #tpu.memory_space<vmem>>, vector<8x1x512xbf16>
    %217 = vector.shape_cast %216 : vector<8x1x512xbf16> to vector<8x512xbf16>
    %218 = arith.extf %217 : vector<8x512xbf16> to vector<8x512xf32>
    %219 = arith.truncf %211 : vector<8x128xf32> to vector<8x128xbf16>
    %cst_80 = arith.constant dense<0.000000e+00> : vector<8x512xf32>
    %220 = tpu.matmul %219, %3, %cst_80 {dimension_numbers = #tpu.dot_dimension_numbers<[1], [0], [0], [1], [0, 0, 1, 1], [], []>} : vector<8x128xbf16>, vector<128x512xbf16>, vector<8x512xf32> -> vector<8x512xf32>
    %221 = arith.addf %218, %220 : vector<8x512xf32>
    %222 = vector.extract_strided_slice %221 {offsets = [0, 0], sizes = [8, 128], strides = [1, 1]} : vector<8x512xf32> to vector<8x128xf32>
    %223 = math.tanh %222 : vector<8x128xf32>
    %cst_81 = arith.constant 5.000000e-01 : f32
    %224 = vector.broadcast %cst_81 : f32 to vector<8x128xf32>
    %225 = arith.mulf %223, %224 : vector<8x128xf32>
    %cst_82 = arith.constant 5.000000e-01 : f32
    %226 = vector.broadcast %cst_82 : f32 to vector<8x128xf32>
    %227 = arith.addf %225, %226 : vector<8x128xf32>
    %228 = vector.extract_strided_slice %221 {offsets = [0, 128], sizes = [8, 128], strides = [1, 1]} : vector<8x512xf32> to vector<8x128xf32>
    %229 = math.tanh %228 : vector<8x128xf32>
    %cst_83 = arith.constant 5.000000e-01 : f32
    %230 = vector.broadcast %cst_83 : f32 to vector<8x128xf32>
    %231 = arith.mulf %229, %230 : vector<8x128xf32>
    %cst_84 = arith.constant 5.000000e-01 : f32
    %232 = vector.broadcast %cst_84 : f32 to vector<8x128xf32>
    %233 = arith.addf %231, %232 : vector<8x128xf32>
    %234 = vector.extract_strided_slice %221 {offsets = [0, 256], sizes = [8, 128], strides = [1, 1]} : vector<8x512xf32> to vector<8x128xf32>
    %235 = math.tanh %234 : vector<8x128xf32>
    %236 = arith.mulf %233, %203 : vector<8x128xf32>
    %237 = arith.mulf %227, %235 : vector<8x128xf32>
    %238 = arith.addf %236, %237 : vector<8x128xf32>
    %239 = vector.extract_strided_slice %221 {offsets = [0, 384], sizes = [8, 128], strides = [1, 1]} : vector<8x512xf32> to vector<8x128xf32>
    %240 = math.tanh %239 : vector<8x128xf32>
    %cst_85 = arith.constant 5.000000e-01 : f32
    %241 = vector.broadcast %cst_85 : f32 to vector<8x128xf32>
    %242 = arith.mulf %240, %241 : vector<8x128xf32>
    %cst_86 = arith.constant 5.000000e-01 : f32
    %243 = vector.broadcast %cst_86 : f32 to vector<8x128xf32>
    %244 = arith.addf %242, %243 : vector<8x128xf32>
    %245 = math.tanh %238 : vector<8x128xf32>
    %246 = arith.mulf %244, %245 : vector<8x128xf32>
    %247 = arith.truncf %246 : vector<8x128xf32> to vector<8x128xbf16>
    %c0_87 = arith.constant 0 : index
    %c6_88 = arith.constant 6 : index
    %c0_89 = arith.constant 0 : index
    %248 = vector.load %arg6[%c0_87, %c6_88, %c0_89] : memref<8x8x128xbf16, #tpu.memory_space<vmem>>, vector<8x1x128xbf16>
    %249 = vector.shape_cast %248 : vector<8x1x128xbf16> to vector<8x128xbf16>
    %250 = vector.shape_cast %247 : vector<8x128xbf16> to vector<8x1x128xbf16>
    tpu.vector_store %arg6[%c0_87, %c6_88, %c0_89], %250 {strides = array<i32>} : memref<8x8x128xbf16, #tpu.memory_space<vmem>>, vector<8x1x128xbf16>,
    %c0_90 = arith.constant 0 : index
    %c7 = arith.constant 7 : index
    %c0_91 = arith.constant 0 : index
    %251 = vector.load %arg2[%c0_90, %c7, %c0_91] : memref<8x8x512xbf16, #tpu.memory_space<vmem>>, vector<8x1x512xbf16>
    %252 = vector.shape_cast %251 : vector<8x1x512xbf16> to vector<8x512xbf16>
    %253 = arith.extf %252 : vector<8x512xbf16> to vector<8x512xf32>
    %254 = arith.truncf %246 : vector<8x128xf32> to vector<8x128xbf16>
    %cst_92 = arith.constant dense<0.000000e+00> : vector<8x512xf32>
    %255 = tpu.matmul %254, %3, %cst_92 {dimension_numbers = #tpu.dot_dimension_numbers<[1], [0], [0], [1], [0, 0, 1, 1], [], []>} : vector<8x128xbf16>, vector<128x512xbf16>, vector<8x512xf32> -> vector<8x512xf32>
    %256 = arith.addf %253, %255 : vector<8x512xf32>
    %257 = vector.extract_strided_slice %256 {offsets = [0, 0], sizes = [8, 128], strides = [1, 1]} : vector<8x512xf32> to vector<8x128xf32>
    %258 = math.tanh %257 : vector<8x128xf32>
    %cst_93 = arith.constant 5.000000e-01 : f32
    %259 = vector.broadcast %cst_93 : f32 to vector<8x128xf32>
    %260 = arith.mulf %258, %259 : vector<8x128xf32>
    %cst_94 = arith.constant 5.000000e-01 : f32
    %261 = vector.broadcast %cst_94 : f32 to vector<8x128xf32>
    %262 = arith.addf %260, %261 : vector<8x128xf32>
    %263 = vector.extract_strided_slice %256 {offsets = [0, 128], sizes = [8, 128], strides = [1, 1]} : vector<8x512xf32> to vector<8x128xf32>
    %264 = math.tanh %263 : vector<8x128xf32>
    %cst_95 = arith.constant 5.000000e-01 : f32
    %265 = vector.broadcast %cst_95 : f32 to vector<8x128xf32>
    %266 = arith.mulf %264, %265 : vector<8x128xf32>
    %cst_96 = arith.constant 5.000000e-01 : f32
    %267 = vector.broadcast %cst_96 : f32 to vector<8x128xf32>
    %268 = arith.addf %266, %267 : vector<8x128xf32>
    %269 = vector.extract_strided_slice %256 {offsets = [0, 256], sizes = [8, 128], strides = [1, 1]} : vector<8x512xf32> to vector<8x128xf32>
    %270 = math.tanh %269 : vector<8x128xf32>
    %271 = arith.mulf %268, %238 : vector<8x128xf32>
    %272 = arith.mulf %262, %270 : vector<8x128xf32>
    %273 = arith.addf %271, %272 : vector<8x128xf32>
    %274 = vector.extract_strided_slice %256 {offsets = [0, 384], sizes = [8, 128], strides = [1, 1]} : vector<8x512xf32> to vector<8x128xf32>
    %275 = math.tanh %274 : vector<8x128xf32>
    %cst_97 = arith.constant 5.000000e-01 : f32
    %276 = vector.broadcast %cst_97 : f32 to vector<8x128xf32>
    %277 = arith.mulf %275, %276 : vector<8x128xf32>
    %cst_98 = arith.constant 5.000000e-01 : f32
    %278 = vector.broadcast %cst_98 : f32 to vector<8x128xf32>
    %279 = arith.addf %277, %278 : vector<8x128xf32>
    %280 = math.tanh %273 : vector<8x128xf32>
    %281 = arith.mulf %279, %280 : vector<8x128xf32>
    %282 = arith.truncf %281 : vector<8x128xf32> to vector<8x128xbf16>
    %c0_99 = arith.constant 0 : index
    %c7_100 = arith.constant 7 : index
    %c0_101 = arith.constant 0 : index
    %283 = vector.load %arg6[%c0_99, %c7_100, %c0_101] : memref<8x8x128xbf16, #tpu.memory_space<vmem>>, vector<8x1x128xbf16>
    %284 = vector.shape_cast %283 : vector<8x1x128xbf16> to vector<8x128xbf16>
    %285 = vector.shape_cast %282 : vector<8x128xbf16> to vector<8x1x128xbf16>
    tpu.vector_store %arg6[%c0_99, %c7_100, %c0_101], %285 {strides = array<i32>} : memref<8x8x128xbf16, #tpu.memory_space<vmem>>, vector<8x1x128xbf16>,
    %c0_102 = arith.constant 0 : index
    %c0_103 = arith.constant 0 : index
    %286 = vector.load %arg7[%c0_102, %c0_103] : memref<8x128xf32, #tpu.memory_space<vmem>>, vector<8x128xf32>
    tpu.vector_store %arg7[%c0_102, %c0_103], %281 {strides = array<i32>} : memref<8x128xf32, #tpu.memory_space<vmem>>, vector<8x128xf32>,
    %c0_104 = arith.constant 0 : index
    %c0_105 = arith.constant 0 : index
    %287 = vector.load %arg8[%c0_104, %c0_105] : memref<8x128xf32, #tpu.memory_space<vmem>>, vector<8x128xf32>
    tpu.vector_store %arg8[%c0_104, %c0_105], %273 {strides = array<i32>} : memref<8x128xf32, #tpu.memory_space<vmem>>, vector<8x128xf32>,
    return
  }
  func.func @transform_0(%arg0: i32, %arg1: i32) -> (i32, i32, i32) {
    %c0_i32 = arith.constant 0 : i32
    %c0_i32_0 = arith.constant 0 : i32
    return %arg0, %arg1, %c0_i32 : i32, i32, i32
  }
  func.func @transform_2(%arg0: i32, %arg1: i32) -> (i32, i32) {
    %c0_i32 = arith.constant 0 : i32
    %c0_i32_0 = arith.constant 0 : i32
    return %arg0, %c0_i32 : i32, i32
  }
  func.func @transform_3(%arg0: i32, %arg1: i32) -> (i32, i32) {
    %c0_i32 = arith.constant 0 : i32
    %c0_i32_0 = arith.constant 0 : i32
    return %arg0, %c0_i32 : i32, i32
  }
  func.func @transform_4(%arg0: i32, %arg1: i32) -> (i32, i32, i32) {
    %c0_i32 = arith.constant 0 : i32
    %c0_i32_0 = arith.constant 0 : i32
    return %arg0, %arg1, %c0_i32 : i32, i32, i32
  }
  func.func @transform_5(%arg0: i32, %arg1: i32) -> (i32, i32) {
    %c0_i32 = arith.constant 0 : i32
    %c0_i32_0 = arith.constant 0 : i32
    return %arg0, %c0_i32 : i32, i32
  }
  func.func @transform_6(%arg0: i32, %arg1: i32) -> (i32, i32) {
    %c0_i32 = arith.constant 0 : i32
    %c0_i32_0 = arith.constant 0 : i32
    return %arg0, %c0_i32 : i32, i32
  }
}

</mosaic_0001>

<bundles_post_ra>
// kernel: tpu_custom_call.1
= control target key start
LH: loop header
LB: loop body
LE: loop exit
PB: predicated region body
PF: predicated region fallthrough
CT: control target
= control target key end

     0   :  { %12 = vsyncpa [#allocation5], 0  ;;  %s6702_s0 = inlined_call_operand.hbm [shape: bf16[8,8,512], index: 0, kind: input, shape index: {}]   ;;  %s6703_s1 = inlined_call_operand.hbm [shape: bf16[128,512], index: 1, kind: input, shape index: {}]   ;;  %s6704_s2 = inlined_call_operand.hbm [shape: f32[8,128], index: 2, kind: input, shape index: {}]   ;;  %s6705_s3 = inlined_call_operand.hbm [shape: f32[8,128], index: 3, kind: input, shape index: {}]   ;;  %s6706_s4 = inlined_call_operand.hbm [shape: bf16[8,8,128], index: 4, kind: output, shape index: {0}]   ;;  %s6707_s5 = inlined_call_operand.hbm [shape: f32[8,128], index: 5, kind: output, shape index: {1}]   ;;  %s6708_s6 = inlined_call_operand.hbm [shape: f32[8,128], index: 6, kind: output, shape index: {2}]  }
   0x1   :  { %13 = vsyncpa [#allocation8], 0 }
   0x2   :  { %14 = vsyncpa [#allocation6], 0 }
   0x3   :  { %15 = vsyncpa [#allocation12], 0  ;;  %s4815_s21 = smov [#allocation7]   ;;  %s4816_s23 = smov [#allocation4]  }
   0x4   :  { %s34_s22 = sshll.u32 %s4815_s21, 4  ;;  %s21_s24 = sshll.u32 %s4816_s23, 4  ;;  %s35_s22 = int_to_ptr.vmem [resolvable:$true] %s34_s22  ;;  %s22_s24 = int_to_ptr.vmem [resolvable:$true] %s21_s24 }
   0x5   :  { %s4673_s25 = scalar_lea.vmem %s35_s22, 128  ;;  %p4678_p1 = scmp.lt.s32.totalorder %s35_s22, %s35_s22 }
   0x6   :  { %p4674_p0 = scmp.ne.s32.totalorder %s35_s22, %s4673_s25  ;;  %p4679_p2 = scmp.lt.s32.totalorder %s4673_s25, %s4673_s25 }
   0x8   :  { %p4680_p3 = por %p4679_p2, %p4678_p1 }
   0xa   :  { %p4681_p4 = pnand %p4680_p3, %p4674_p0 }
   0xc   :  { %4684 = shalt.err (!%p4681_p4)
}
   0xd   :  { %37 = dma.hbm_to_vmem [thread:$0]  %s6704_s2, 128, %s35_s22, [#allocation8]  }
   0xe   :  { %s4693_s28 = scalar_lea.vmem %s22_s24, 2048  ;;  %p4698_p6 = scmp.lt.s32.totalorder %s22_s24, %s22_s24 }
   0xf   :  { %p4694_p5 = scmp.ne.s32.totalorder %s22_s24, %s4693_s28  ;;  %p4699_p7 = scmp.lt.s32.totalorder %s4693_s28, %s4693_s28 }
  0x11   :  { %p4700_p8 = por %p4699_p7, %p4698_p6 }
  0x13   :  { %p4701_p9 = pnand %p4700_p8, %p4694_p5 }
  0x15   :  { %4704 = shalt.err (!%p4701_p9)
}
  0x16   :  { %s4817_s29 = smov 256   ;;  %s4818_s30 = smov 16  }
  0x17   :  { %27 = dma.hbm_to_vmem [thread:$0]  %s6702_s0, 2048, %s22_s24, [#allocation5], %s4817_s29, %s4817_s29, %s4818_s30  }
  0x18   :  { %s4819_s9 = smov [#allocation9]  }
  0x19   :  { %s44_s10 = sshll.u32 %s4819_s9, 4  ;;  %s45_s10 = int_to_ptr.vmem [resolvable:$true] %s44_s10 }
  0x1a   :  { %s4713_s11 = scalar_lea.vmem %s45_s10, 128  ;;  %p4718_p11 = scmp.lt.s32.totalorder %s45_s10, %s45_s10 }
  0x1b   :  { %p4714_p10 = scmp.ne.s32.totalorder %s45_s10, %s4713_s11  ;;  %p4719_p12 = scmp.lt.s32.totalorder %s4713_s11, %s4713_s11 }
  0x1d   :  { %p4720_p13 = por %p4719_p12, %p4718_p11 }
  0x1f   :  { %p4721_p0 = pnand %p4720_p13, %p4714_p10 }
  0x21   :  { %4724 = shalt.err (!%p4721_p0)
}
  0x22   :  { %47 = dma.hbm_to_vmem [thread:$0]  %s6705_s3, 128, %s45_s10, [#allocation8]  }
  0x23   :  { %4805 = dma.done.wait [#allocation5], 2048  }
  0x24   :  { %4806 = vsyncadd [#allocation5], 4294965248 }
  0x25   :  { %4807 = dma.done.wait [#allocation8], 256  }
  0x26   :  { %4808 = vsyncadd [#allocation8], 4294967040  ;;  %s4820_s13 = smov [#allocation2]  }
  0x27   :  { %s69_s0 = sshll.u32 %s4820_s13, 4  ;;  %s70_s0 = int_to_ptr.vmem [resolvable:$true] %s69_s0 }
  0x28   :  { %s4733_s14 = scalar_lea.vmem %s70_s0, 4096  ;;  %p4738_p2 = scmp.lt.s32.totalorder %s70_s0, %s70_s0 }
  0x29   :  { %p4734_p1 = scmp.ne.s32.totalorder %s70_s0, %s4733_s14  ;;  %p4739_p3 = scmp.lt.s32.totalorder %s4733_s14, %s4733_s14 }
  0x2b   :  { %p4740_p4 = por %p4739_p3, %p4738_p2 }
  0x2d   :  { %p4741_p5 = pnand %p4740_p4, %p4734_p1 }
  0x2f   :  { %4744 = shalt.err (!%p4741_p5)  }
  0x30   :  { %72 = dma.hbm_to_vmem [thread:$0]  %s6703_s1, 4096, %s70_s0, [#allocation3]  ;;  %v73_v0 = vld [vmem:[#allocation7] sm:$0xff]  ;;  %v75_v1 = vld [vmem:[#allocation9] sm:$0xff] }
  0x31   :  { %74 = vst [vmem:[#allocation11] sm:$0xff] %v73_v0  ;;  %76 = vst [vmem:[#allocation13] sm:$0xff] %v75_v1 }
  0x32   :  { %4809 = dma.done.wait [#allocation3], 4096 }
  0x33   :  { %4810 = vsyncadd [#allocation3], 4294963200  ;;  %v6709_v2 = vmov 0   ;;  %v4876_v3 = vld [vmem:[#allocation2 + $0xe4] ss:$16 sps:$4 sm:$0xff]   ;;  %vm646_vm0 = vcmask 1040384  }
  0x34   :  { %356 = vmatprep.mubr.bf16.mxu0 %v6709_v2  ;;  %397 = vmatprep.mubr.bf16.mxu1 %v6709_v2  ;;  %v4878_v4 = vld [vmem:[#allocation2 + $0xec] ss:$16 sps:$4 sm:$0xff]   ;;  %v4881_v5 = vld [vmem:[#allocation2 + $0xe0] ss:$16 sps:$4 sm:$0xff]   ;;  %v4883_v6 = vld [vmem:[#allocation2 + $0xe8] ss:$16 sps:$4 sm:$0xff]  }
  0x35   :  { %324 = vmatprep.subr.bf16.mxu0 %v4876_v3  ;;  %365 = vmatprep.subr.bf16.mxu1 %v4878_v4  ;;  %v4886_v7 = vld [vmem:[#allocation2 + $0xc4] ss:$16 sps:$4 sm:$0xff]   ;;  %v4890_v8 = vld [vmem:[#allocation2 + $0xcc] ss:$16 sps:$4 sm:$0xff]   ;;  %v4892_v9 = vld [vmem:[#allocation2 + $0xc0] ss:$16 sps:$4 sm:$0xff]  }
  0x36   :  { %325 = vmatpush1.bf16.msra.mxu0 %v4881_v5  ;;  %366 = vmatpush1.bf16.msra.mxu1 %v4883_v6  ;;  %v4895_v10 = vld [vmem:[#allocation2 + $0xc8] ss:$16 sps:$4 sm:$0xff]   ;;  %v4898_v11 = vld [vmem:[#allocation2 + $0xa4] ss:$16 sps:$4 sm:$0xff]   ;;  %v4900_v12 = vld [vmem:[#allocation2 + $0xac] ss:$16 sps:$4 sm:$0xff]  }
  0x37   :  { %326 = vmatprep.subr.bf16.mxu0 %v4886_v7  ;;  %367 = vmatprep.subr.bf16.mxu1 %v4890_v8  ;;  %v4902_v13 = vld [vmem:[#allocation2 + $0xa0] ss:$16 sps:$4 sm:$0xff]   ;;  %v4904_v14 = vld [vmem:[#allocation2 + $0xa8] ss:$16 sps:$4 sm:$0xff]   ;;  %v4908_v15 = vld [vmem:[#allocation2 + $0x84] ss:$16 sps:$4 sm:$0xff]  }
  0x38   :  { %v4912_v16 = vld [vmem:[#allocation2 + $0x8c] ss:$16 sps:$4 sm:$0xff]   ;;  %v4914_v17 = vld [vmem:[#allocation2 + $0x80] ss:$16 sps:$4 sm:$0xff]   ;;  %v4918_v18 = vld [vmem:[#allocation2 + $0x88] ss:$16 sps:$4 sm:$0xff]  }
  0x39   :  { %6767 = vst [vmem:[#allocation23_spill] sm:$0xff] %v4918_v18  ;;  %v4920_v19 = vld [vmem:[#allocation2 + $0x64] ss:$16 sps:$4 sm:$0xff]   ;;  %v4924_v20 = vld [vmem:[#allocation2 + $0x6c] ss:$16 sps:$4 sm:$0xff]   ;;  %vm738_vm2 = vcmask 1041409  }
  0x3a   :  { %327 = vmatpush1.bf16.msra.mxu0 %v4892_v9  ;;  %368 = vmatpush1.bf16.msra.mxu1 %v4895_v10  ;;  %6768 = vst [vmem:[#allocation24_spill] sm:$0xff] %v4920_v19  ;;  %6769 = vst [vmem:[#allocation25_spill] sm:$0xff] %v4924_v20  ;;  %v4926_v21 = vld [vmem:[#allocation2 + $0x60] ss:$16 sps:$4 sm:$0xff]   ;;  %v4928_v22 = vld [vmem:[#allocation2 + $0x68] ss:$16 sps:$4 sm:$0xff]  }
  0x3b   :  { %328 = vmatprep.subr.bf16.mxu0 %v4898_v11  ;;  %369 = vmatprep.subr.bf16.mxu1 %v4900_v12  ;;  %6770 = vst [vmem:[#allocation26_spill] sm:$0xff] %v4926_v21  ;;  %6771 = vst [vmem:[#allocation27_spill] sm:$0xff] %v4928_v22  ;;  %v4932_v23 = vld [vmem:[#allocation2 + $0x44] ss:$16 sps:$4 sm:$0xff]   ;;  %v4936_v24 = vld [vmem:[#allocation2 + $0x4c] ss:$16 sps:$4 sm:$0xff]  }
  0x3c   :  { %6772 = vst [vmem:[#allocation28_spill] sm:$0xff] %v4932_v23  ;;  %6773 = vst [vmem:[#allocation29_spill] sm:$0xff] %v4936_v24  ;;  %v4940_v25 = vld [vmem:[#allocation2 + $0x40] ss:$16 sps:$4 sm:$0xff]   ;;  %v4942_v26 = vld [vmem:[#allocation2 + $0x48] ss:$16 sps:$4 sm:$0xff]  }
  0x3d   :  { %6774 = vst [vmem:[#allocation30_spill] sm:$0xff] %v4940_v25  ;;  %6775 = vst [vmem:[#allocation31_spill] sm:$0xff] %v4942_v26  ;;  %v4946_v27 = vld [vmem:[#allocation2 + $0x24] ss:$16 sps:$4 sm:$0xff]   ;;  %v4948_v28 = vld [vmem:[#allocation2 + $0x2c] ss:$16 sps:$4 sm:$0xff]  }
  0x3e   :  { %329 = vmatpush1.bf16.msra.mxu0 %v4902_v13  ;;  %370 = vmatpush1.bf16.msra.mxu1 %v4904_v14  ;;  %6776 = vst [vmem:[#allocation32_spill] sm:$0xff] %v4946_v27  ;;  %6777 = vst [vmem:[#allocation33_spill] sm:$0xff] %v4948_v28  ;;  %v4952_v29 = vld [vmem:[#allocation2 + $0x20] ss:$16 sps:$4 sm:$0xff]   ;;  %v4954_v30 = vld [vmem:[#allocation2 + $0x28] ss:$16 sps:$4 sm:$0xff]  }
  0x3f   :  { %330 = vmatprep.subr.bf16.mxu0 %v4908_v15  ;;  %371 = vmatprep.subr.bf16.mxu1 %v4912_v16  ;;  %6778 = vst [vmem:[#allocation34_spill] sm:$0xff] %v4952_v29  ;;  %6779 = vst [vmem:[#allocation35_spill] sm:$0xff] %v4954_v30  ;;  %v4958_v31 = vld [vmem:[#allocation2 + $0x4] ss:$16 sps:$4 sm:$0xff]   ;;  %v4960_v32 = vld [vmem:[#allocation2 + $0xc] ss:$16 sps:$4 sm:$0xff]  }
  0x40   :  { %6780 = vst [vmem:[#allocation36_spill] sm:$0xff] %v4958_v31  ;;  %6781 = vst [vmem:[#allocation37_spill] sm:$0xff] %v4960_v32  ;;  %v4964_v33 = vld [vmem:[#allocation2] ss:$16 sps:$4 sm:$0xff]   ;;  %v4966_v34 = vld [vmem:[#allocation2 + $0x8] ss:$16 sps:$4 sm:$0xff]  }
  0x41   :  { %6782 = vst [vmem:[#allocation38_spill] sm:$0xff] %v4964_v33  ;;  %6783 = vst [vmem:[#allocation39_spill] sm:$0xff] %v4966_v34  ;;  %v113_v35 = vld [vmem:[#allocation11] sm:$0xff]  ;;  %v5008_v37 = vld [vmem:[#allocation4] sm:$0x11]  ;;  %vm741_vm4 = vcmask 1042434  }
  0x42   :  { %331 = vmatpush1.bf16.msra.mxu0 %v4914_v17  ;;  %372 = vmatpush1.bf16.msra.mxu1 %v4918_v18  ;;  %v163_v36 = vpack.c.bf16 %v113_v35, %v113_v35  ;;  %v5010_v38 = vld [vmem:[#allocation4 + $0x10] sm:$0x11]  ;;  %v5012_v39 = vld [vmem:[#allocation4 + $0x20] sm:$0x11]  ;;  %v5024_v45 = vld [vmem:[#allocation4 + $0x8] sm:$0x11]  ;;  %v131_v46 = vunpack.c.l.bf16 %v5008_v37 }
  0x43   :  { %332 = vmatprep.subr.bf16.mxu0 %v4920_v19  ;;  %373 = vmatprep.subr.bf16.mxu1 %v4924_v20  ;;  %v5014_v40 = vld [vmem:[#allocation4 + $0x30] sm:$0x11]  ;;  %v5016_v41 = vld [vmem:[#allocation4 + $0x40] sm:$0x11]  ;;  %v5027_v47 = vld [vmem:[#allocation4 + $0x18] sm:$0x11]  ;;  %v135_v48 = vunpack.c.l.bf16 %v5010_v38  ;;  %v139_v49 = vunpack.c.l.bf16 %v5012_v39  ;;  %v133_v60 = vunpack.c.l.bf16 %v5024_v45 }
  0x44   :  { %v5018_v42 = vld [vmem:[#allocation4 + $0x50] sm:$0x11]  ;;  %v5020_v43 = vld [vmem:[#allocation4 + $0x60] sm:$0x11]  ;;  %v143_v50 = vunpack.c.l.bf16 %v5014_v40  ;;  %v147_v51 = vunpack.c.l.bf16 %v5016_v41  ;;  %v5033_v52 = vld [vmem:[#allocation4 + $0x28] sm:$0x11] }
  0x45   :  { %v5022_v44 = vld [vmem:[#allocation4 + $0x70] sm:$0x11]  ;;  %v5035_v53 = vld [vmem:[#allocation4 + $0x38] sm:$0x11]  ;;  %v151_v54 = vunpack.c.l.bf16 %v5018_v42  ;;  %v155_v55 = vunpack.c.l.bf16 %v5020_v43  ;;  %v5040_v58 = vld [vmem:[#allocation4 + $0x48] sm:$0x11] }
  0x46   :  { %333 = vmatpush1.bf16.msra.mxu0 %v4926_v21  ;;  %374 = vmatpush1.bf16.msra.mxu1 %v4928_v22  ;;  %v159_v56 = vunpack.c.l.bf16 %v5022_v44  ;;  %v5042_v59 = vld [vmem:[#allocation4 + $0x58] sm:$0x11]  ;;  %v5047_v1 = vld [vmem:[#allocation4 + $0x68] sm:$0x11]  ;;  %vm647_vm1 = vsmask.f32 256 }
  0x47   :  { %334 = vmatprep.subr.bf16.mxu0 %v4932_v23  ;;  %375 = vmatprep.subr.bf16.mxu1 %v4936_v24  ;;  %vm5171_vm3 = vmand %vm646_vm0, %vm647_vm1  ;;  %vm744_vm5 = vcmask 1043459   ;;  %vm747_vm6 = vcmask 1044484   ;;  %vm750_vm7 = vcmask 1045509   ;;  %vm753_vm8 = vcmask 1046534   ;;  %s4822_s1 = smov [#allocation11]   ;;  %s4823_s17 = smov [#allocation10]  }
  0x48   :  { %vm756_vm9 = vcmask 1047559   ;;  %vm1090_vm10 = vsmask.f32 7938  ;;  %vm1527_vm12 = vsmask.f32 1280  ;;  %s3803_s3 = sshll.u32 %s4822_s1, 4  ;;  %s3804_s3 = int_to_ptr.vmem [resolvable:$true] %s3803_s3 }
  0x49   :  { %vm5383_vm11 = vmand %vm646_vm0, %vm1090_vm10  ;;  %vm1963_vm14 = vsmask.f32 7942  ;;  %vm2400_vm0 = vsmask.f32 2304  ;;  %s3790_s18 = sshll.u32 %s4823_s17, 4  ;;  %s4824_s19 = smov [#allocation13]   ;;  %s3791_s18 = int_to_ptr.vmem [resolvable:$true] %s3790_s18 }
  0x4a   :  { %335 = vmatpush1.bf16.msra.mxu0 %v4940_v25  ;;  %376 = vmatpush1.bf16.msra.mxu1 %v4942_v26  ;;  %vm5648_vm13 = vmand %vm738_vm2, %vm1527_vm12  ;;  %s3813_s20 = sshll.u32 %s4824_s19, 4  ;;  %s4745_s21 = scalar_lea.vmem %s3804_s3, 128  ;;  %s3814_s20 = int_to_ptr.vmem [resolvable:$true] %s3813_s20 }
  0x4b   :  { %336 = vmatprep.subr.bf16.mxu0 %v4946_v27  ;;  %377 = vmatprep.subr.bf16.mxu1 %v4948_v28  ;;  %vm5858_vm15 = vmand %vm738_vm2, %vm1963_vm14  ;;  %p4746_p6 = scmp.ne.s32.totalorder %s3804_s3, %s4745_s21  ;;  %p4750_p7 = scmp.lt.s32.totalorder %s3804_s3, %s3804_s3 }
  0x4c   :  { %vm6125_vm1 = vmand %vm741_vm4, %vm2400_vm0  ;;  %p4751_p8 = scmp.lt.s32.totalorder %s4745_s21, %s4745_s21 }
  0x4e   :  { %337 = vmatpush1.bf16.msra.mxu0 %v4952_v29  ;;  %378 = vmatpush1.bf16.msra.mxu1 %v4954_v30  ;;  %p4752_p9 = por %p4751_p8, %p4750_p7 }
  0x4f   :  { %338 = vmatprep.subr.bf16.mxu0 %v4958_v31  ;;  %379 = vmatprep.subr.bf16.mxu1 %v4960_v32 }
  0x50   :  { %p4753_p10 = pnand %p4752_p9, %p4746_p6 }
  0x52   :  { %339 = vmatpush1.bf16.msra.mxu0 %v4964_v33  ;;  %380 = vmatpush1.bf16.msra.mxu1 %v4966_v34 }
  0x53   :  { %760 = vmatprep.subr.bf16.mxu0 %v4876_v3  ;;  %801 = vmatprep.subr.bf16.mxu1 %v4878_v4 }
  0x55   :  { %357 = vmatmul.mubr.bf16.vlgmr.msra.gmra.mxu0 %v163_v36  ;;  %398 = vmatmul.mubr.bf16.vlgmr.msra.gmra.mxu1 %v163_v36  ;;  %v5050_v36 = vld [vmem:[#allocation4 + $0x78] sm:$0x11] }
  0x56   :  { %761 = vmatpush1.bf16.msra.mxu0 %v4881_v5  ;;  %802 = vmatpush1.bf16.msra.mxu1 %v4883_v6 }
  0x57   :  { %762 = vmatprep.subr.bf16.mxu0 %v4886_v7  ;;  %803 = vmatprep.subr.bf16.mxu1 %v4890_v8 }
  0x58   :  { %792 = vmatprep.mubr.bf16.mxu0 %v6709_v2  ;;  %833 = vmatprep.mubr.bf16.mxu1 %v6709_v2  ;;  %v141_v2 = vunpack.c.l.bf16 %v5033_v52 }
  0x5a   :  { %763 = vmatpush1.bf16.msra.mxu0 %v4892_v9  ;;  %804 = vmatpush1.bf16.msra.mxu1 %v4895_v10 }
  0x5b   :  { %764 = vmatprep.subr.bf16.mxu0 %v4898_v11  ;;  %805 = vmatprep.subr.bf16.mxu1 %v4900_v12 }
  0x5e   :  { %765 = vmatpush1.bf16.msra.mxu0 %v4902_v13  ;;  %806 = vmatpush1.bf16.msra.mxu1 %v4904_v14 }
  0x5f   :  { %766 = vmatprep.subr.bf16.mxu0 %v4908_v15  ;;  %807 = vmatprep.subr.bf16.mxu1 %v4912_v16 }
  0x62   :  { %767 = vmatpush1.bf16.msra.mxu0 %v4914_v17  ;;  %808 = vmatpush1.bf16.msra.mxu1 %v4918_v18 }
  0x63   :  { %768 = vmatprep.subr.bf16.mxu0 %v4920_v19  ;;  %809 = vmatprep.subr.bf16.mxu1 %v4924_v20  ;;  %v161_v20 = vunpack.c.l.bf16 %v5050_v36  ;;  %v136_v19 = vunpack.c.h.bf16 %v5010_v38  ;;  %v152_v38 = vunpack.c.h.bf16 %v5018_v42  ;;  %v142_v42 = vunpack.c.h.bf16 %v5033_v52 }
  0x66   :  { %769 = vmatpush1.bf16.msra.mxu0 %v4926_v21  ;;  %810 = vmatpush1.bf16.msra.mxu1 %v4928_v22 }
  0x67   :  { %770 = vmatprep.subr.bf16.mxu0 %v4932_v23  ;;  %811 = vmatprep.subr.bf16.mxu1 %v4936_v24 }
  0x6a   :  { %771 = vmatpush1.bf16.msra.mxu0 %v4940_v25  ;;  %812 = vmatpush1.bf16.msra.mxu1 %v4942_v26 }
  0x6b   :  { %772 = vmatprep.subr.bf16.mxu0 %v4946_v27  ;;  %813 = vmatprep.subr.bf16.mxu1 %v4948_v28  ;;  %v132_v28 = vunpack.c.h.bf16 %v5008_v37  ;;  %v144_v37 = vunpack.c.h.bf16 %v5014_v40  ;;  %v156_v40 = vunpack.c.h.bf16 %v5020_v43 }
  0x6e   :  { %773 = vmatpush1.bf16.msra.mxu0 %v4952_v29  ;;  %814 = vmatpush1.bf16.msra.mxu1 %v4954_v30  ;;  %v149_v29 = vunpack.c.l.bf16 %v5040_v58 }
  0x6f   :  { %774 = vmatprep.subr.bf16.mxu0 %v4958_v31  ;;  %815 = vmatprep.subr.bf16.mxu1 %v4960_v32 }
  0x72   :  { %775 = vmatpush1.bf16.msra.mxu0 %v4964_v33  ;;  %816 = vmatpush1.bf16.msra.mxu1 %v4966_v34  ;;  %v145_v34 = vunpack.c.l.bf16 %v5035_v53 }
  0x73   :  { %1196 = vmatprep.subr.bf16.mxu0 %v4876_v3  ;;  %1237 = vmatprep.subr.bf16.mxu1 %v4878_v4  ;;  %v137_v3 = vunpack.c.l.bf16 %v5027_v47 }
 0x115   :  { %v358_v57 = vpop.f32.mrf.mxu0  ;;  %v5045_v61 = vpop.f32.mrf.mxu1 }
 0x116   :  { %v410_v62 = vrot.slane %v358_v57, 1  ;;  %v414_v63 = vrot.slane %v358_v57, 2  ;;  %v418_v0 = vrot.slane %v358_v57, 3  ;;  %v422_v4 = vrot.slane %v358_v57, 4 }
 0x117   :  { %v470_v35 = vadd.f32 %v358_v57, %v131_v46  ;;  %v5054_v33 = vpop.f32.mrf.mxu0  ;;  %v5056_v32 = vpop.f32.mrf.mxu1  ;;  %v426_v31 = vrot.slane %v358_v57, 5  ;;  %v430_v27 = vrot.slane %v358_v57, 6  ;;  %v153_v46 = vunpack.c.l.bf16 %v5042_v59 }
 0x118   :  { %v474_v30 = vadd.f32 %v410_v62, %v135_v48  ;;  %v478_v26 = vadd.f32 %v414_v63, %v139_v49  ;;  %v434_v22 = vrot.slane %v358_v57, 7  ;;  %v482_v21 = vadd.f32 %v418_v0, %v143_v50 }
 0x119   :  { %v362_v24 = vpop.f32.mrf.mxu0  ;;  %v403_v23 = vpop.f32.mrf.mxu1  ;;  %v486_v18 = vadd.f32 %v422_v4, %v147_v51  ;;  %3929 = vtanh.f32 %v470_v35  ;;  %v140_v48 = vunpack.c.h.bf16 %v5012_v39  ;;  %v490_v63 = vadd.f32 %v426_v31, %v151_v54 }
 0x11a   :  { %3931 = vtanh.f32 %v474_v30  ;;  %v412_v25 = vrot.slane %v5045_v61, 1  ;;  %v148_v23 = vunpack.c.h.bf16 %v5016_v41  ;;  %v494_v24 = vadd.f32 %v430_v27, %v155_v55 }
 0x11b   :  { %v363_v62 = vpop.f32.mrf.mxu0  ;;  %v404_v49 = vpop.f32.mrf.mxu1  ;;  %3933 = vtanh.f32 %v478_v26  ;;  %v416_v50 = vrot.slane %v5045_v61, 2  ;;  %v498_v51 = vadd.f32 %v434_v22, %v159_v56  ;;  %v420_v39 = vrot.slane %v5045_v61, 3 }
 0x11c   :  { %3935 = vtanh.f32 %v482_v21  ;;  %v424_v31 = vrot.slane %v5045_v61, 4  ;;  %v472_v30 = vadd.f32 %v5045_v61, %v133_v60  ;;  %v160_v54 = vunpack.c.h.bf16 %v5022_v44  ;;  %v5083_v60 = vld [vmem:[#allocation13] sm:$0xff] }
 0x11d   :  { %3937 = vtanh.f32 %v486_v18  ;;  %v428_v26 = vrot.slane %v5045_v61, 5  ;;  %v476_v27 = vadd.f32 %v412_v25, %v137_v3  ;;  %v134_v41 = vunpack.c.h.bf16 %v5024_v45 }
 0x11e   :  { %3939 = vtanh.f32 %v490_v63  ;;  %v480_v22 = vadd.f32 %v416_v50, %v141_v2  ;;  %v138_v21 = vunpack.c.h.bf16 %v5027_v47  ;;  %v484_v18 = vadd.f32 %v420_v39, %v145_v34 }
 0x11f   :  { %3941 = vtanh.f32 %v494_v24  ;;  %v411_v43 = vrot.slane %v5054_v33, 1  ;;  %v146_v55 = vunpack.c.h.bf16 %v5035_v53  ;;  %v488_v56 = vadd.f32 %v424_v31, %v149_v29 }
 0x120   :  { %3943 = vtanh.f32 %v498_v51  ;;  %v415_v44 = vrot.slane %v5054_v33, 2  ;;  %v150_v25 = vunpack.c.h.bf16 %v5040_v58  ;;  %v492_v57 = vadd.f32 %v428_v26, %v153_v46 }
 0x121   :  { %3945 = vtanh.f32 %v472_v30  ;;  %v419_v2 = vrot.slane %v5054_v33, 3  ;;  %v154_v0 = vunpack.c.h.bf16 %v5042_v59  ;;  %v423_v34 = vrot.slane %v5054_v33, 4 }
 0x122   :  { %3947 = vtanh.f32 %v476_v27  ;;  %v471_v3 = vadd.f32 %v5054_v33, %v132_v28  ;;  %v158_v29 = vunpack.c.h.bf16 %v5047_v1  ;;  %v427_v4 = vrot.slane %v5054_v33, 5 }
 0x123   :  { %3949 = vtanh.f32 %v480_v22  ;;  %v475_v35 = vadd.f32 %v411_v43, %v136_v19  ;;  %v162_v46 = vunpack.c.h.bf16 %v5050_v36  ;;  %v431_v62 = vrot.slane %v5054_v33, 6 }
 0x124   :  { %3951 = vtanh.f32 %v484_v18  ;;  %v479_v49 = vadd.f32 %v415_v44, %v140_v48  ;;  %v559_v63 = vrot.slane %v5083_v60, 1  ;;  %v432_v50 = vrot.slane %v5045_v61, 6 }
 0x125   :  { %3953 = vtanh.f32 %v488_v56  ;;  %v435_v28 = vrot.slane %v5054_v33, 7  ;;  %v483_v51 = vadd.f32 %v419_v2, %v144_v37  ;;  %v436_v31 = vrot.slane %v5045_v61, 7 }
 0x126   :  { %v3930_v24 = vpop.eup %3929  ;;  %3955 = vtanh.f32 %v492_v57  ;;  %v487_v30 = vadd.f32 %v423_v34, %v148_v23  ;;  %v560_v19 = vrot.slane %v5083_v60, 2  ;;  %v491_v27 = vadd.f32 %v427_v4, %v152_v38 }
 0x127   :  { %v3932_v39 = vpop.eup %3931  ;;  %3957 = vtanh.f32 %v471_v3  ;;  %v561_v48 = vrot.slane %v5083_v60, 3  ;;  %v495_v43 = vadd.f32 %v431_v62, %v156_v40  ;;  %v6784_v61 = vunpack.c.l.bf16 %v5047_v1 }
 0x128   :  { %v3934_v26 = vpop.eup %3933  ;;  %3959 = vtanh.f32 %v475_v35  ;;  %v499_v44 = vadd.f32 %v435_v28, %v160_v54  ;;  %v500_v2 = vadd.f32 %v436_v31, %v161_v20  ;;  %v413_v40 = vrot.slane %v5056_v32, 1 }
 0x129   :  { %v3936_v18 = vpop.eup %3935  ;;  %3961 = vtanh.f32 %v479_v49  ;;  %v496_v23 = vadd.f32 %v432_v50, %v6784_v61  ;;  %v417_v34 = vrot.slane %v5056_v32, 2  ;;  %v510_v4 = vmul.f32 0.5, %v3930_v24 }
 0x12a   :  { %v3938_v56 = vpop.eup %3937  ;;  %3963 = vtanh.f32 %v483_v51  ;;  %v421_v35 = vrot.slane %v5056_v32, 3  ;;  %v425_v62 = vrot.slane %v5056_v32, 4  ;;  %v511_v49 = vmul.f32 0.5, %v3932_v39 }
 0x12b   :  { %v3940_v57 = vpop.eup %3939  ;;  %3965 = vtanh.f32 %v487_v30  ;;  %v429_v50 = vrot.slane %v5056_v32, 5  ;;  %v433_v28 = vrot.slane %v5056_v32, 6  ;;  %v512_v51 = vmul.f32 0.5, %v3934_v26 }
 0x12c   :  { %v3942_v3 = vpop.eup %3941  ;;  %3967 = vtanh.f32 %v491_v27  ;;  %v513_v31 = vmul.f32 0.5, %v3936_v18  ;;  %v437_v30 = vrot.slane %v5056_v32, 7  ;;  %v514_v24 = vmul.f32 0.5, %v3938_v56 }
 0x12d   :  { %v3944_v54 = vpop.eup %3943  ;;  %3969 = vtanh.f32 %v495_v43  ;;  %v473_v27 = vadd.f32 %v5056_v32, %v134_v41  ;;  %v477_v39 = vadd.f32 %v413_v40, %v138_v21  ;;  %v515_v38 = vmul.f32 0.5, %v3940_v57 }
 0x12e   :  { %v3946_v20 = vpop.eup %3945  ;;  %3971 = vtanh.f32 %v499_v44  ;;  %v516_v37 = vmul.f32 0.5, %v3942_v3  ;;  %v518_v33 = vadd.f32 0.5, %v510_v4  ;;  %v517_v18 = vmul.f32 0.5, %v3944_v54 }
 0x12f   :  { %v3948_v61 = vpop.eup %3947  ;;  %3973 = vtanh.f32 %v496_v23  ;;  %v519_v44 = vadd.f32 0.5, %v511_v49  ;;  %v481_v22 = vadd.f32 %v417_v34, %v142_v42  ;;  %v485_v56 = vadd.f32 %v421_v35, %v146_v55 }
 0x130   :  { %v3950_v43 = vpop.eup %3949  ;;  %3975 = vtanh.f32 %v500_v2  ;;  %v520_v23 = vadd.f32 0.5, %v512_v51  ;;  %v521_v32 = vadd.f32 0.5, %v513_v31  ;;  %v489_v47 = vadd.f32 %v425_v62, %v150_v25 }
 0x131   :  { %v3952_v26 = vpop.eup %3951  ;;  %v493_v41 = vadd.f32 %v429_v50, %v154_v0  ;;  %v522_v57 = vadd.f32 0.5, %v514_v24  ;;  %v497_v2 = vadd.f32 %v433_v28, %v158_v29  ;;  %3977 = vtanh.f32 %v473_v27 }
 0x132   :  { %v3954_v45 = vpop.eup %3953  ;;  %v501_v52 = vadd.f32 %v437_v30, %v162_v46  ;;  %v523_v42 = vadd.f32 0.5, %v515_v38  ;;  %v524_v55 = vadd.f32 0.5, %v516_v37  ;;  %v582_v40 = vmul.f32 %v3946_v20, %v518_v33 }
 0x133   :  { %v3956_v21 = vpop.eup %3955  ;;  %3979 = vtanh.f32 %v477_v39  ;;  %v525_v58 = vadd.f32 0.5, %v517_v18  ;;  %v583_v3 = vmul.f32 %v3948_v61, %v519_v44  ;;  %v584_v4 = vmul.f32 %v3950_v43, %v520_v23 }
 0x134   :  { %v3958_v53 = vpop.eup %3957  ;;  %3981 = vtanh.f32 %v481_v22  ;;  %v585_v35 = vmul.f32 %v3952_v26, %v521_v32  ;;  %v586_v36 = vmul.f32 %v3954_v45, %v522_v57  ;;  %v587_v33 = vmul.f32 %v3956_v21, %v523_v42 }
 0x135   :  { %v3960_v34 = vpop.eup %3959  ;;  %v534_v25 = vmul.f32 0.5, %v3958_v53  ;;  %3983 = vtanh.f32 %v485_v56 }
 0x136   :  { %v3962_v59 = vpop.eup %3961  ;;  %v535_v0 = vmul.f32 0.5, %v3960_v34  ;;  %3985 = vtanh.f32 %v489_v47 }
 0x137   :  { %v3964_v1 = vpop.eup %3963  ;;  %v536_v29 = vmul.f32 0.5, %v3962_v59  ;;  %v542_v62 = vadd.f32 0.5, %v534_v25  ;;  %3987 = vtanh.f32 %v493_v41  ;;  %v6786_v41 = vrot.slane %v5083_v60, 5 }
 0x138   :  { %v3966_v46 = vpop.eup %3965  ;;  %v537_v38 = vmul.f32 0.5, %v3964_v1  ;;  %v543_v37 = vadd.f32 0.5, %v535_v0  ;;  %3989 = vtanh.f32 %v497_v2 }
 0x139   :  { %v3968_v54 = vpop.eup %3967  ;;  %v538_v49 = vmul.f32 0.5, %v3966_v46  ;;  %v544_v50 = vadd.f32 0.5, %v536_v29  ;;  %v574_v22 = vmul.f32 %v542_v62, %v5083_v60  ;;  %3991 = vtanh.f32 %v501_v52 }
 0x13a   :  { %v3970_v28 = vpop.eup %3969  ;;  %v539_v20 = vmul.f32 0.5, %v3968_v54  ;;  %v545_v51 = vadd.f32 0.5, %v537_v38  ;;  %v575_v31 = vmul.f32 %v559_v63, %v543_v37  ;;  %v6785_v63 = vrot.slane %v5083_v60, 4 }
 0x13b   :  { %v3972_v30 = vpop.eup %3971  ;;  %v540_v61 = vmul.f32 0.5, %v3970_v28  ;;  %v546_v24 = vadd.f32 0.5, %v538_v49  ;;  %v576_v27 = vmul.f32 %v560_v19, %v544_v50  ;;  %v5136_v39 = vadd.f32 %v582_v40, %v574_v22 }
 0x13c   :  { %v3974_v43 = vpop.eup %3973  ;;  %v541_v26 = vmul.f32 0.5, %v3972_v30  ;;  %v547_v18 = vadd.f32 0.5, %v539_v20  ;;  %v577_v44 = vmul.f32 %v561_v48, %v545_v51  ;;  %v5140_v56 = vadd.f32 %v583_v3, %v575_v31 }
 0x13d   :  { %v3976_v45 = vpop.eup %3975  ;;  %v548_v23 = vadd.f32 0.5, %v540_v61  ;;  %v578_v32 = vmul.f32 %v6785_v63, %v546_v24  ;;  %v5144_v47 = vadd.f32 %v584_v4, %v576_v27  ;;  %3993 = vtanh.f32 %v5136_v39  ;;  %v649_v27 = vld [vmem:[#allocation10] sm:$0x1] }
 0x13e   :  { %v549_v19 = vadd.f32 0.5, %v541_v26  ;;  %v579_v21 = vmul.f32 %v6786_v41, %v547_v18  ;;  %v5149_v57 = vadd.f32 %v585_v35, %v577_v44  ;;  %3995 = vtanh.f32 %v5140_v56  ;;  %v3978_v42 = vpop.eup %3977 }
 0x13f   :  { %v6787_v48 = vrot.slane %v5083_v60, 6  ;;  %v588_v52 = vmul.f32 %v3974_v43, %v524_v55  ;;  %v5154_v53 = vadd.f32 %v586_v36, %v578_v32  ;;  %3997 = vtanh.f32 %v5144_v47 }
 0x140   :  { %v6788_v40 = vrot.slane %v5083_v60, 7  ;;  %v589_v25 = vmul.f32 %v3976_v45, %v525_v58  ;;  %v5159_v3 = vadd.f32 %v587_v33, %v579_v21  ;;  %3999 = vtanh.f32 %v5149_v57  ;;  %v3980_v59 = vpop.eup %3979 }
 0x141   :  { %v580_v2 = vmul.f32 %v6787_v48, %v548_v23  ;;  %4001 = vtanh.f32 %v5154_v53  ;;  %v3982_v4 = vpop.eup %3981  ;;  %v606_v58 = vmul.f32 0.5, %v3978_v42  ;;  %v607_v62 = vmul.f32 0.5, %v3980_v59  ;;  %v652_v23 = vld [vmem:[#allocation10 + $0x4] sm:$0x1]  ;;  %v655_v48 = vld [vmem:[#allocation10 + $0x8] sm:$0x1] }
 0x142   :  { %v581_v34 = vmul.f32 %v6788_v40, %v549_v19  ;;  %4003 = vtanh.f32 %v5159_v3  ;;  %v3984_v35 = vpop.eup %3983  ;;  %v608_v46 = vmul.f32 0.5, %v3982_v4  ;;  %v6791_v24 = vmov 0  }
 0x143   :  { %v5162_v0 = vadd.f32 %v588_v52, %v580_v2  ;;  %v3986_v1 = vpop.eup %3985  ;;  %v609_v38 = vmul.f32 0.5, %v3984_v35  ;;  %v614_v37 = vadd.f32 0.5, %v606_v58  ;;  %v615_v49 = vadd.f32 0.5, %v607_v62 }
 0x144   :  { %v5165_v55 = vadd.f32 %v589_v25, %v581_v34  ;;  %v3988_v60 = vpop.eup %3987  ;;  %v610_v33 = vmul.f32 0.5, %v3986_v1  ;;  %v616_v20 = vadd.f32 0.5, %v608_v46  ;;  %v658_v25 = vld [vmem:[#allocation10 + $0xc] sm:$0x1]  ;;  %v661_v1 = vld [vmem:[#allocation10 + $0x10] sm:$0x1] }
 0x145   :  { %4005 = vtanh.f32 %v5162_v0  ;;  %v3990_v29 = vpop.eup %3989  ;;  %v611_v50 = vmul.f32 0.5, %v3988_v60  ;;  %v617_v43 = vadd.f32 0.5, %v609_v38 }
 0x146   :  { %4007 = vtanh.f32 %v5165_v55  ;;  %v3992_v36 = vpop.eup %3991  ;;  %v612_v22 = vmul.f32 0.5, %v3990_v29  ;;  %v618_v44 = vadd.f32 0.5, %v610_v33 }
 0x147   :  { %v613_v31 = vmul.f32 0.5, %v3992_v36  ;;  %v619_v32 = vadd.f32 0.5, %v611_v50  ;;  %v664_v36 = vld [vmem:[#allocation10 + $0x14] sm:$0x1] }
 0x148   :  { %v620_v19 = vadd.f32 0.5, %v612_v22 }
 0x149   :  { %v621_v42 = vadd.f32 0.5, %v613_v31 }
 0x14a   :  { %v3994_v54 = vpop.eup %3993 }
 0x14b   :  { %v3996_v28 = vpop.eup %3995  ;;  %v630_v51 = vmul.f32 %v3994_v54, %v614_v37 }
 0x14c   :  { %v3998_v30 = vpop.eup %3997  ;;  %v631_v61 = vmul.f32 %v3996_v28, %v615_v49 }
 0x14d   :  { %v4000_v26 = vpop.eup %3999  ;;  %v638_v18 = vpack.c.bf16 %v630_v51, %v630_v51  ;;  %v632_v45 = vmul.f32 %v3998_v30, %v616_v20  ;;  %v667_v20 = vld [vmem:[#allocation10 + $0x18] sm:$0x1] }
 0x14e   :  { %v4002_v63 = vpop.eup %4001  ;;  %v633_v41 = vmul.f32 %v4000_v26, %v617_v43  ;;  %v639_v21 = vpack.c.bf16 %v631_v61, %v631_v61 }
 0x14f   :  { %v4004_v2 = vpop.eup %4003  ;;  %v650_v52 = vsel %vm5171_vm3, %v638_v18, %v649_v27  ;;  %v634_v40 = vmul.f32 %v4002_v63, %v618_v44  ;;  %v640_v34 = vpack.c.bf16 %v632_v45, %v632_v45  ;;  %v729_v46 = vunpack.c.l.b16 %v638_v18  ;;  %v670_v27 = vld [vmem:[#allocation10 + $0x1c] sm:$0x1] }
 0x150   :  { %651 = vst [vmem:[#allocation10] sm:$0x1] %v650_v52  ;;  %v635_v59 = vmul.f32 %v4004_v2, %v619_v32  ;;  %v641_v4 = vpack.c.bf16 %v633_v41, %v633_v41  ;;  %v653_v35 = vsel %vm5171_vm3, %v639_v21, %v652_v23  ;;  %v730_v60 = vunpack.c.l.b16 %v639_v21 }
 0x151   :  { %v642_v29 = vpack.c.bf16 %v634_v40, %v634_v40  ;;  %654 = vst [vmem:[#allocation10 + $0x4] sm:$0x1] %v653_v35  ;;  %v656_v62 = vsel %vm5171_vm3, %v640_v34, %v655_v48  ;;  %v731_v38 = vunpack.c.l.b16 %v640_v34  ;;  %v6805_v35 = vld [vmem:[#allocation36_spill] sm:$0xff] }
 0x152   :  { %v4006_v58 = vpop.eup %4005  ;;  %v643_v54 = vpack.c.bf16 %v635_v59, %v635_v59  ;;  %657 = vst [vmem:[#allocation10 + $0x8] sm:$0x1] %v656_v62  ;;  %v659_v49 = vsel %vm5171_vm3, %v641_v4, %v658_v25  ;;  %v732_v50 = vunpack.c.l.b16 %v641_v4  ;;  %v737_v31 = vrot.slane %v730_v60, 7  ;;  %v6807_v60 = vld [vmem:[#allocation38_spill] sm:$0xff] }
 0x153   :  { %v4008_v37 = vpop.eup %4007  ;;  %v636_v33 = vmul.f32 %v4006_v58, %v620_v19  ;;  %660 = vst [vmem:[#allocation10 + $0xc] sm:$0x1] %v659_v49  ;;  %v662_v28 = vsel %vm5171_vm3, %v642_v29, %v661_v1  ;;  %v733_v51 = vunpack.c.l.b16 %v642_v29  ;;  %v740_v26 = vrot.slane %v731_v38, 6  ;;  %v6806_v1 = vld [vmem:[#allocation37_spill] sm:$0xff]  ;;  %v6808_v58 = vld [vmem:[#allocation39_spill] sm:$0xff] }
 0x154   :  { %v637_v22 = vmul.f32 %v4008_v37, %v621_v42  ;;  %663 = vst [vmem:[#allocation10 + $0x10] sm:$0x1] %v662_v28  ;;  %v665_v61 = vsel %vm5171_vm3, %v643_v54, %v664_v36  ;;  %v734_v43 = vunpack.c.l.b16 %v643_v54  ;;  %v739_v44 = vsel %vm738_vm2, %v737_v31, %v729_v46  ;;  %v5230_v29 = vld [vmem:[#allocation2 + $0xe4] ss:$16 sps:$4 sm:$0xff]   ;;  %v5233_v62 = vld [vmem:[#allocation2 + $0xec] ss:$16 sps:$4 sm:$0xff]  }
 0x155   :  { %v644_v30 = vpack.c.bf16 %v636_v33, %v636_v33  ;;  %666 = vst [vmem:[#allocation10 + $0x14] sm:$0x1] %v665_v61  ;;  %v743_v45 = vrot.slane %v732_v50, 5  ;;  %v742_v32 = vsel %vm741_vm4, %v740_v26, %v739_v44  ;;  %v746_v19 = vrot.slane %v733_v51, 4  ;;  %v5236_v36 = vld [vmem:[#allocation4] sm:$0x11] }
 0x156   :  { %v645_v18 = vpack.c.bf16 %v637_v22, %v637_v22  ;;  %v749_v2 = vrot.slane %v734_v43, 3  ;;  %v5238_v46 = vld [vmem:[#allocation4 + $0x10] sm:$0x11]  ;;  %v5240_v38 = vld [vmem:[#allocation4 + $0x20] sm:$0x11]  ;;  %v689_v50 = vunpack.c.l.bf16 %v5236_v36  ;;  %v1002_v26 = vrot.slane %v5136_v39, 7 }
 0x157   :  { %v668_v23 = vsel %vm5171_vm3, %v644_v30, %v667_v20  ;;  %v735_v63 = vunpack.c.l.b16 %v644_v30  ;;  %v745_v48 = vsel %vm744_vm5, %v743_v45, %v742_v32  ;;  %v5242_v37 = vld [vmem:[#allocation4 + $0x30] sm:$0x11]  ;;  %v5244_v33 = vld [vmem:[#allocation4 + $0x40] sm:$0x11]  ;;  %v693_v22 = vunpack.c.l.bf16 %v5238_v46  ;;  %v5264_v32 = vld [vmem:[#allocation4 + $0x18] sm:$0x11] }
 0x158   :  { %669 = vst [vmem:[#allocation10 + $0x18] sm:$0x1] %v668_v23  ;;  %v671_v41 = vsel %vm5171_vm3, %v645_v18, %v670_v27  ;;  %v736_v21 = vunpack.c.l.b16 %v645_v18  ;;  %v748_v52 = vsel %vm747_vm6, %v746_v19, %v745_v48  ;;  %v5246_v54 = vld [vmem:[#allocation4 + $0x50] sm:$0x11]  ;;  %v5248_v49 = vld [vmem:[#allocation4 + $0x60] sm:$0x11]  ;;  %v697_v20 = vunpack.c.l.bf16 %v5240_v38 }
 0x159   :  { %672 = vst [vmem:[#allocation10 + $0x1c] sm:$0x1] %v671_v41  ;;  %v752_v42 = vrot.slane %v735_v63, 2  ;;  %v751_v40 = vsel %vm750_vm7, %v749_v2, %v748_v52  ;;  %v5252_v28 = vld [vmem:[#allocation4 + $0x70] sm:$0x11]  ;;  %v701_v51 = vunpack.c.l.bf16 %v5242_v37  ;;  %v705_v31 = vunpack.c.l.bf16 %v5244_v33 }
 0x15a   :  { %v755_v34 = vrot.slane %v736_v21, 1  ;;  %v709_v30 = vunpack.c.l.bf16 %v5246_v54  ;;  %v713_v61 = vunpack.c.l.bf16 %v5248_v49  ;;  %v1003_v18 = vrot.slane %v5140_v56, 7  ;;  %v5268_v2 = vld [vmem:[#allocation4 + $0x8] sm:$0x11] }
 0x15b   :  { %v754_v25 = vsel %vm753_vm8, %v752_v42, %v751_v40  ;;  %v1004_v44 = vrot.slane %v5144_v47, 7  ;;  %v1005_v19 = vrot.slane %v5149_v57, 7  ;;  %v717_v41 = vunpack.c.l.bf16 %v5252_v28  ;;  %v5270_v52 = vld [vmem:[#allocation4 + $0x28] sm:$0x11] }
 0x15c   :  { %v757_v59 = vsel %vm756_vm9, %v755_v34, %v754_v25  ;;  %v1006_v40 = vrot.slane %v5154_v53, 7  ;;  %vm2836_vm3 = vsmask.f32 7946 }
 0x15d   :  { %v758_v4 = vpack.c.b16 %v757_v59, %v757_v59  ;;  %vm6329_vm10 = vmand %vm741_vm4, %vm2836_vm3 }
 0x15f   :  { %793 = vmatmul.mubr.bf16.vlgmr.msra.gmra.mxu0 %v758_v4  ;;  %834 = vmatmul.mubr.bf16.vlgmr.msra.gmra.mxu1 %v758_v4  ;;  %v5277_v4 = vld [vmem:[#allocation4 + $0x38] sm:$0x11] }
 0x160   :  { %1197 = vmatpush1.bf16.msra.mxu0 %v4881_v5  ;;  %1238 = vmatpush1.bf16.msra.mxu1 %v4883_v6  ;;  %v6792_v5 = vld [vmem:[#allocation23_spill] sm:$0xff]  ;;  %v6793_v6 = vld [vmem:[#allocation24_spill] sm:$0xff] }
 0x161   :  { %1198 = vmatprep.subr.bf16.mxu0 %v4886_v7  ;;  %1239 = vmatprep.subr.bf16.mxu1 %v4890_v8  ;;  %v6794_v7 = vld [vmem:[#allocation25_spill] sm:$0xff]  ;;  %v6795_v8 = vld [vmem:[#allocation26_spill] sm:$0xff] }
 0x162   :  { %1228 = vmatprep.mubr.bf16.mxu0 %v6791_v24  ;;  %1269 = vmatprep.mubr.bf16.mxu1 %v6791_v24 }
 0x164   :  { %1199 = vmatpush1.bf16.msra.mxu0 %v4892_v9  ;;  %1240 = vmatpush1.bf16.msra.mxu1 %v4895_v10  ;;  %v6796_v9 = vld [vmem:[#allocation27_spill] sm:$0xff]  ;;  %v6797_v10 = vld [vmem:[#allocation28_spill] sm:$0xff] }
 0x165   :  { %1200 = vmatprep.subr.bf16.mxu0 %v4898_v11  ;;  %1241 = vmatprep.subr.bf16.mxu1 %v4900_v12  ;;  %v6798_v11 = vld [vmem:[#allocation29_spill] sm:$0xff]  ;;  %v6799_v12 = vld [vmem:[#allocation30_spill] sm:$0xff] }
 0x168   :  { %1201 = vmatpush1.bf16.msra.mxu0 %v4902_v13  ;;  %1242 = vmatpush1.bf16.msra.mxu1 %v4904_v14  ;;  %v6800_v13 = vld [vmem:[#allocation31_spill] sm:$0xff]  ;;  %v6801_v14 = vld [vmem:[#allocation32_spill] sm:$0xff] }
 0x169   :  { %1202 = vmatprep.subr.bf16.mxu0 %v4908_v15  ;;  %1243 = vmatprep.subr.bf16.mxu1 %v4912_v16  ;;  %v6802_v15 = vld [vmem:[#allocation33_spill] sm:$0xff]  ;;  %v6803_v16 = vld [vmem:[#allocation34_spill] sm:$0xff] }
 0x16c   :  { %1203 = vmatpush1.bf16.msra.mxu0 %v4914_v17  ;;  %1244 = vmatpush1.bf16.msra.mxu1 %v6792_v5  ;;  %v6804_v17 = vld [vmem:[#allocation35_spill] sm:$0xff]  ;;  %v1007_v5 = vrot.slane %v5159_v3, 7 }
 0x16d   :  { %1204 = vmatprep.subr.bf16.mxu0 %v6793_v6  ;;  %1245 = vmatprep.subr.bf16.mxu1 %v6794_v7  ;;  %v1008_v6 = vrot.slane %v5162_v0, 7 }
 0x170   :  { %1205 = vmatpush1.bf16.msra.mxu0 %v6795_v8  ;;  %1246 = vmatpush1.bf16.msra.mxu1 %v6796_v9  ;;  %v5281_v9 = vld [vmem:[#allocation4 + $0x48] sm:$0x11] }
 0x171   :  { %1206 = vmatprep.subr.bf16.mxu0 %v6797_v10  ;;  %1247 = vmatprep.subr.bf16.mxu1 %v6798_v11  ;;  %v5283_v10 = vld [vmem:[#allocation4 + $0x58] sm:$0x11]  ;;  %v695_v11 = vunpack.c.l.bf16 %v5264_v32 }
 0x174   :  { %1207 = vmatpush1.bf16.msra.mxu0 %v6799_v12  ;;  %1248 = vmatpush1.bf16.msra.mxu1 %v6800_v13  ;;  %v1009_v12 = vrot.slane %v5165_v55, 7 }
 0x175   :  { %1208 = vmatprep.subr.bf16.mxu0 %v6801_v14  ;;  %1249 = vmatprep.subr.bf16.mxu1 %v6802_v15 }
 0x178   :  { %1209 = vmatpush1.bf16.msra.mxu0 %v6803_v16  ;;  %1250 = vmatpush1.bf16.msra.mxu1 %v6804_v17  ;;  %v5287_v17 = vld [vmem:[#allocation4 + $0x68] sm:$0x11] }
 0x179   :  { %1210 = vmatprep.subr.bf16.mxu0 %v6805_v35  ;;  %1251 = vmatprep.subr.bf16.mxu1 %v6806_v1  ;;  %v691_v35 = vunpack.c.l.bf16 %v5268_v2  ;;  %v699_v1 = vunpack.c.l.bf16 %v5270_v52 }
 0x17c   :  { %1211 = vmatpush1.bf16.msra.mxu0 %v6807_v60  ;;  %1252 = vmatpush1.bf16.msra.mxu1 %v6808_v58  ;;  %v5291_v58 = vld [vmem:[#allocation4 + $0x78] sm:$0x11] }
 0x17d   :  { %1633 = vmatprep.subr.bf16.mxu0 %v5230_v29  ;;  %1674 = vmatprep.subr.bf16.mxu1 %v5233_v62 }
 0x21f   :  { %v794_v27 = vpop.f32.mrf.mxu0  ;;  %v5259_v43 = vpop.f32.mrf.mxu1 }
 0x220   :  { %v846_v45 = vrot.slane %v794_v27, 7  ;;  %v850_v23 = vrot.slane %v794_v27, 1  ;;  %v854_v63 = vrot.slane %v794_v27, 2  ;;  %v858_v21 = vrot.slane %v794_v27, 3 }
 0x221   :  { %v910_v48 = vadd.f32 %v794_v27, %v693_v22  ;;  %v5272_v42 = vpop.f32.mrf.mxu0  ;;  %v5275_v34 = vpop.f32.mrf.mxu1  ;;  %v862_v25 = vrot.slane %v794_v27, 4  ;;  %v866_v7 = vrot.slane %v794_v27, 5  ;;  %v870_v15 = vrot.slane %v794_v27, 6 }
 0x222   :  { %v906_v59 = vadd.f32 %v846_v45, %v689_v50  ;;  %v914_v8 = vadd.f32 %v850_v23, %v697_v20  ;;  %v918_v16 = vadd.f32 %v854_v63, %v701_v51  ;;  %v922_v60 = vadd.f32 %v858_v21, %v705_v31 }
 0x223   :  { %v798_v13 = vpop.f32.mrf.mxu0  ;;  %v839_v14 = vpop.f32.mrf.mxu1  ;;  %4009 = vtanh.f32 %v910_v48  ;;  %v703_v50 = vunpack.c.l.bf16 %v5277_v4  ;;  %v848_v22 = vrot.slane %v5259_v43, 7  ;;  %v926_v23 = vadd.f32 %v862_v25, %v709_v30 }
 0x224   :  { %4011 = vtanh.f32 %v906_v59  ;;  %v707_v51 = vunpack.c.l.bf16 %v5281_v9  ;;  %v711_v27 = vunpack.c.l.bf16 %v5283_v10  ;;  %v930_v63 = vadd.f32 %v866_v7, %v713_v61 }
 0x225   :  { %v799_v20 = vpop.f32.mrf.mxu0  ;;  %v840_v45 = vpop.f32.mrf.mxu1  ;;  %4013 = vtanh.f32 %v914_v8  ;;  %v715_v13 = vunpack.c.l.bf16 %v5287_v17  ;;  %v852_v31 = vrot.slane %v5259_v43, 1  ;;  %v934_v21 = vadd.f32 %v870_v15, %v717_v41 }
 0x226   :  { %4015 = vtanh.f32 %v918_v16  ;;  %v719_v48 = vunpack.c.l.bf16 %v5291_v58  ;;  %v856_v14 = vrot.slane %v5259_v43, 2  ;;  %v860_v30 = vrot.slane %v5259_v43, 3 }
 0x227   :  { %4017 = vtanh.f32 %v922_v60  ;;  %v908_v25 = vadd.f32 %v848_v22, %v691_v35  ;;  %v694_v59 = vunpack.c.h.bf16 %v5238_v46  ;;  %v864_v61 = vrot.slane %v5259_v43, 4 }
 0x228   :  { %4019 = vtanh.f32 %v926_v23  ;;  %v912_v7 = vadd.f32 %v5259_v43, %v695_v11  ;;  %v690_v8 = vunpack.c.h.bf16 %v5236_v36  ;;  %v916_v41 = vadd.f32 %v852_v31, %v699_v1 }
 0x229   :  { %4021 = vtanh.f32 %v930_v63  ;;  %v698_v15 = vunpack.c.h.bf16 %v5240_v38  ;;  %v847_v16 = vrot.slane %v5272_v42, 7  ;;  %v920_v60 = vadd.f32 %v856_v14, %v703_v50 }
 0x22a   :  { %4023 = vtanh.f32 %v934_v21  ;;  %v702_v20 = vunpack.c.h.bf16 %v5242_v37  ;;  %v706_v35 = vunpack.c.h.bf16 %v5244_v33  ;;  %v924_v46 = vadd.f32 %v860_v30, %v707_v51 }
 0x22b   :  { %4025 = vtanh.f32 %v908_v25  ;;  %v710_v22 = vunpack.c.h.bf16 %v5246_v54  ;;  %v851_v11 = vrot.slane %v5272_v42, 1  ;;  %v928_v45 = vadd.f32 %v864_v61, %v711_v27 }
 0x22c   :  { %4027 = vtanh.f32 %v912_v7  ;;  %v714_v36 = vunpack.c.h.bf16 %v5248_v49  ;;  %v855_v38 = vrot.slane %v5272_v42, 2  ;;  %v718_v1 = vunpack.c.h.bf16 %v5252_v28 }
 0x22d   :  { %4029 = vtanh.f32 %v916_v41  ;;  %v859_v50 = vrot.slane %v5272_v42, 3  ;;  %v907_v37 = vadd.f32 %v847_v16, %v690_v8  ;;  %v863_v33 = vrot.slane %v5272_v42, 4 }
 0x22e   :  { %4031 = vtanh.f32 %v920_v60  ;;  %v911_v23 = vadd.f32 %v5272_v42, %v694_v59  ;;  %v696_v54 = vunpack.c.h.bf16 %v5264_v32  ;;  %v867_v51 = vrot.slane %v5272_v42, 5 }
 0x22f   :  { %4033 = vtanh.f32 %v924_v46  ;;  %v915_v27 = vadd.f32 %v851_v11, %v698_v15  ;;  %v692_v49 = vunpack.c.h.bf16 %v5268_v2  ;;  %v868_v31 = vrot.slane %v5259_v43, 5 }
 0x230   :  { %v4010_v63 = vpop.eup %4009  ;;  %4035 = vtanh.f32 %v928_v45  ;;  %v871_v28 = vrot.slane %v5272_v42, 6  ;;  %v919_v21 = vadd.f32 %v855_v38, %v702_v20  ;;  %v872_v30 = vrot.slane %v5259_v43, 6 }
 0x231   :  { %v4012_v14 = vpop.eup %4011  ;;  %v923_v25 = vadd.f32 %v859_v50, %v706_v35  ;;  %4037 = vtanh.f32 %v907_v37  ;;  %v700_v32 = vunpack.c.h.bf16 %v5270_v52  ;;  %v927_v61 = vadd.f32 %v863_v33, %v710_v22 }
 0x232   :  { %v4014_v59 = vpop.eup %4013  ;;  %4039 = vtanh.f32 %v911_v23  ;;  %v704_v7 = vunpack.c.h.bf16 %v5277_v4  ;;  %v708_v2 = vunpack.c.h.bf16 %v5281_v9  ;;  %v931_v41 = vadd.f32 %v867_v51, %v714_v36 }
 0x233   :  { %v4016_v8 = vpop.eup %4015  ;;  %4041 = vtanh.f32 %v915_v27  ;;  %v712_v42 = vunpack.c.h.bf16 %v5283_v10  ;;  %v716_v15 = vunpack.c.h.bf16 %v5287_v17  ;;  %v932_v43 = vadd.f32 %v868_v31, %v715_v13 }
 0x234   :  { %v4018_v16 = vpop.eup %4017  ;;  %v935_v60 = vadd.f32 %v871_v28, %v718_v1  ;;  %4043 = vtanh.f32 %v919_v21  ;;  %v720_v52 = vunpack.c.h.bf16 %v5291_v58  ;;  %v936_v4 = vadd.f32 %v872_v30, %v719_v48 }
 0x235   :  { %v4020_v20 = vpop.eup %4019  ;;  %4045 = vtanh.f32 %v923_v25  ;;  %v849_v9 = vrot.slane %v5275_v34, 7  ;;  %v853_v35 = vrot.slane %v5275_v34, 1  ;;  %v946_v46 = vmul.f32 0.5, %v4012_v14 }
 0x236   :  { %v4022_v10 = vpop.eup %4021  ;;  %4047 = vtanh.f32 %v927_v61  ;;  %v857_v22 = vrot.slane %v5275_v34, 2  ;;  %v861_v17 = vrot.slane %v5275_v34, 3  ;;  %v947_v11 = vmul.f32 0.5, %v4010_v63 }
 0x237   :  { %v4024_v13 = vpop.eup %4023  ;;  %4049 = vtanh.f32 %v931_v41  ;;  %v865_v45 = vrot.slane %v5275_v34, 4  ;;  %v869_v58 = vrot.slane %v5275_v34, 5  ;;  %v948_v36 = vmul.f32 0.5, %v4014_v59 }
 0x238   :  { %v4026_v48 = vpop.eup %4025  ;;  %v949_v38 = vmul.f32 0.5, %v4016_v8  ;;  %4051 = vtanh.f32 %v935_v60  ;;  %v873_v1 = vrot.slane %v5275_v34, 6  ;;  %v950_v37 = vmul.f32 0.5, %v4018_v16 }
 0x239   :  { %v4028_v50 = vpop.eup %4027  ;;  %4053 = vtanh.f32 %v932_v43  ;;  %v909_v33 = vadd.f32 %v849_v9, %v692_v49  ;;  %v913_v23 = vadd.f32 %v5275_v34, %v696_v54  ;;  %v951_v27 = vmul.f32 0.5, %v4020_v20 }
 0x23a   :  { %v4030_v51 = vpop.eup %4029  ;;  %v952_v63 = vmul.f32 0.5, %v4022_v10  ;;  %v954_v31 = vadd.f32 0.5, %v946_v46  ;;  %v917_v28 = vadd.f32 %v853_v35, %v700_v32  ;;  %v953_v14 = vmul.f32 0.5, %v4024_v13 }
 0x23b   :  { %v4032_v21 = vpop.eup %4031  ;;  %v955_v30 = vadd.f32 0.5, %v947_v11  ;;  %4055 = vtanh.f32 %v936_v4  ;;  %v921_v25 = vadd.f32 %v857_v22, %v704_v7  ;;  %v956_v61 = vadd.f32 0.5, %v948_v36 }
 0x23c   :  { %v4034_v59 = vpop.eup %4033  ;;  %v957_v8 = vadd.f32 0.5, %v949_v38  ;;  %v925_v41 = vadd.f32 %v861_v17, %v708_v2  ;;  %v929_v60 = vadd.f32 %v865_v45, %v712_v42  ;;  %v958_v43 = vadd.f32 0.5, %v950_v37 }
 0x23d   :  { %v4036_v16 = vpop.eup %4035  ;;  %v933_v49 = vadd.f32 %v869_v58, %v716_v15  ;;  %4057 = vtanh.f32 %v909_v33  ;;  %v937_v34 = vadd.f32 %v873_v1, %v720_v52  ;;  %v959_v20 = vadd.f32 0.5, %v951_v27 }
 0x23e   :  { %v4038_v54 = vpop.eup %4037  ;;  %v960_v9 = vadd.f32 0.5, %v952_v63  ;;  %v1026_v10 = vmul.f32 %v4026_v48, %v954_v31  ;;  %4059 = vtanh.f32 %v913_v23  ;;  %v961_v35 = vadd.f32 0.5, %v953_v14 }
 0x23f   :  { %v4040_v32 = vpop.eup %4039  ;;  %v970_v46 = vmul.f32 0.5, %v4038_v54  ;;  %v1027_v4 = vmul.f32 %v4028_v50, %v955_v30  ;;  %4061 = vtanh.f32 %v917_v28  ;;  %v1028_v13 = vmul.f32 %v4030_v51, %v956_v61 }
 0x240   :  { %v4042_v7 = vpop.eup %4041  ;;  %v971_v22 = vmul.f32 0.5, %v4040_v32  ;;  %v1029_v2 = vmul.f32 %v4032_v21, %v957_v8  ;;  %4063 = vtanh.f32 %v921_v25  ;;  %v1030_v11 = vmul.f32 %v4034_v59, %v958_v43 }
 0x241   :  { %v4044_v42 = vpop.eup %4043  ;;  %v972_v17 = vmul.f32 0.5, %v4042_v7  ;;  %v978_v15 = vadd.f32 0.5, %v970_v46  ;;  %4065 = vtanh.f32 %v925_v41  ;;  %v1031_v48 = vmul.f32 %v4036_v16, %v959_v20 }
 0x242   :  { %v4046_v52 = vpop.eup %4045  ;;  %v973_v45 = vmul.f32 0.5, %v4044_v42  ;;  %v979_v58 = vadd.f32 0.5, %v971_v22  ;;  %4067 = vtanh.f32 %v929_v60 }
 0x243   :  { %v4048_v36 = vpop.eup %4047  ;;  %v974_v38 = vmul.f32 0.5, %v4046_v52  ;;  %v980_v1 = vadd.f32 0.5, %v972_v17  ;;  %v1018_v50 = vmul.f32 %v1002_v26, %v978_v15  ;;  %4069 = vtanh.f32 %v933_v49 }
 0x244   :  { %v4050_v37 = vpop.eup %4049  ;;  %v975_v33 = vmul.f32 0.5, %v4048_v36  ;;  %v981_v23 = vadd.f32 0.5, %v973_v45  ;;  %v1019_v51 = vmul.f32 %v1003_v18, %v979_v58  ;;  %4071 = vtanh.f32 %v937_v34  ;;  %v5410_v58 = vld [vmem:[#allocation2 + $0xe0] ss:$16 sps:$4 sm:$0xff]  }
 0x245   :  { %v4052_v27 = vpop.eup %4051  ;;  %v976_v63 = vmul.f32 0.5, %v4050_v37  ;;  %v982_v31 = vadd.f32 0.5, %v974_v38  ;;  %v1020_v28 = vmul.f32 %v1004_v44, %v980_v1  ;;  %v5348_v21 = vadd.f32 %v1026_v10, %v1018_v50 }
 0x246   :  { %v4054_v14 = vpop.eup %4053  ;;  %v977_v30 = vmul.f32 0.5, %v4052_v27  ;;  %v983_v39 = vadd.f32 0.5, %v975_v33  ;;  %v1021_v26 = vmul.f32 %v1005_v19, %v981_v23  ;;  %v5352_v25 = vadd.f32 %v1027_v4, %v1019_v51  ;;  %v1092_v27 = vld [vmem:[#allocation10] sm:$0x1] }
 0x247   :  { %v984_v59 = vadd.f32 0.5, %v976_v63  ;;  %v1022_v56 = vmul.f32 %v1006_v40, %v982_v31  ;;  %v5356_v18 = vadd.f32 %v1028_v13, %v1020_v28  ;;  %4073 = vtanh.f32 %v5348_v21  ;;  %v1095_v31 = vld [vmem:[#allocation10 + $0x4] sm:$0x1] }
 0x248   :  { %v4056_v47 = vpop.eup %4055  ;;  %v985_v44 = vadd.f32 0.5, %v977_v30  ;;  %v1023_v61 = vmul.f32 %v1007_v5, %v983_v39  ;;  %v5361_v8 = vadd.f32 %v1029_v2, %v1021_v26  ;;  %4075 = vtanh.f32 %v5352_v25 }
 0x249   :  { %v1024_v57 = vmul.f32 %v1008_v6, %v984_v59  ;;  %v1032_v19 = vmul.f32 %v4054_v14, %v960_v9  ;;  %v5366_v41 = vadd.f32 %v1030_v11, %v1022_v56  ;;  %4077 = vtanh.f32 %v5356_v18 }
 0x24a   :  { %v4058_v53 = vpop.eup %4057  ;;  %v1025_v40 = vmul.f32 %v1009_v12, %v985_v44  ;;  %v1033_v60 = vmul.f32 %v4056_v47, %v961_v35  ;;  %v5371_v16 = vadd.f32 %v1031_v48, %v1023_v61  ;;  %4079 = vtanh.f32 %v5361_v8  ;;  %v1098_v47 = vld [vmem:[#allocation10 + $0x8] sm:$0x1] }
 0x24b   :  { %v4060_v3 = vpop.eup %4059  ;;  %v5374_v5 = vadd.f32 %v1032_v19, %v1024_v57  ;;  %4081 = vtanh.f32 %v5366_v41  ;;  %v1050_v12 = vmul.f32 0.5, %v4058_v53  ;;  %v1101_v53 = vld [vmem:[#allocation10 + $0xc] sm:$0x1] }
 0x24c   :  { %v4062_v0 = vpop.eup %4061  ;;  %v5377_v6 = vadd.f32 %v1033_v60, %v1025_v40  ;;  %4083 = vtanh.f32 %v5371_v16  ;;  %v1051_v54 = vmul.f32 0.5, %v4060_v3 }
 0x24d   :  { %v4064_v43 = vpop.eup %4063  ;;  %4085 = vtanh.f32 %v5374_v5  ;;  %v1052_v9 = vmul.f32 0.5, %v4062_v0  ;;  %v1058_v32 = vadd.f32 0.5, %v1050_v12 }
 0x24e   :  { %v4066_v49 = vpop.eup %4065  ;;  %4087 = vtanh.f32 %v5377_v6  ;;  %v1053_v10 = vmul.f32 0.5, %v4064_v43  ;;  %v1059_v7 = vadd.f32 0.5, %v1051_v54 }
 0x24f   :  { %v4068_v55 = vpop.eup %4067  ;;  %v1054_v35 = vmul.f32 0.5, %v4066_v49  ;;  %v1060_v42 = vadd.f32 0.5, %v1052_v9 }
 0x250   :  { %v4070_v34 = vpop.eup %4069  ;;  %v1055_v46 = vmul.f32 0.5, %v4068_v55  ;;  %v1061_v52 = vadd.f32 0.5, %v1053_v10  ;;  %v1104_v55 = vld [vmem:[#allocation10 + $0x10] sm:$0x1] }
 0x251   :  { %v4072_v20 = vpop.eup %4071  ;;  %v1056_v22 = vmul.f32 0.5, %v4070_v34  ;;  %v1062_v48 = vadd.f32 0.5, %v1054_v35 }
 0x252   :  { %v1057_v13 = vmul.f32 0.5, %v4072_v20  ;;  %v1063_v36 = vadd.f32 0.5, %v1055_v46  ;;  %v1107_v20 = vld [vmem:[#allocation10 + $0x14] sm:$0x1] }
 0x253   :  { %v1064_v33 = vadd.f32 0.5, %v1056_v22  ;;  %v1110_v22 = vld [vmem:[#allocation10 + $0x18] sm:$0x1] }
 0x254   :  { %v4074_v4 = vpop.eup %4073  ;;  %v1065_v23 = vadd.f32 0.5, %v1057_v13 }
 0x255   :  { %v4076_v2 = vpop.eup %4075  ;;  %v1074_v17 = vmul.f32 %v4074_v4, %v1058_v32 }
 0x256   :  { %v4078_v15 = vpop.eup %4077  ;;  %v1075_v11 = vmul.f32 %v4076_v2, %v1059_v7 }
 0x257   :  { %v4080_v45 = vpop.eup %4079  ;;  %v1076_v38 = vmul.f32 %v4078_v15, %v1060_v42  ;;  %v1082_v1 = vpack.c.bf16 %v1074_v17, %v1074_v17  ;;  %v1113_v42 = vld [vmem:[#allocation10 + $0x1c] sm:$0x1] }
 0x258   :  { %v4082_v50 = vpop.eup %4081  ;;  %v1083_v37 = vpack.c.bf16 %v1075_v11, %v1075_v11  ;;  %v1077_v51 = vmul.f32 %v4080_v45, %v1061_v52 }
 0x259   :  { %v4084_v63 = vpop.eup %4083  ;;  %v1078_v28 = vmul.f32 %v4082_v50, %v1062_v48  ;;  %v1084_v14 = vpack.c.bf16 %v1076_v38, %v1076_v38  ;;  %v1093_v30 = vsel %vm5383_vm11, %v1082_v1, %v1092_v27  ;;  %v1172_v39 = vunpack.c.l.b16 %v1082_v1  ;;  %v5413_v27 = vld [vmem:[#allocation2 + $0xe8] ss:$16 sps:$4 sm:$0xff]  }
 0x25a   :  { %v1096_v26 = vsel %vm5383_vm11, %v1083_v37, %v1095_v31  ;;  %v1079_v59 = vmul.f32 %v4084_v63, %v1063_v36  ;;  %v1085_v56 = vpack.c.bf16 %v1077_v51, %v1077_v51  ;;  %1094 = vst [vmem:[#allocation10] sm:$0x1] %v1093_v30  ;;  %v1173_v44 = vunpack.c.l.b16 %v1083_v37  ;;  %v4086_v61 = vpop.eup %4085  ;;  %v5416_v63 = vld [vmem:[#allocation2 + $0xc4] ss:$16 sps:$4 sm:$0xff]   ;;  %v5419_v31 = vld [vmem:[#allocation2 + $0xcc] ss:$16 sps:$4 sm:$0xff]  }
 0x25b   :  { %1097 = vst [vmem:[#allocation10 + $0x4] sm:$0x1] %v1096_v26  ;;  %v1086_v57 = vpack.c.bf16 %v1078_v28, %v1078_v28  ;;  %v1099_v19 = vsel %vm5383_vm11, %v1084_v14, %v1098_v47  ;;  %v1174_v40 = vunpack.c.l.b16 %v1084_v14  ;;  %v1180_v60 = vrot.slane %v1172_v39, 1  ;;  %v4088_v3 = vpop.eup %4087  ;;  %v5424_v28 = vld [vmem:[#allocation2 + $0xc0] ss:$16 sps:$4 sm:$0xff]  }
 0x25c   :  { %v1080_v0 = vmul.f32 %v4086_v61, %v1064_v33  ;;  %v1087_v43 = vpack.c.bf16 %v1079_v59, %v1079_v59  ;;  %1100 = vst [vmem:[#allocation10 + $0x8] sm:$0x1] %v1099_v19  ;;  %v1102_v49 = vsel %vm5383_vm11, %v1085_v56, %v1101_v53  ;;  %v1175_v12 = vunpack.c.l.b16 %v1085_v56  ;;  %v5427_v14 = vld [vmem:[#allocation2 + $0xc8] ss:$16 sps:$4 sm:$0xff]   ;;  %v5430_v30 = vld [vmem:[#allocation2 + $0xa4] ss:$16 sps:$4 sm:$0xff]  }
 0x25d   :  { %v1081_v34 = vmul.f32 %v4088_v3, %v1065_v23  ;;  %1103 = vst [vmem:[#allocation10 + $0xc] sm:$0x1] %v1102_v49  ;;  %v1105_v54 = vsel %vm5383_vm11, %v1086_v57, %v1104_v55  ;;  %v1176_v9 = vunpack.c.l.b16 %v1086_v57  ;;  %v1181_v10 = vsel %vm738_vm2, %v1173_v44, %v1180_v60  ;;  %v5433_v39 = vld [vmem:[#allocation2 + $0xac] ss:$16 sps:$4 sm:$0xff]   ;;  %v5436_v26 = vld [vmem:[#allocation2 + $0xa0] ss:$16 sps:$4 sm:$0xff]  }
 0x25e   :  { %v1088_v32 = vpack.c.bf16 %v1080_v0, %v1080_v0  ;;  %1106 = vst [vmem:[#allocation10 + $0x10] sm:$0x1] %v1105_v54  ;;  %v1108_v35 = vsel %vm5383_vm11, %v1087_v43, %v1107_v20  ;;  %v1177_v46 = vunpack.c.l.b16 %v1087_v43  ;;  %v1182_v4 = vrot.slane %v1174_v40, 7  ;;  %v5439_v59 = vld [vmem:[#allocation2 + $0xa8] ss:$16 sps:$4 sm:$0xff]  }
 0x25f   :  { %v1089_v7 = vpack.c.bf16 %v1081_v34, %v1081_v34  ;;  %1109 = vst [vmem:[#allocation10 + $0x14] sm:$0x1] %v1108_v35  ;;  %v1184_v13 = vrot.slane %v1175_v12, 6  ;;  %v1186_v11 = vrot.slane %v1176_v9, 5  ;;  %v5442_v56 = vld [vmem:[#allocation2 + $0x84] ss:$16 sps:$4 sm:$0xff]  }
 0x260   :  { %v1111_v2 = vsel %vm5383_vm11, %v1088_v32, %v1110_v22  ;;  %v1178_v17 = vunpack.c.l.b16 %v1088_v32  ;;  %v1183_v15 = vsel %vm741_vm4, %v1182_v4, %v1181_v10  ;;  %v1188_v36 = vrot.slane %v1177_v46, 4  ;;  %6811 = vst [vmem:[#allocation23_spill] sm:$0xff] %v5442_v56  ;;  %v5445_v47 = vld [vmem:[#allocation2 + $0x8c] ss:$16 sps:$4 sm:$0xff]   ;;  %v5448_v44 = vld [vmem:[#allocation2 + $0x80] ss:$16 sps:$4 sm:$0xff]  }
 0x261   :  { %1112 = vst [vmem:[#allocation10 + $0x18] sm:$0x1] %v1111_v2  ;;  %v1114_v52 = vsel %vm5383_vm11, %v1089_v7, %v1113_v42  ;;  %v1179_v45 = vunpack.c.l.b16 %v1089_v7  ;;  %v1185_v48 = vsel %vm744_vm5, %v1184_v13, %v1183_v15  ;;  %6812 = vst [vmem:[#allocation24_spill] sm:$0xff] %v5445_v47  ;;  %v5451_v61 = vld [vmem:[#allocation2 + $0x88] ss:$16 sps:$4 sm:$0xff]  }
 0x262   :  { %1115 = vst [vmem:[#allocation10 + $0x1c] sm:$0x1] %v1114_v52  ;;  %v1187_v38 = vsel %vm747_vm6, %v1186_v11, %v1185_v48  ;;  %v1190_v1 = vrot.slane %v1178_v17, 3  ;;  %6813 = vst [vmem:[#allocation25_spill] sm:$0xff] %v5448_v44  ;;  %v5454_v57 = vld [vmem:[#allocation2 + $0x64] ss:$16 sps:$4 sm:$0xff]  }
 0x263   :  { %v1189_v50 = vsel %vm750_vm7, %v1188_v36, %v1187_v38  ;;  %v1192_v37 = vrot.slane %v1179_v45, 2  ;;  %6814 = vst [vmem:[#allocation26_spill] sm:$0xff] %v5451_v61  ;;  %6815 = vst [vmem:[#allocation27_spill] sm:$0xff] %v5454_v57  ;;  %v5457_v19 = vld [vmem:[#allocation2 + $0x6c] ss:$16 sps:$4 sm:$0xff]  }
 0x264   :  { %v1191_v33 = vsel %vm753_vm8, %v1190_v1, %v1189_v50  ;;  %6816 = vst [vmem:[#allocation28_spill] sm:$0xff] %v5457_v19  ;;  %v5460_v53 = vld [vmem:[#allocation2 + $0x60] ss:$16 sps:$4 sm:$0xff]   ;;  %v5463_v40 = vld [vmem:[#allocation2 + $0x68] ss:$16 sps:$4 sm:$0xff]  }
 0x265   :  { %v1193_v23 = vsel %vm756_vm9, %v1192_v37, %v1191_v33  ;;  %6817 = vst [vmem:[#allocation29_spill] sm:$0xff] %v5460_v53  ;;  %6818 = vst [vmem:[#allocation30_spill] sm:$0xff] %v5463_v40  ;;  %v5466_v60 = vld [vmem:[#allocation2 + $0x44] ss:$16 sps:$4 sm:$0xff]   ;;  %v5469_v3 = vld [vmem:[#allocation2 + $0x4c] ss:$16 sps:$4 sm:$0xff]  }
 0x266   :  { %v1194_v51 = vpack.c.b16 %v1193_v23, %v1193_v23  ;;  %6819 = vst [vmem:[#allocation31_spill] sm:$0xff] %v5466_v60  ;;  %6820 = vst [vmem:[#allocation32_spill] sm:$0xff] %v5469_v3  ;;  %v5472_v0 = vld [vmem:[#allocation2 + $0x40] ss:$16 sps:$4 sm:$0xff]   ;;  %v5475_v43 = vld [vmem:[#allocation2 + $0x48] ss:$16 sps:$4 sm:$0xff]  }
 0x267   :  { %6821 = vst [vmem:[#allocation33_spill] sm:$0xff] %v5472_v0  ;;  %6822 = vst [vmem:[#allocation34_spill] sm:$0xff] %v5475_v43  ;;  %v5478_v49 = vld [vmem:[#allocation2 + $0x24] ss:$16 sps:$4 sm:$0xff]   ;;  %v5481_v55 = vld [vmem:[#allocation2 + $0x2c] ss:$16 sps:$4 sm:$0xff]  }
 0x268   :  { %1229 = vmatmul.mubr.bf16.vlgmr.msra.gmra.mxu0 %v1194_v51  ;;  %1270 = vmatmul.mubr.bf16.vlgmr.msra.gmra.mxu1 %v1194_v51  ;;  %6823 = vst [vmem:[#allocation35_spill] sm:$0xff] %v5478_v49  ;;  %6824 = vst [vmem:[#allocation36_spill] sm:$0xff] %v5481_v55  ;;  %v5484_v12 = vld [vmem:[#allocation2 + $0x20] ss:$16 sps:$4 sm:$0xff]   ;;  %v5487_v34 = vld [vmem:[#allocation2 + $0x28] ss:$16 sps:$4 sm:$0xff]  }
 0x269   :  { %1634 = vmatpush1.bf16.msra.mxu0 %v5410_v58  ;;  %1675 = vmatpush1.bf16.msra.mxu1 %v5413_v27  ;;  %6825 = vst [vmem:[#allocation37_spill] sm:$0xff] %v5484_v12  ;;  %6826 = vst [vmem:[#allocation38_spill] sm:$0xff] %v5487_v34  ;;  %v5490_v54 = vld [vmem:[#allocation2 + $0x4] ss:$16 sps:$4 sm:$0xff]   ;;  %v5493_v20 = vld [vmem:[#allocation2 + $0xc] ss:$16 sps:$4 sm:$0xff]  }
 0x26a   :  { %1635 = vmatprep.subr.bf16.mxu0 %v5416_v63  ;;  %1676 = vmatprep.subr.bf16.mxu1 %v5419_v31  ;;  %6827 = vst [vmem:[#allocation39_spill] sm:$0xff] %v5490_v54  ;;  %6828 = vst [vmem:[#allocation40_spill] sm:$0xff] %v5493_v20  ;;  %v5496_v9 = vld [vmem:[#allocation2] ss:$16 sps:$4 sm:$0xff]   ;;  %v5499_v10 = vld [vmem:[#allocation2 + $0x8] ss:$16 sps:$4 sm:$0xff]  }
 0x26b   :  { %1665 = vmatprep.mubr.bf16.mxu0 %v6791_v24  ;;  %1706 = vmatprep.mubr.bf16.mxu1 %v6791_v24  ;;  %6829 = vst [vmem:[#allocation41_spill] sm:$0xff] %v5496_v9  ;;  %6830 = vst [vmem:[#allocation42_spill] sm:$0xff] %v5499_v10  ;;  %v5504_v32 = vld [vmem:[#allocation4] sm:$0x22]  ;;  %v5506_v35 = vld [vmem:[#allocation4 + $0x10] sm:$0x22] }
 0x26c   :  { %v5508_v46 = vld [vmem:[#allocation4 + $0x20] sm:$0x22]  ;;  %v5510_v4 = vld [vmem:[#allocation4 + $0x30] sm:$0x22]  ;;  %v1132_v2 = vunpack.c.l.bf16 %v5504_v32  ;;  %v5532_v23 = vld [vmem:[#allocation4 + $0x28] sm:$0x22] }
 0x26d   :  { %1636 = vmatpush1.bf16.msra.mxu0 %v5424_v28  ;;  %1677 = vmatpush1.bf16.msra.mxu1 %v5427_v14  ;;  %v5512_v7 = vld [vmem:[#allocation4 + $0x40] sm:$0x22]  ;;  %v5514_v22 = vld [vmem:[#allocation4 + $0x50] sm:$0x22]  ;;  %v1144_v17 = vunpack.c.l.bf16 %v5510_v4  ;;  %vm3273_vm11 = vsmask.f32 3328 }
 0x26e   :  { %1637 = vmatprep.subr.bf16.mxu0 %v5430_v30  ;;  %1678 = vmatprep.subr.bf16.mxu1 %v5433_v39  ;;  %v5516_v13 = vld [vmem:[#allocation4 + $0x60] sm:$0x22]  ;;  %v5520_v42 = vld [vmem:[#allocation4 + $0x70] sm:$0x22]  ;;  %v1148_v15 = vunpack.c.l.bf16 %v5512_v7  ;;  %v1152_v11 = vunpack.c.l.bf16 %v5514_v22  ;;  %vm6506_vm12 = vmand %vm744_vm5, %vm3273_vm11 }
 0x26f   :  { %v1156_v52 = vunpack.c.l.bf16 %v5516_v13 }
 0x271   :  { %1638 = vmatpush1.bf16.msra.mxu0 %v5436_v26  ;;  %1679 = vmatpush1.bf16.msra.mxu1 %v5439_v59 }
 0x272   :  { %1639 = vmatprep.subr.bf16.mxu0 %v5442_v56  ;;  %1680 = vmatprep.subr.bf16.mxu1 %v5445_v47 }
 0x275   :  { %1640 = vmatpush1.bf16.msra.mxu0 %v5448_v44  ;;  %1681 = vmatpush1.bf16.msra.mxu1 %v5451_v61  ;;  %v5553_v61 = vld [vmem:[#allocation4 + $0x58] sm:$0x22] }
 0x276   :  { %1641 = vmatprep.subr.bf16.mxu0 %v5454_v57  ;;  %1682 = vmatprep.subr.bf16.mxu1 %v5457_v19  ;;  %v1154_v47 = vunpack.c.l.bf16 %v5553_v61 }
 0x279   :  { %1642 = vmatpush1.bf16.msra.mxu0 %v5460_v53  ;;  %1683 = vmatpush1.bf16.msra.mxu1 %v5463_v40 }
 0x27a   :  { %1643 = vmatprep.subr.bf16.mxu0 %v5466_v60  ;;  %1684 = vmatprep.subr.bf16.mxu1 %v5469_v3  ;;  %v5549_v3 = vld [vmem:[#allocation4 + $0x48] sm:$0x22]  ;;  %v1142_v60 = vunpack.c.l.bf16 %v5532_v23 }
 0x27d   :  { %1644 = vmatpush1.bf16.msra.mxu0 %v5472_v0  ;;  %1685 = vmatpush1.bf16.msra.mxu1 %v5475_v43 }
 0x27e   :  { %1645 = vmatprep.subr.bf16.mxu0 %v5478_v49  ;;  %1686 = vmatprep.subr.bf16.mxu1 %v5481_v55  ;;  %v5545_v49 = vld [vmem:[#allocation4 + $0x38] sm:$0x22] }
 0x281   :  { %1646 = vmatpush1.bf16.msra.mxu0 %v5484_v12  ;;  %1687 = vmatpush1.bf16.msra.mxu1 %v5487_v34  ;;  %v5538_v34 = vld [vmem:[#allocation4 + $0x18] sm:$0x22] }
 0x282   :  { %1647 = vmatprep.subr.bf16.mxu0 %v5490_v54  ;;  %1688 = vmatprep.subr.bf16.mxu1 %v5493_v20  ;;  %v5536_v54 = vld [vmem:[#allocation4 + $0x8] sm:$0x22]  ;;  %v1138_v43 = vunpack.c.l.bf16 %v5538_v34 }
 0x285   :  { %1648 = vmatpush1.bf16.msra.mxu0 %v5496_v9  ;;  %1689 = vmatpush1.bf16.msra.mxu1 %v5499_v10  ;;  %v1160_v10 = vunpack.c.l.bf16 %v5520_v42 }
 0x286   :  { %2069 = vmatprep.subr.bf16.mxu0 %v5230_v29  ;;  %2110 = vmatprep.subr.bf16.mxu1 %v5233_v62  ;;  %v1140_v29 = vunpack.c.l.bf16 %v5508_v46  ;;  %v1136_v62 = vunpack.c.l.bf16 %v5506_v35 }
 0x328   :  { %v1230_v45 = vpop.f32.mrf.mxu0  ;;  %v5527_v48 = vpop.f32.mrf.mxu1 }
 0x329   :  { %v1282_v50 = vrot.slane %v1230_v45, 6  ;;  %v1286_v37 = vrot.slane %v1230_v45, 7  ;;  %v1290_v33 = vrot.slane %v1230_v45, 1  ;;  %v1294_v9 = vrot.slane %v1230_v45, 2 }
 0x32a   :  { %v1350_v20 = vadd.f32 %v1230_v45, %v1140_v29  ;;  %v5540_v36 = vpop.f32.mrf.mxu0  ;;  %v5543_v1 = vpop.f32.mrf.mxu1  ;;  %v1298_v12 = vrot.slane %v1230_v45, 3  ;;  %v1302_v0 = vrot.slane %v1230_v45, 4  ;;  %v1306_v19 = vrot.slane %v1230_v45, 5  ;;  %v5561_v45 = vld [vmem:[#allocation4 + $0x78] sm:$0x22] }
 0x32b   :  { %v1342_v55 = vadd.f32 %v1282_v50, %v1132_v2  ;;  %v1346_v29 = vadd.f32 %v1286_v37, %v1136_v62  ;;  %v1354_v57 = vadd.f32 %v1290_v33, %v1144_v17  ;;  %v5555_v2 = vld [vmem:[#allocation4 + $0x68] sm:$0x22]  ;;  %v1134_v50 = vunpack.c.l.bf16 %v5536_v54 }
 0x32c   :  { %v1234_v53 = vpop.f32.mrf.mxu0  ;;  %v1275_v38 = vpop.f32.mrf.mxu1  ;;  %v1358_v51 = vadd.f32 %v1294_v9, %v1148_v15  ;;  %4089 = vtanh.f32 %v1350_v20  ;;  %v1146_v62 = vunpack.c.l.bf16 %v5545_v49  ;;  %v1284_v37 = vrot.slane %v5527_v48, 6 }
 0x32d   :  { %v1362_v53 = vadd.f32 %v1298_v12, %v1152_v11  ;;  %4091 = vtanh.f32 %v1342_v55  ;;  %v1150_v17 = vunpack.c.l.bf16 %v5549_v3  ;;  %v1288_v38 = vrot.slane %v5527_v48, 7 }
 0x32e   :  { %v1235_v44 = vpop.f32.mrf.mxu0  ;;  %v1276_v40 = vpop.f32.mrf.mxu1  ;;  %v1366_v33 = vadd.f32 %v1302_v0, %v1156_v52  ;;  %4093 = vtanh.f32 %v1346_v29  ;;  %v1158_v20 = vunpack.c.l.bf16 %v5555_v2  ;;  %v1370_v9 = vadd.f32 %v1306_v19, %v1160_v10 }
 0x32f   :  { %4095 = vtanh.f32 %v1354_v57  ;;  %v1292_v15 = vrot.slane %v5527_v48, 1  ;;  %v1141_v44 = vunpack.c.h.bf16 %v5508_v46  ;;  %v1162_v40 = vunpack.c.l.bf16 %v5561_v45 }
 0x330   :  { %4097 = vtanh.f32 %v1358_v51  ;;  %v1296_v55 = vrot.slane %v5527_v48, 2  ;;  %v1344_v12 = vadd.f32 %v1284_v37, %v1134_v50  ;;  %v1300_v0 = vrot.slane %v5527_v48, 3 }
 0x331   :  { %4099 = vtanh.f32 %v1362_v53  ;;  %v1348_v11 = vadd.f32 %v1288_v38, %v1138_v43  ;;  %v1133_v52 = vunpack.c.h.bf16 %v5504_v32  ;;  %v1352_v19 = vadd.f32 %v5527_v48, %v1142_v60 }
 0x332   :  { %4101 = vtanh.f32 %v1366_v33  ;;  %v1137_v57 = vunpack.c.h.bf16 %v5506_v35  ;;  %v1283_v10 = vrot.slane %v5540_v36, 6  ;;  %v1356_v46 = vadd.f32 %v1292_v15, %v1146_v62 }
 0x333   :  { %4103 = vtanh.f32 %v1370_v9  ;;  %v1145_v51 = vunpack.c.h.bf16 %v5510_v4  ;;  %v1287_v29 = vrot.slane %v5540_v36, 7  ;;  %v1360_v50 = vadd.f32 %v1296_v55, %v1150_v17 }
 0x334   :  { %4105 = vtanh.f32 %v1344_v12  ;;  %v1149_v37 = vunpack.c.h.bf16 %v5512_v7  ;;  %v1153_v43 = vunpack.c.h.bf16 %v5514_v22  ;;  %v1364_v32 = vadd.f32 %v1300_v0, %v1154_v47 }
 0x335   :  { %4107 = vtanh.f32 %v1348_v11  ;;  %v1157_v60 = vunpack.c.h.bf16 %v5516_v13  ;;  %v1291_v35 = vrot.slane %v5540_v36, 1  ;;  %v1161_v53 = vunpack.c.h.bf16 %v5520_v42 }
 0x336   :  { %4109 = vtanh.f32 %v1352_v19  ;;  %v1295_v62 = vrot.slane %v5540_v36, 2  ;;  %v1343_v4 = vadd.f32 %v1283_v10, %v1133_v52  ;;  %v1299_v17 = vrot.slane %v5540_v36, 3 }
 0x337   :  { %4111 = vtanh.f32 %v1356_v46  ;;  %v1347_v38 = vadd.f32 %v1287_v29, %v1137_v57  ;;  %v1143_v7 = vunpack.c.h.bf16 %v5532_v23  ;;  %v1303_v47 = vrot.slane %v5540_v36, 4 }
 0x338   :  { %4113 = vtanh.f32 %v1360_v50  ;;  %v1351_v22 = vadd.f32 %v5540_v36, %v1141_v44  ;;  %v1135_v13 = vunpack.c.h.bf16 %v5536_v54  ;;  %v1304_v9 = vrot.slane %v5527_v48, 4 }
 0x339   :  { %v4090_v33 = vpop.eup %4089  ;;  %4115 = vtanh.f32 %v1364_v32  ;;  %v1307_v42 = vrot.slane %v5540_v36, 5  ;;  %v1355_v15 = vadd.f32 %v1291_v35, %v1145_v51  ;;  %v1308_v12 = vrot.slane %v5527_v48, 5 }
 0x33a   :  { %v4092_v55 = vpop.eup %4091  ;;  %v1359_v0 = vadd.f32 %v1295_v62, %v1149_v37  ;;  %4117 = vtanh.f32 %v1343_v4  ;;  %v1139_v23 = vunpack.c.h.bf16 %v5538_v34  ;;  %v1363_v52 = vadd.f32 %v1299_v17, %v1153_v43 }
 0x33b   :  { %v4094_v11 = vpop.eup %4093  ;;  %4119 = vtanh.f32 %v1347_v38  ;;  %v1147_v44 = vunpack.c.h.bf16 %v5545_v49  ;;  %v1151_v54 = vunpack.c.h.bf16 %v5549_v3  ;;  %v1367_v57 = vadd.f32 %v1303_v47, %v1157_v60 }
 0x33c   :  { %v4096_v19 = vpop.eup %4095  ;;  %4121 = vtanh.f32 %v1351_v22  ;;  %v1155_v36 = vunpack.c.h.bf16 %v5553_v61  ;;  %v1159_v10 = vunpack.c.h.bf16 %v5555_v2  ;;  %v1368_v48 = vadd.f32 %v1304_v9, %v1158_v20 }
 0x33d   :  { %v4098_v46 = vpop.eup %4097  ;;  %v1371_v51 = vadd.f32 %v1307_v42, %v1161_v53  ;;  %4123 = vtanh.f32 %v1355_v15  ;;  %v1163_v34 = vunpack.c.h.bf16 %v5561_v45  ;;  %v1372_v50 = vadd.f32 %v1308_v12, %v1162_v40 }
 0x33e   :  { %v4100_v29 = vpop.eup %4099  ;;  %4125 = vtanh.f32 %v1359_v0  ;;  %v1285_v49 = vrot.slane %v5543_v1, 6  ;;  %v1289_v3 = vrot.slane %v5543_v1, 7  ;;  %v1382_v43 = vmul.f32 0.5, %v4092_v55 }
 0x33f   :  { %v4102_v37 = vpop.eup %4101  ;;  %4127 = vtanh.f32 %v1363_v52  ;;  %v1293_v61 = vrot.slane %v5543_v1, 1  ;;  %v1297_v2 = vrot.slane %v5543_v1, 2  ;;  %v1383_v20 = vmul.f32 0.5, %v4094_v11 }
 0x340   :  { %v4104_v32 = vpop.eup %4103  ;;  %4129 = vtanh.f32 %v1367_v57  ;;  %v1301_v60 = vrot.slane %v5543_v1, 3  ;;  %v1305_v45 = vrot.slane %v5543_v1, 4  ;;  %v1384_v35 = vmul.f32 0.5, %v4090_v33 }
 0x341   :  { %v4106_v40 = vpop.eup %4105  ;;  %v1385_v53 = vmul.f32 0.5, %v4096_v19  ;;  %4131 = vtanh.f32 %v1371_v51  ;;  %v1309_v62 = vrot.slane %v5543_v1, 5  ;;  %v1386_v17 = vmul.f32 0.5, %v4098_v46 }
 0x342   :  { %v4108_v4 = vpop.eup %4107  ;;  %4133 = vtanh.f32 %v1368_v48  ;;  %v1345_v38 = vadd.f32 %v1285_v49, %v1135_v13  ;;  %v1349_v47 = vadd.f32 %v1289_v3, %v1139_v23  ;;  %v1387_v9 = vmul.f32 0.5, %v4100_v29 }
 0x343   :  { %v4110_v22 = vpop.eup %4109  ;;  %v1388_v42 = vmul.f32 0.5, %v4102_v37  ;;  %v1390_v15 = vadd.f32 0.5, %v1382_v43  ;;  %v1353_v55 = vadd.f32 %v5543_v1, %v1143_v7  ;;  %v1389_v0 = vmul.f32 0.5, %v4104_v32 }
 0x344   :  { %v4112_v12 = vpop.eup %4111  ;;  %v1391_v11 = vadd.f32 0.5, %v1383_v20  ;;  %4135 = vtanh.f32 %v1372_v50  ;;  %v1357_v33 = vadd.f32 %v1293_v61, %v1147_v44  ;;  %v1392_v19 = vadd.f32 0.5, %v1384_v35 }
 0x345   :  { %v4114_v52 = vpop.eup %4113  ;;  %v1393_v57 = vadd.f32 0.5, %v1385_v53  ;;  %v1361_v51 = vadd.f32 %v1297_v2, %v1151_v54  ;;  %v1365_v56 = vadd.f32 %v1301_v60, %v1155_v36  ;;  %v1394_v48 = vadd.f32 0.5, %v1386_v17 }
 0x346   :  { %v4116_v46 = vpop.eup %4115  ;;  %v1369_v13 = vadd.f32 %v1305_v45, %v1159_v10  ;;  %4137 = vtanh.f32 %v1345_v38  ;;  %v1373_v23 = vadd.f32 %v1309_v62, %v1163_v34  ;;  %v1395_v49 = vadd.f32 0.5, %v1387_v9 }
 0x347   :  { %v4118_v29 = vpop.eup %4117  ;;  %v1396_v3 = vadd.f32 0.5, %v1388_v42  ;;  %v1462_v37 = vmul.f32 %v4106_v40, %v1390_v15  ;;  %4139 = vtanh.f32 %v1349_v47  ;;  %v1397_v7 = vadd.f32 0.5, %v1389_v0 }
 0x348   :  { %v4120_v1 = vpop.eup %4119  ;;  %v1406_v43 = vmul.f32 0.5, %v4118_v29  ;;  %v1463_v50 = vmul.f32 %v4108_v4, %v1391_v11  ;;  %4141 = vtanh.f32 %v1353_v55  ;;  %v1464_v32 = vmul.f32 %v4110_v22, %v1392_v19 }
 0x349   :  { %v4122_v44 = vpop.eup %4121  ;;  %v1407_v61 = vmul.f32 0.5, %v4120_v1  ;;  %v1465_v54 = vmul.f32 %v4112_v12, %v1393_v57  ;;  %4143 = vtanh.f32 %v1357_v33  ;;  %v1466_v20 = vmul.f32 %v4114_v52, %v1394_v48 }
 0x34a   :  { %v4124_v36 = vpop.eup %4123  ;;  %v1408_v2 = vmul.f32 0.5, %v4122_v44  ;;  %v1414_v10 = vadd.f32 0.5, %v1406_v43  ;;  %4145 = vtanh.f32 %v1361_v51  ;;  %v1467_v40 = vmul.f32 %v4116_v46, %v1395_v49 }
 0x34b   :  { %v4126_v34 = vpop.eup %4125  ;;  %v1409_v60 = vmul.f32 0.5, %v4124_v36  ;;  %v1415_v45 = vadd.f32 0.5, %v1407_v61  ;;  %4147 = vtanh.f32 %v1365_v56  ;;  %v6831_v4 = vrot.slane %v5348_v21, 7 }
 0x34c   :  { %v4128_v35 = vpop.eup %4127  ;;  %v1410_v53 = vmul.f32 0.5, %v4126_v34  ;;  %v1416_v62 = vadd.f32 0.5, %v1408_v2  ;;  %4149 = vtanh.f32 %v1369_v13  ;;  %v6832_v9 = vrot.slane %v5352_v25, 7 }
 0x34d   :  { %v1454_v17 = vmul.f32 %v6831_v4, %v1414_v10  ;;  %v4130_v38 = vpop.eup %4129  ;;  %v1411_v47 = vmul.f32 0.5, %v4128_v35  ;;  %v1417_v22 = vadd.f32 0.5, %v1409_v60  ;;  %4151 = vtanh.f32 %v1373_v23 }
 0x34e   :  { %v1455_v42 = vmul.f32 %v6832_v9, %v1415_v45  ;;  %v4132_v15 = vpop.eup %4131  ;;  %v1412_v55 = vmul.f32 0.5, %v4130_v38  ;;  %v1418_v12 = vadd.f32 0.5, %v1410_v53  ;;  %v6833_v0 = vrot.slane %v5356_v18, 7 }
 0x34f   :  { %v5612_v11 = vadd.f32 %v1462_v37, %v1454_v17  ;;  %v4134_v33 = vpop.eup %4133  ;;  %v1413_v52 = vmul.f32 0.5, %v4132_v15  ;;  %v1419_v21 = vadd.f32 0.5, %v1411_v47  ;;  %v6834_v19 = vrot.slane %v5361_v8, 7 }
 0x350   :  { %v1456_v56 = vmul.f32 %v6833_v0, %v1416_v62  ;;  %v5616_v51 = vadd.f32 %v1463_v50, %v1455_v42  ;;  %v1420_v46 = vadd.f32 0.5, %v1412_v55  ;;  %v6835_v25 = vrot.slane %v5366_v41, 7 }
 0x351   :  { %v1457_v57 = vmul.f32 %v6834_v19, %v1417_v22  ;;  %4153 = vtanh.f32 %v5612_v11  ;;  %v4136_v18 = vpop.eup %4135  ;;  %v1421_v23 = vadd.f32 0.5, %v1413_v52  ;;  %v6836_v29 = vrot.slane %v5371_v16, 7  ;;  %v1532_v19 = vld [vmem:[#allocation10 + $0x4] sm:$0x2] }
 0x352   :  { %v1458_v48 = vmul.f32 %v6835_v25, %v1418_v12  ;;  %v5620_v13 = vadd.f32 %v1464_v32, %v1456_v56  ;;  %4155 = vtanh.f32 %v5616_v51  ;;  %v6837_v8 = vrot.slane %v5374_v5, 7  ;;  %v1529_v12 = vld [vmem:[#allocation10] sm:$0x2] }
 0x353   :  { %v1459_v49 = vmul.f32 %v6836_v29, %v1419_v21  ;;  %v5625_v37 = vadd.f32 %v1465_v54, %v1457_v57  ;;  %v1468_v43 = vmul.f32 %v4134_v33, %v1396_v3  ;;  %v4138_v41 = vpop.eup %4137  ;;  %v6838_v44 = vrot.slane %v5377_v6, 7  ;;  %v1535_v29 = vld [vmem:[#allocation10 + $0x8] sm:$0x2] }
 0x354   :  { %v1460_v1 = vmul.f32 %v6837_v8, %v1420_v46  ;;  %v5630_v50 = vadd.f32 %v1466_v20, %v1458_v48  ;;  %4157 = vtanh.f32 %v5620_v13  ;;  %v1469_v32 = vmul.f32 %v4136_v18, %v1397_v7  ;;  %v4140_v16 = vpop.eup %4139 }
 0x355   :  { %v1461_v61 = vmul.f32 %v6838_v44, %v1421_v23  ;;  %v5635_v36 = vadd.f32 %v1467_v40, %v1459_v49  ;;  %4159 = vtanh.f32 %v5625_v37  ;;  %v4142_v5 = vpop.eup %4141  ;;  %v1486_v7 = vmul.f32 0.5, %v4138_v41  ;;  %v1538_v41 = vld [vmem:[#allocation10 + $0xc] sm:$0x2]  ;;  %v6845_v23 = vld [vmem:[#allocation27_spill] sm:$0xff] }
 0x356   :  { %v5638_v54 = vadd.f32 %v1468_v43, %v1460_v1  ;;  %4161 = vtanh.f32 %v5630_v50  ;;  %v4144_v2 = vpop.eup %4143  ;;  %v1487_v34 = vmul.f32 0.5, %v4140_v16  ;;  %v1488_v45 = vmul.f32 0.5, %v4142_v5  ;;  %v1541_v5 = vld [vmem:[#allocation10 + $0x10] sm:$0x2] }
 0x357   :  { %v5641_v3 = vadd.f32 %v1469_v32, %v1461_v61  ;;  %4163 = vtanh.f32 %v5635_v36  ;;  %v4146_v10 = vpop.eup %4145  ;;  %v1489_v40 = vmul.f32 0.5, %v4144_v2  ;;  %v1494_v35 = vadd.f32 0.5, %v1486_v7 }
 0x358   :  { %4165 = vtanh.f32 %v5638_v54  ;;  %v4148_v6 = vpop.eup %4147  ;;  %v1490_v53 = vmul.f32 0.5, %v4146_v10  ;;  %v1495_v4 = vadd.f32 0.5, %v1487_v34  ;;  %v1496_v22 = vadd.f32 0.5, %v1488_v45  ;;  %v1544_v34 = vld [vmem:[#allocation10 + $0x14] sm:$0x2] }
 0x359   :  { %4167 = vtanh.f32 %v5641_v3  ;;  %v4150_v20 = vpop.eup %4149  ;;  %v1491_v17 = vmul.f32 0.5, %v4148_v6  ;;  %v1497_v55 = vadd.f32 0.5, %v1489_v40 }
 0x35a   :  { %v4152_v60 = vpop.eup %4151  ;;  %v1492_v38 = vmul.f32 0.5, %v4150_v20  ;;  %v1498_v33 = vadd.f32 0.5, %v1490_v53 }
 0x35b   :  { %v1493_v56 = vmul.f32 0.5, %v4152_v60  ;;  %v1499_v46 = vadd.f32 0.5, %v1491_v17 }
 0x35c   :  { %v1500_v25 = vadd.f32 0.5, %v1492_v38  ;;  %v1547_v38 = vld [vmem:[#allocation10 + $0x18] sm:$0x2] }
 0x35d   :  { %v1501_v6 = vadd.f32 0.5, %v1493_v56 }
 0x35e   :  { %v4154_v62 = vpop.eup %4153 }
 0x35f   :  { %v4156_v47 = vpop.eup %4155  ;;  %v1510_v9 = vmul.f32 %v4154_v62, %v1494_v35 }
 0x360   :  { %v1511_v15 = vmul.f32 %v4156_v47, %v1495_v4 }
 0x361   :  { %v4158_v42 = vpop.eup %4157  ;;  %v1518_v21 = vpack.c.bf16 %v1510_v9, %v1510_v9 }
 0x362   :  { %v4160_v0 = vpop.eup %4159  ;;  %v1512_v52 = vmul.f32 %v4158_v42, %v1496_v22  ;;  %v1519_v18 = vpack.c.bf16 %v1511_v15, %v1511_v15  ;;  %v1550_v15 = vld [vmem:[#allocation10 + $0x1c] sm:$0x2] }
 0x363   :  { %v4162_v57 = vpop.eup %4161  ;;  %v1513_v48 = vmul.f32 %v4160_v0, %v1497_v55  ;;  %v1530_v43 = vsel %vm5648_vm13, %v1518_v21, %v1529_v12  ;;  %v1609_v44 = vunpack.c.l.b16 %v1518_v21 }
 0x364   :  { %v4164_v49 = vpop.eup %4163  ;;  %v1514_v8 = vmul.f32 %v4162_v57, %v1498_v33  ;;  %v1520_v1 = vpack.c.bf16 %v1512_v52, %v1512_v52  ;;  %1531 = vst [vmem:[#allocation10] sm:$0x2] %v1530_v43  ;;  %v1533_v16 = vsel %vm5648_vm13, %v1519_v18, %v1532_v19  ;;  %v1610_v2 = vunpack.c.l.b16 %v1519_v18 }
 0x365   :  { %v1515_v61 = vmul.f32 %v4164_v49, %v1499_v46  ;;  %v1521_v32 = vpack.c.bf16 %v1513_v48, %v1513_v48  ;;  %v4166_v10 = vpop.eup %4165  ;;  %1534 = vst [vmem:[#allocation10 + $0x4] sm:$0x2] %v1533_v16  ;;  %v1617_v60 = vrot.slane %v1609_v44, 2  ;;  %v6854_v16 = vld [vmem:[#allocation36_spill] sm:$0xff] }
 0x366   :  { %v1522_v7 = vpack.c.bf16 %v1514_v8, %v1514_v8  ;;  %v1536_v20 = vsel %vm5648_vm13, %v1520_v1, %v1535_v29  ;;  %v4168_v45 = vpop.eup %4167  ;;  %v1516_v40 = vmul.f32 %v4166_v10, %v1500_v25  ;;  %v1618_v22 = vrot.slane %v1610_v2, 1  ;;  %v6856_v2 = vld [vmem:[#allocation38_spill] sm:$0xff]  ;;  %v6857_v10 = vld [vmem:[#allocation39_spill] sm:$0xff] }
 0x367   :  { %v1523_v35 = vpack.c.bf16 %v1515_v61, %v1515_v61  ;;  %1537 = vst [vmem:[#allocation10 + $0x8] sm:$0x2] %v1536_v20  ;;  %v1539_v53 = vsel %vm5648_vm13, %v1521_v32, %v1538_v41  ;;  %v1612_v62 = vunpack.c.l.b16 %v1521_v32  ;;  %v1517_v4 = vmul.f32 %v4168_v45, %v1501_v6  ;;  %v6852_v61 = vld [vmem:[#allocation34_spill] sm:$0xff]  ;;  %v6853_v32 = vld [vmem:[#allocation35_spill] sm:$0xff]  ;;  %v6858_v6 = vld [vmem:[#allocation40_spill] sm:$0xff] }
 0x368   :  { %1540 = vst [vmem:[#allocation10 + $0xc] sm:$0x2] %v1539_v53  ;;  %v1542_v17 = vsel %vm5648_vm13, %v1522_v7, %v1541_v5  ;;  %v1613_v47 = vunpack.c.l.b16 %v1522_v7  ;;  %v1524_v9 = vpack.c.bf16 %v1516_v40, %v1516_v40  ;;  %v1611_v55 = vunpack.c.l.b16 %v1520_v1  ;;  %v6855_v5 = vld [vmem:[#allocation37_spill] sm:$0xff]  ;;  %v6860_v20 = vld [vmem:[#allocation42_spill] sm:$0xff]  ;;  %v5713_v45 = vld [vmem:[#allocation4] sm:$0x22] }
 0x369   :  { %1543 = vst [vmem:[#allocation10 + $0x10] sm:$0x2] %v1542_v17  ;;  %v1545_v42 = vsel %vm5648_vm13, %v1523_v35, %v1544_v34  ;;  %v1614_v12 = vunpack.c.l.b16 %v1523_v35  ;;  %v1525_v0 = vpack.c.bf16 %v1517_v4, %v1517_v4  ;;  %v1619_v56 = vsel %vm738_vm2, %v1618_v22, %v1617_v60  ;;  %v6859_v7 = vld [vmem:[#allocation41_spill] sm:$0xff]  ;;  %v5710_v60 = vld [vmem:[#allocation2 + $0xec] ss:$16 sps:$4 sm:$0xff]  }
 0x36a   :  { %1546 = vst [vmem:[#allocation10 + $0x14] sm:$0x2] %v1545_v42  ;;  %v1621_v33 = vrot.slane %v1612_v62, 7  ;;  %v1548_v52 = vsel %vm5648_vm13, %v1524_v9, %v1547_v38  ;;  %v1615_v21 = vunpack.c.l.b16 %v1524_v9  ;;  %v1620_v19 = vsel %vm741_vm4, %v1611_v55, %v1619_v56  ;;  %v5707_v34 = vld [vmem:[#allocation2 + $0xe4] ss:$16 sps:$4 sm:$0xff]  }
 0x36b   :  { %v1623_v57 = vrot.slane %v1613_v47, 6  ;;  %1549 = vst [vmem:[#allocation10 + $0x18] sm:$0x2] %v1548_v52  ;;  %v1551_v46 = vsel %vm5648_vm13, %v1525_v0, %v1550_v15  ;;  %v1616_v25 = vunpack.c.l.b16 %v1525_v0  ;;  %v1625_v18 = vrot.slane %v1614_v12, 5  ;;  %v5715_v40 = vld [vmem:[#allocation4 + $0x10] sm:$0x22] }
 0x36c   :  { %v1622_v48 = vsel %vm744_vm5, %v1621_v33, %v1620_v19  ;;  %1552 = vst [vmem:[#allocation10 + $0x1c] sm:$0x2] %v1551_v46  ;;  %v1627_v49 = vrot.slane %v1615_v21, 4  ;;  %v5717_v35 = vld [vmem:[#allocation4 + $0x30] sm:$0x22]  ;;  %v1569_v38 = vunpack.c.l.bf16 %v5713_v45  ;;  %v1573_v9 = vunpack.c.l.bf16 %v5715_v40 }
 0x36d   :  { %v1624_v29 = vsel %vm747_vm6, %v1623_v57, %v1622_v48  ;;  %v1629_v1 = vrot.slane %v1616_v25, 3  ;;  %v5719_v53 = vld [vmem:[#allocation4 + $0x20] sm:$0x22]  ;;  %v5723_v4 = vld [vmem:[#allocation4 + $0x50] sm:$0x22]  ;;  %v1581_v47 = vunpack.c.l.bf16 %v5717_v35  ;;  %v1875_v33 = vrot.slane %v5612_v11, 7 }
 0x36e   :  { %v1626_v8 = vsel %vm750_vm7, %v1625_v18, %v1624_v29  ;;  %v5721_v62 = vld [vmem:[#allocation4 + $0x40] sm:$0x22]  ;;  %v5729_v22 = vld [vmem:[#allocation4 + $0x70] sm:$0x22]  ;;  %v1577_v42 = vunpack.c.l.bf16 %v5719_v53  ;;  %v1589_v55 = vunpack.c.l.bf16 %v5723_v4  ;;  %v1876_v52 = vrot.slane %v5616_v51, 7 }
 0x36f   :  { %v1628_v43 = vsel %vm753_vm8, %v1627_v49, %v1626_v8  ;;  %v5725_v17 = vld [vmem:[#allocation4 + $0x60] sm:$0x22]  ;;  %v1585_v15 = vunpack.c.l.bf16 %v5721_v62  ;;  %v1877_v21 = vrot.slane %v5620_v13, 7  ;;  %v5741_v25 = vld [vmem:[#allocation4 + $0x38] sm:$0x22]  ;;  %v1878_v48 = vrot.slane %v5625_v37, 7 }
 0x370   :  { %v1630_v41 = vsel %vm756_vm9, %v1629_v1, %v1628_v43  ;;  %v1593_v12 = vunpack.c.l.bf16 %v5725_v17  ;;  %v1597_v18 = vunpack.c.l.bf16 %v5729_v22  ;;  %v5745_v8 = vld [vmem:[#allocation4 + $0x8] sm:$0x22]  ;;  %v5747_v1 = vld [vmem:[#allocation4 + $0x18] sm:$0x22] }
 0x371   :  { %v1631_v44 = vpack.c.b16 %v1630_v41, %v1630_v41  ;;  %v1879_v41 = vrot.slane %v5630_v50, 7 }
 0x373   :  { %1666 = vmatmul.mubr.bf16.vlgmr.msra.gmra.mxu0 %v1631_v44  ;;  %1707 = vmatmul.mubr.bf16.vlgmr.msra.gmra.mxu1 %v1631_v44 }
 0x374   :  { %2070 = vmatpush1.bf16.msra.mxu0 %v5410_v58  ;;  %2111 = vmatpush1.bf16.msra.mxu1 %v5413_v27  ;;  %v6841_v58 = vld [vmem:[#allocation23_spill] sm:$0xff]  ;;  %v6842_v27 = vld [vmem:[#allocation24_spill] sm:$0xff] }
 0x375   :  { %2071 = vmatprep.subr.bf16.mxu0 %v5416_v63  ;;  %2112 = vmatprep.subr.bf16.mxu1 %v5419_v31  ;;  %v6843_v63 = vld [vmem:[#allocation25_spill] sm:$0xff]  ;;  %v6844_v31 = vld [vmem:[#allocation26_spill] sm:$0xff] }
 0x376   :  { %2101 = vmatprep.mubr.bf16.mxu0 %v6791_v24  ;;  %2142 = vmatprep.mubr.bf16.mxu1 %v6791_v24 }
 0x378   :  { %2072 = vmatpush1.bf16.msra.mxu0 %v5424_v28  ;;  %2113 = vmatpush1.bf16.msra.mxu1 %v5427_v14  ;;  %v6846_v28 = vld [vmem:[#allocation28_spill] sm:$0xff]  ;;  %v6847_v14 = vld [vmem:[#allocation29_spill] sm:$0xff] }
 0x379   :  { %2073 = vmatprep.subr.bf16.mxu0 %v5430_v30  ;;  %2114 = vmatprep.subr.bf16.mxu1 %v5433_v39  ;;  %v6848_v30 = vld [vmem:[#allocation30_spill] sm:$0xff]  ;;  %v6849_v39 = vld [vmem:[#allocation31_spill] sm:$0xff] }
 0x37c   :  { %2074 = vmatpush1.bf16.msra.mxu0 %v5436_v26  ;;  %2115 = vmatpush1.bf16.msra.mxu1 %v5439_v59  ;;  %v6850_v26 = vld [vmem:[#allocation32_spill] sm:$0xff]  ;;  %v6851_v59 = vld [vmem:[#allocation33_spill] sm:$0xff] }
 0x37d   :  { %2075 = vmatprep.subr.bf16.mxu0 %v6841_v58  ;;  %2116 = vmatprep.subr.bf16.mxu1 %v6842_v27 }
 0x380   :  { %2076 = vmatpush1.bf16.msra.mxu0 %v6843_v63  ;;  %2117 = vmatpush1.bf16.msra.mxu1 %v6844_v31  ;;  %v5754_v63 = vld [vmem:[#allocation4 + $0x28] sm:$0x22]  ;;  %v1880_v31 = vrot.slane %v5635_v36, 7 }
 0x381   :  { %2077 = vmatprep.subr.bf16.mxu0 %v6845_v23  ;;  %2118 = vmatprep.subr.bf16.mxu1 %v6846_v28  ;;  %v1881_v23 = vrot.slane %v5638_v54, 7 }
 0x384   :  { %2078 = vmatpush1.bf16.msra.mxu0 %v6847_v14  ;;  %2119 = vmatpush1.bf16.msra.mxu1 %v6848_v30  ;;  %v5758_v30 = vld [vmem:[#allocation4 + $0x48] sm:$0x22] }
 0x385   :  { %2079 = vmatprep.subr.bf16.mxu0 %v6849_v39  ;;  %2120 = vmatprep.subr.bf16.mxu1 %v6850_v26  ;;  %v1583_v39 = vunpack.c.l.bf16 %v5741_v25  ;;  %v1882_v26 = vrot.slane %v5641_v3, 7 }
 0x388   :  { %2080 = vmatpush1.bf16.msra.mxu0 %v6851_v59  ;;  %2121 = vmatpush1.bf16.msra.mxu1 %v6852_v61 }
 0x389   :  { %2081 = vmatprep.subr.bf16.mxu0 %v6853_v32  ;;  %2122 = vmatprep.subr.bf16.mxu1 %v6854_v16 }
 0x38c   :  { %2082 = vmatpush1.bf16.msra.mxu0 %v6855_v5  ;;  %2123 = vmatpush1.bf16.msra.mxu1 %v6856_v2  ;;  %v5762_v5 = vld [vmem:[#allocation4 + $0x58] sm:$0x22]  ;;  %v1571_v2 = vunpack.c.l.bf16 %v5745_v8 }
 0x38d   :  { %2083 = vmatprep.subr.bf16.mxu0 %v6857_v10  ;;  %2124 = vmatprep.subr.bf16.mxu1 %v6858_v6  ;;  %v1575_v10 = vunpack.c.l.bf16 %v5747_v1 }
 0x390   :  { %2084 = vmatpush1.bf16.msra.mxu0 %v6859_v7  ;;  %2125 = vmatpush1.bf16.msra.mxu1 %v6860_v20  ;;  %v5766_v7 = vld [vmem:[#allocation4 + $0x68] sm:$0x22]  ;;  %v1579_v20 = vunpack.c.l.bf16 %v5754_v63 }
 0x391   :  { %2506 = vmatprep.subr.bf16.mxu0 %v5707_v34  ;;  %2547 = vmatprep.subr.bf16.mxu1 %v5710_v60 }
 0x433   :  { %v1667_v0 = vpop.f32.mrf.mxu0  ;;  %v5736_v56 = vpop.f32.mrf.mxu1 }
 0x434   :  { %v1719_v19 = vrot.slane %v1667_v0, 5  ;;  %v1723_v57 = vrot.slane %v1667_v0, 6  ;;  %v1727_v46 = vrot.slane %v1667_v0, 7  ;;  %v1731_v29 = vrot.slane %v1667_v0, 1 }
 0x435   :  { %v1791_v49 = vadd.f32 %v1667_v0, %v1581_v47  ;;  %v5749_v43 = vpop.f32.mrf.mxu0  ;;  %v5752_v44 = vpop.f32.mrf.mxu1  ;;  %v1735_v58 = vrot.slane %v1667_v0, 2  ;;  %v1739_v28 = vrot.slane %v1667_v0, 3  ;;  %v1743_v32 = vrot.slane %v1667_v0, 4  ;;  %v5770_v0 = vld [vmem:[#allocation4 + $0x78] sm:$0x22] }
 0x436   :  { %v1779_v27 = vadd.f32 %v1719_v19, %v1569_v38  ;;  %v1783_v14 = vadd.f32 %v1723_v57, %v1573_v9  ;;  %v1787_v16 = vadd.f32 %v1727_v46, %v1577_v42  ;;  %v1795_v6 = vadd.f32 %v1731_v29, %v1585_v15 }
 0x437   :  { %v1671_v59 = vpop.f32.mrf.mxu0  ;;  %v1712_v61 = vpop.f32.mrf.mxu1  ;;  %4169 = vtanh.f32 %v1791_v49  ;;  %v1721_v38 = vrot.slane %v5736_v56, 5  ;;  %v1799_v19 = vadd.f32 %v1735_v58, %v1589_v55  ;;  %v1587_v42 = vunpack.c.l.bf16 %v5758_v30 }
 0x438   :  { %4171 = vtanh.f32 %v1779_v27  ;;  %v1725_v57 = vrot.slane %v5736_v56, 6  ;;  %v1803_v46 = vadd.f32 %v1739_v28, %v1593_v12  ;;  %v1591_v15 = vunpack.c.l.bf16 %v5762_v5 }
 0x439   :  { %v1672_v47 = vpop.f32.mrf.mxu0  ;;  %v1713_v9 = vpop.f32.mrf.mxu1  ;;  %4173 = vtanh.f32 %v1783_v14  ;;  %v1729_v29 = vrot.slane %v5736_v56, 7  ;;  %v1807_v49 = vadd.f32 %v1743_v32, %v1597_v18  ;;  %v1595_v59 = vunpack.c.l.bf16 %v5766_v7 }
 0x43a   :  { %4175 = vtanh.f32 %v1787_v16  ;;  %v1582_v61 = vunpack.c.h.bf16 %v5717_v35  ;;  %v1599_v55 = vunpack.c.l.bf16 %v5770_v0  ;;  %v1733_v58 = vrot.slane %v5736_v56, 1 }
 0x43b   :  { %4177 = vtanh.f32 %v1795_v6  ;;  %v1781_v27 = vadd.f32 %v1721_v38, %v1571_v2  ;;  %v1737_v12 = vrot.slane %v5736_v56, 2  ;;  %v1785_v28 = vadd.f32 %v1725_v57, %v1575_v10 }
 0x43c   :  { %4179 = vtanh.f32 %v1799_v19  ;;  %v1570_v14 = vunpack.c.h.bf16 %v5713_v45  ;;  %v1789_v47 = vadd.f32 %v1729_v29, %v1579_v20  ;;  %v1574_v18 = vunpack.c.h.bf16 %v5715_v40 }
 0x43d   :  { %4181 = vtanh.f32 %v1803_v46  ;;  %v1720_v32 = vrot.slane %v5749_v43, 5  ;;  %v1793_v35 = vadd.f32 %v5736_v56, %v1583_v39  ;;  %v1578_v16 = vunpack.c.h.bf16 %v5719_v53 }
 0x43e   :  { %4183 = vtanh.f32 %v1807_v49  ;;  %v1724_v6 = vrot.slane %v5749_v43, 6  ;;  %v1797_v2 = vadd.f32 %v1733_v58, %v1587_v42  ;;  %v1586_v38 = vunpack.c.h.bf16 %v5721_v62 }
 0x43f   :  { %4185 = vtanh.f32 %v1781_v27  ;;  %v1728_v10 = vrot.slane %v5749_v43, 7  ;;  %v1801_v45 = vadd.f32 %v1737_v12, %v1591_v15  ;;  %v1590_v20 = vunpack.c.h.bf16 %v5723_v4 }
 0x440   :  { %4187 = vtanh.f32 %v1785_v28  ;;  %v1594_v40 = vunpack.c.h.bf16 %v5725_v17  ;;  %v1598_v9 = vunpack.c.h.bf16 %v5729_v22  ;;  %v1732_v39 = vrot.slane %v5749_v43, 1 }
 0x441   :  { %4189 = vtanh.f32 %v1789_v47  ;;  %v1780_v53 = vadd.f32 %v1720_v32, %v1570_v14  ;;  %v1736_v19 = vrot.slane %v5749_v43, 2  ;;  %v1784_v42 = vadd.f32 %v1724_v6, %v1574_v18 }
 0x442   :  { %4191 = vtanh.f32 %v1793_v35  ;;  %v1584_v62 = vunpack.c.h.bf16 %v5741_v25  ;;  %v1740_v57 = vrot.slane %v5749_v43, 3  ;;  %v1788_v46 = vadd.f32 %v1728_v10, %v1578_v16 }
 0x443   :  { %4193 = vtanh.f32 %v1797_v2  ;;  %v1572_v4 = vunpack.c.h.bf16 %v5745_v8  ;;  %v1741_v17 = vrot.slane %v5736_v56, 3  ;;  %v1744_v22 = vrot.slane %v5749_v43, 4 }
 0x444   :  { %v4170_v15 = vpop.eup %4169  ;;  %4195 = vtanh.f32 %v1801_v45  ;;  %v1792_v29 = vadd.f32 %v5749_v43, %v1582_v61  ;;  %v1745_v58 = vrot.slane %v5736_v56, 4  ;;  %v1796_v27 = vadd.f32 %v1732_v39, %v1586_v38 }
 0x445   :  { %v4172_v49 = vpop.eup %4171  ;;  %4197 = vtanh.f32 %v1780_v53  ;;  %v1576_v12 = vunpack.c.h.bf16 %v5747_v1  ;;  %v1800_v14 = vadd.f32 %v1736_v19, %v1590_v20  ;;  %v1580_v8 = vunpack.c.h.bf16 %v5754_v63 }
 0x446   :  { %v4174_v28 = vpop.eup %4173  ;;  %4199 = vtanh.f32 %v1784_v42  ;;  %v1588_v47 = vunpack.c.h.bf16 %v5758_v30  ;;  %v1804_v32 = vadd.f32 %v1740_v57, %v1594_v40  ;;  %v1592_v35 = vunpack.c.h.bf16 %v5762_v5 }
 0x447   :  { %v4176_v18 = vpop.eup %4175  ;;  %4201 = vtanh.f32 %v1788_v46  ;;  %v1596_v43 = vunpack.c.h.bf16 %v5766_v7  ;;  %v1805_v56 = vadd.f32 %v1741_v17, %v1595_v59  ;;  %v1808_v16 = vadd.f32 %v1744_v22, %v1598_v9 }
 0x448   :  { %v4178_v61 = vpop.eup %4177  ;;  %4203 = vtanh.f32 %v1792_v29  ;;  %v1600_v1 = vunpack.c.h.bf16 %v5770_v0  ;;  %v1809_v2 = vadd.f32 %v1745_v58, %v1599_v55  ;;  %v1722_v63 = vrot.slane %v5752_v44, 5 }
 0x449   :  { %v4180_v6 = vpop.eup %4179  ;;  %4205 = vtanh.f32 %v1796_v27  ;;  %v1726_v30 = vrot.slane %v5752_v44, 6  ;;  %v1819_v10 = vmul.f32 0.5, %v4172_v49  ;;  %v1730_v5 = vrot.slane %v5752_v44, 7 }
 0x44a   :  { %v4182_v38 = vpop.eup %4181  ;;  %4207 = vtanh.f32 %v1800_v14  ;;  %v1734_v7 = vrot.slane %v5752_v44, 1  ;;  %v1820_v59 = vmul.f32 0.5, %v4174_v28  ;;  %v1738_v20 = vrot.slane %v5752_v44, 2 }
 0x44b   :  { %v4184_v45 = vpop.eup %4183  ;;  %4209 = vtanh.f32 %v1804_v32  ;;  %v1742_v0 = vrot.slane %v5752_v44, 3  ;;  %v1821_v40 = vmul.f32 0.5, %v4176_v18  ;;  %v1822_v9 = vmul.f32 0.5, %v4170_v15 }
 0x44c   :  { %v4186_v55 = vpop.eup %4185  ;;  %4211 = vtanh.f32 %v1808_v16  ;;  %v1746_v39 = vrot.slane %v5752_v44, 4  ;;  %v1823_v19 = vmul.f32 0.5, %v4178_v61  ;;  %v1782_v42 = vadd.f32 %v1722_v63, %v1572_v4 }
 0x44d   :  { %v4188_v53 = vpop.eup %4187  ;;  %4213 = vtanh.f32 %v1805_v56  ;;  %v1786_v57 = vadd.f32 %v1726_v30, %v1576_v12  ;;  %v1824_v17 = vmul.f32 0.5, %v4180_v6  ;;  %v1825_v22 = vmul.f32 0.5, %v4182_v38 }
 0x44e   :  { %v4190_v46 = vpop.eup %4189  ;;  %v1827_v29 = vadd.f32 0.5, %v1819_v10  ;;  %v1790_v49 = vadd.f32 %v1730_v5, %v1580_v8  ;;  %v1826_v27 = vmul.f32 0.5, %v4184_v45  ;;  %v1828_v28 = vadd.f32 0.5, %v1820_v59 }
 0x44f   :  { %v4192_v58 = vpop.eup %4191  ;;  %4215 = vtanh.f32 %v1809_v2  ;;  %v1794_v15 = vadd.f32 %v5752_v44, %v1584_v62  ;;  %v1829_v18 = vadd.f32 0.5, %v1821_v40  ;;  %v1830_v32 = vadd.f32 0.5, %v1822_v9 }
 0x450   :  { %v4194_v14 = vpop.eup %4193  ;;  %v1798_v61 = vadd.f32 %v1734_v7, %v1588_v47  ;;  %v1802_v56 = vadd.f32 %v1738_v20, %v1592_v35  ;;  %v1831_v12 = vadd.f32 0.5, %v1823_v19  ;;  %v1806_v16 = vadd.f32 %v1742_v0, %v1596_v43 }
 0x451   :  { %v4196_v4 = vpop.eup %4195  ;;  %4217 = vtanh.f32 %v1782_v42  ;;  %v1810_v6 = vadd.f32 %v1746_v39, %v1600_v1  ;;  %v1832_v8 = vadd.f32 0.5, %v1824_v17  ;;  %v1833_v30 = vadd.f32 0.5, %v1825_v22 }
 0x452   :  { %v4198_v63 = vpop.eup %4197  ;;  %v1899_v38 = vmul.f32 %v4186_v55, %v1827_v29  ;;  %4219 = vtanh.f32 %v1786_v57  ;;  %v1834_v10 = vadd.f32 0.5, %v1826_v27  ;;  %v1900_v5 = vmul.f32 %v4188_v53, %v1828_v28 }
 0x453   :  { %v4200_v2 = vpop.eup %4199  ;;  %v1843_v25 = vmul.f32 0.5, %v4198_v63  ;;  %4221 = vtanh.f32 %v1790_v49  ;;  %v1901_v45 = vmul.f32 %v4190_v46, %v1829_v18  ;;  %v1902_v47 = vmul.f32 %v4192_v58, %v1830_v32 }
 0x454   :  { %v4202_v44 = vpop.eup %4201  ;;  %v1844_v62 = vmul.f32 0.5, %v4200_v2  ;;  %4223 = vtanh.f32 %v1794_v15  ;;  %v1903_v59 = vmul.f32 %v4194_v14, %v1831_v12  ;;  %v1904_v55 = vmul.f32 %v4196_v4, %v1832_v8 }
 0x455   :  { %v4204_v35 = vpop.eup %4203  ;;  %v1845_v7 = vmul.f32 0.5, %v4202_v44  ;;  %v1851_v43 = vadd.f32 0.5, %v1843_v25  ;;  %4225 = vtanh.f32 %v1798_v61 }
 0x456   :  { %v4206_v1 = vpop.eup %4205  ;;  %v1846_v20 = vmul.f32 0.5, %v4204_v35  ;;  %v1852_v0 = vadd.f32 0.5, %v1844_v62  ;;  %4227 = vtanh.f32 %v1802_v56 }
 0x457   :  { %v4208_v40 = vpop.eup %4207  ;;  %v1847_v9 = vmul.f32 0.5, %v4206_v1  ;;  %v1853_v39 = vadd.f32 0.5, %v1845_v7  ;;  %v1891_v53 = vmul.f32 %v1875_v33, %v1851_v43  ;;  %4229 = vtanh.f32 %v1806_v16 }
 0x458   :  { %v4210_v19 = vpop.eup %4209  ;;  %v1848_v42 = vmul.f32 0.5, %v4208_v40  ;;  %v1854_v57 = vadd.f32 0.5, %v1846_v20  ;;  %v1892_v46 = vmul.f32 %v1876_v52, %v1852_v0  ;;  %4231 = vtanh.f32 %v1810_v6 }
 0x459   :  { %v4212_v17 = vpop.eup %4211  ;;  %v1849_v22 = vmul.f32 0.5, %v4210_v19  ;;  %v1855_v29 = vadd.f32 0.5, %v1847_v9  ;;  %v1893_v49 = vmul.f32 %v1877_v21, %v1853_v39  ;;  %v5823_v58 = vadd.f32 %v1899_v38, %v1891_v53 }
 0x45a   :  { %v4214_v27 = vpop.eup %4213  ;;  %v1850_v28 = vmul.f32 0.5, %v4212_v17  ;;  %v1856_v11 = vadd.f32 0.5, %v1848_v42  ;;  %v1894_v33 = vmul.f32 %v1878_v48, %v1854_v57  ;;  %v5827_v15 = vadd.f32 %v1900_v5, %v1892_v46  ;;  %v1965_v17 = vld [vmem:[#allocation10] sm:$0x2] }
 0x45b   :  { %v1857_v14 = vadd.f32 0.5, %v1849_v22  ;;  %v1895_v51 = vmul.f32 %v1879_v41, %v1855_v29  ;;  %v5831_v52 = vadd.f32 %v1901_v45, %v1893_v49  ;;  %4233 = vtanh.f32 %v5823_v58  ;;  %v5885_v46 = vld [vmem:[#allocation2 + $0xe0] ss:$16 sps:$4 sm:$0xff]  }
 0x45c   :  { %v4216_v13 = vpop.eup %4215  ;;  %v1858_v21 = vadd.f32 0.5, %v1850_v28  ;;  %v1896_v18 = vmul.f32 %v1880_v31, %v1856_v11  ;;  %v5836_v32 = vadd.f32 %v1902_v47, %v1894_v33  ;;  %4235 = vtanh.f32 %v5827_v15  ;;  %v1968_v28 = vld [vmem:[#allocation10 + $0x4] sm:$0x2] }
 0x45d   :  { %v1897_v37 = vmul.f32 %v1881_v23, %v1857_v14  ;;  %v1905_v48 = vmul.f32 %v4214_v27, %v1833_v30  ;;  %v5841_v61 = vadd.f32 %v1903_v59, %v1895_v51  ;;  %4237 = vtanh.f32 %v5831_v52 }
 0x45e   :  { %v4218_v50 = vpop.eup %4217  ;;  %v1898_v41 = vmul.f32 %v1882_v26, %v1858_v21  ;;  %v1906_v56 = vmul.f32 %v4216_v13, %v1834_v10  ;;  %v5846_v4 = vadd.f32 %v1904_v55, %v1896_v18  ;;  %4239 = vtanh.f32 %v5836_v32  ;;  %v1971_v13 = vld [vmem:[#allocation10 + $0x8] sm:$0x2] }
 0x45f   :  { %v4220_v36 = vpop.eup %4219  ;;  %v5849_v31 = vadd.f32 %v1905_v48, %v1897_v37  ;;  %4241 = vtanh.f32 %v5841_v61  ;;  %v1923_v26 = vmul.f32 0.5, %v4218_v50  ;;  %v1974_v50 = vld [vmem:[#allocation10 + $0xc] sm:$0x2] }
 0x460   :  { %v4222_v54 = vpop.eup %4221  ;;  %v5852_v23 = vadd.f32 %v1906_v56, %v1898_v41  ;;  %4243 = vtanh.f32 %v5846_v4  ;;  %v1924_v63 = vmul.f32 0.5, %v4220_v36 }
 0x461   :  { %v4224_v12 = vpop.eup %4223  ;;  %4245 = vtanh.f32 %v5849_v31  ;;  %v1925_v30 = vmul.f32 0.5, %v4222_v54  ;;  %v1931_v2 = vadd.f32 0.5, %v1923_v26 }
 0x462   :  { %v4226_v16 = vpop.eup %4225  ;;  %4247 = vtanh.f32 %v5852_v23  ;;  %v1926_v38 = vmul.f32 0.5, %v4224_v12  ;;  %v1932_v44 = vadd.f32 0.5, %v1924_v63  ;;  %v1980_v63 = vld [vmem:[#allocation10 + $0x14] sm:$0x2] }
 0x463   :  { %v4228_v3 = vpop.eup %4227  ;;  %v1927_v10 = vmul.f32 0.5, %v4226_v16  ;;  %v1933_v35 = vadd.f32 0.5, %v1925_v30 }
 0x464   :  { %v4230_v6 = vpop.eup %4229  ;;  %v1928_v25 = vmul.f32 0.5, %v4228_v3  ;;  %v1934_v59 = vadd.f32 0.5, %v1926_v38  ;;  %v1977_v3 = vld [vmem:[#allocation10 + $0x10] sm:$0x2] }
 0x465   :  { %v4232_v8 = vpop.eup %4231  ;;  %v1929_v62 = vmul.f32 0.5, %v4230_v6  ;;  %v1935_v0 = vadd.f32 0.5, %v1927_v10 }
 0x466   :  { %v1930_v45 = vmul.f32 0.5, %v4232_v8  ;;  %v1936_v55 = vadd.f32 0.5, %v1928_v25 }
 0x467   :  { %v1937_v53 = vadd.f32 0.5, %v1929_v62 }
 0x468   :  { %v4234_v5 = vpop.eup %4233  ;;  %v1938_v19 = vadd.f32 0.5, %v1930_v45 }
 0x469   :  { %v4236_v47 = vpop.eup %4235  ;;  %v1947_v7 = vmul.f32 %v4234_v5, %v1931_v2 }
 0x46a   :  { %v4238_v43 = vpop.eup %4237  ;;  %v1948_v1 = vmul.f32 %v4236_v47, %v1932_v44  ;;  %v1983_v44 = vld [vmem:[#allocation10 + $0x18] sm:$0x2] }
 0x46b   :  { %v4240_v20 = vpop.eup %4239  ;;  %v1949_v40 = vmul.f32 %v4238_v43, %v1933_v35  ;;  %v1955_v9 = vpack.c.bf16 %v1947_v7, %v1947_v7  ;;  %v1986_v35 = vld [vmem:[#allocation10 + $0x1c] sm:$0x2] }
 0x46c   :  { %v4242_v39 = vpop.eup %4241  ;;  %v1950_v42 = vmul.f32 %v4240_v20, %v1934_v59  ;;  %v1956_v57 = vpack.c.bf16 %v1948_v1, %v1948_v1 }
 0x46d   :  { %v4244_v22 = vpop.eup %4243  ;;  %v1951_v29 = vmul.f32 %v4242_v39, %v1935_v0  ;;  %v1957_v49 = vpack.c.bf16 %v1949_v40, %v1949_v40  ;;  %v1966_v27 = vsel %vm5858_vm15, %v1955_v9, %v1965_v17  ;;  %v2045_v11 = vunpack.c.l.b16 %v1955_v9  ;;  %v5888_v17 = vld [vmem:[#allocation2 + $0xe8] ss:$16 sps:$4 sm:$0xff]  }
 0x46e   :  { %v1952_v33 = vmul.f32 %v4244_v22, %v1936_v55  ;;  %v1958_v14 = vpack.c.bf16 %v1950_v42, %v1950_v42  ;;  %1967 = vst [vmem:[#allocation10] sm:$0x2] %v1966_v27  ;;  %v1969_v51 = vsel %vm5858_vm15, %v1956_v57, %v1968_v28  ;;  %v2046_v21 = vunpack.c.l.b16 %v1956_v57  ;;  %v4246_v18 = vpop.eup %4245  ;;  %v5891_v22 = vld [vmem:[#allocation2 + $0xc4] ss:$16 sps:$4 sm:$0xff]   ;;  %v5902_v27 = vld [vmem:[#allocation2 + $0xc8] ss:$16 sps:$4 sm:$0xff]  }
 0x46f   :  { %v1959_v37 = vpack.c.bf16 %v1951_v29, %v1951_v29  ;;  %1970 = vst [vmem:[#allocation10 + $0x4] sm:$0x2] %v1969_v51  ;;  %v1972_v48 = vsel %vm5858_vm15, %v1957_v49, %v1971_v13  ;;  %v2047_v41 = vunpack.c.l.b16 %v1957_v49  ;;  %v2053_v56 = vrot.slane %v2045_v11, 3  ;;  %v4248_v36 = vpop.eup %4247  ;;  %v5894_v29 = vld [vmem:[#allocation2 + $0xcc] ss:$16 sps:$4 sm:$0xff]  }
 0x470   :  { %v1953_v54 = vmul.f32 %v4246_v18, %v1937_v53  ;;  %v1960_v12 = vpack.c.bf16 %v1952_v33, %v1952_v33  ;;  %1973 = vst [vmem:[#allocation10 + $0x8] sm:$0x2] %v1972_v48  ;;  %v1975_v16 = vsel %vm5858_vm15, %v1958_v14, %v1974_v50  ;;  %v1954_v26 = vmul.f32 %v4248_v36, %v1938_v19  ;;  %v5899_v49 = vld [vmem:[#allocation2 + $0xc0] ss:$16 sps:$4 sm:$0xff]   ;;  %v5905_v28 = vld [vmem:[#allocation2 + $0xa4] ss:$16 sps:$4 sm:$0xff]  }
 0x471   :  { %1976 = vst [vmem:[#allocation10 + $0xc] sm:$0x2] %v1975_v16  ;;  %v1978_v6 = vsel %vm5858_vm15, %v1959_v37, %v1977_v3  ;;  %v2049_v8 = vunpack.c.l.b16 %v1959_v37  ;;  %v2054_v30 = vrot.slane %v2046_v21, 2  ;;  %v2056_v25 = vrot.slane %v2047_v41, 1  ;;  %v5908_v11 = vld [vmem:[#allocation2 + $0xac] ss:$16 sps:$4 sm:$0xff]  }
 0x472   :  { %v1961_v38 = vpack.c.bf16 %v1953_v54, %v1953_v54  ;;  %1979 = vst [vmem:[#allocation10 + $0x10] sm:$0x2] %v1978_v6  ;;  %v1981_v2 = vsel %vm5858_vm15, %v1960_v12, %v1980_v63  ;;  %v2050_v10 = vunpack.c.l.b16 %v1960_v12  ;;  %v1962_v5 = vpack.c.bf16 %v1954_v26, %v1954_v26  ;;  %v5911_v33 = vld [vmem:[#allocation2 + $0xa0] ss:$16 sps:$4 sm:$0xff]   ;;  %v5917_v51 = vld [vmem:[#allocation2 + $0x84] ss:$16 sps:$4 sm:$0xff]  }
 0x473   :  { %1982 = vst [vmem:[#allocation10 + $0x14] sm:$0x2] %v1981_v2  ;;  %v2048_v62 = vunpack.c.l.b16 %v1958_v14  ;;  %v2055_v45 = vsel %vm738_vm2, %v2054_v30, %v2053_v56  ;;  %v2059_v59 = vrot.slane %v2049_v8, 7  ;;  %v5914_v14 = vld [vmem:[#allocation2 + $0xa8] ss:$16 sps:$4 sm:$0xff]  }
 0x474   :  { %v1984_v47 = vsel %vm5858_vm15, %v1961_v38, %v1983_v44  ;;  %v2051_v7 = vunpack.c.l.b16 %v1961_v38  ;;  %v2057_v43 = vsel %vm741_vm4, %v2056_v25, %v2055_v45  ;;  %v1987_v1 = vsel %vm5858_vm15, %v1962_v5, %v1986_v35  ;;  %v5920_v13 = vld [vmem:[#allocation2 + $0x8c] ss:$16 sps:$4 sm:$0xff]   ;;  %v5923_v21 = vld [vmem:[#allocation2 + $0x80] ss:$16 sps:$4 sm:$0xff]   ;;  %v5926_v18 = vld [vmem:[#allocation2 + $0x88] ss:$16 sps:$4 sm:$0xff]  }
 0x475   :  { %1985 = vst [vmem:[#allocation10 + $0x18] sm:$0x2] %v1984_v47  ;;  %v2052_v20 = vunpack.c.l.b16 %v1962_v5  ;;  %v2058_v0 = vsel %vm744_vm5, %v2048_v62, %v2057_v43  ;;  %v2061_v55 = vrot.slane %v2050_v10, 6  ;;  %1988 = vst [vmem:[#allocation10 + $0x1c] sm:$0x2] %v1987_v1 }
 0x476   :  { %v2060_v40 = vsel %vm747_vm6, %v2059_v59, %v2058_v0  ;;  %v2063_v9 = vrot.slane %v2051_v7, 5  ;;  %6863 = vst [vmem:[#allocation23_spill] sm:$0xff] %v5920_v13  ;;  %6864 = vst [vmem:[#allocation24_spill] sm:$0xff] %v5923_v21  ;;  %v5929_v37 = vld [vmem:[#allocation2 + $0x64] ss:$16 sps:$4 sm:$0xff]  }
 0x477   :  { %v2062_v39 = vsel %vm750_vm7, %v2061_v55, %v2060_v40  ;;  %v2065_v53 = vrot.slane %v2052_v20, 4  ;;  %6865 = vst [vmem:[#allocation25_spill] sm:$0xff] %v5926_v18  ;;  %6866 = vst [vmem:[#allocation26_spill] sm:$0xff] %v5929_v37  ;;  %v5932_v48 = vld [vmem:[#allocation2 + $0x6c] ss:$16 sps:$4 sm:$0xff]  }
 0x478   :  { %v2064_v19 = vsel %vm753_vm8, %v2063_v9, %v2062_v39  ;;  %6867 = vst [vmem:[#allocation27_spill] sm:$0xff] %v5932_v48  ;;  %v5935_v50 = vld [vmem:[#allocation2 + $0x60] ss:$16 sps:$4 sm:$0xff]   ;;  %v5938_v41 = vld [vmem:[#allocation2 + $0x68] ss:$16 sps:$4 sm:$0xff]  }
 0x479   :  { %v2066_v42 = vsel %vm756_vm9, %v2065_v53, %v2064_v19  ;;  %6868 = vst [vmem:[#allocation28_spill] sm:$0xff] %v5935_v50  ;;  %6869 = vst [vmem:[#allocation29_spill] sm:$0xff] %v5938_v41  ;;  %v5941_v56 = vld [vmem:[#allocation2 + $0x44] ss:$16 sps:$4 sm:$0xff]   ;;  %v5944_v36 = vld [vmem:[#allocation2 + $0x4c] ss:$16 sps:$4 sm:$0xff]  }
 0x47a   :  { %v2067_v57 = vpack.c.b16 %v2066_v42, %v2066_v42  ;;  %6870 = vst [vmem:[#allocation30_spill] sm:$0xff] %v5941_v56  ;;  %6871 = vst [vmem:[#allocation31_spill] sm:$0xff] %v5944_v36  ;;  %v5947_v54 = vld [vmem:[#allocation2 + $0x40] ss:$16 sps:$4 sm:$0xff]   ;;  %v5950_v12 = vld [vmem:[#allocation2 + $0x48] ss:$16 sps:$4 sm:$0xff]  }
 0x47b   :  { %6872 = vst [vmem:[#allocation32_spill] sm:$0xff] %v5947_v54  ;;  %6873 = vst [vmem:[#allocation33_spill] sm:$0xff] %v5950_v12  ;;  %v5953_v16 = vld [vmem:[#allocation2 + $0x24] ss:$16 sps:$4 sm:$0xff]   ;;  %v5956_v3 = vld [vmem:[#allocation2 + $0x2c] ss:$16 sps:$4 sm:$0xff]  }
 0x47c   :  { %2102 = vmatmul.mubr.bf16.vlgmr.msra.gmra.mxu0 %v2067_v57  ;;  %2143 = vmatmul.mubr.bf16.vlgmr.msra.gmra.mxu1 %v2067_v57  ;;  %6874 = vst [vmem:[#allocation34_spill] sm:$0xff] %v5953_v16  ;;  %6875 = vst [vmem:[#allocation35_spill] sm:$0xff] %v5956_v3  ;;  %v5959_v26 = vld [vmem:[#allocation2 + $0x20] ss:$16 sps:$4 sm:$0xff]   ;;  %v5962_v6 = vld [vmem:[#allocation2 + $0x28] ss:$16 sps:$4 sm:$0xff]  }
 0x47d   :  { %2507 = vmatpush1.bf16.msra.mxu0 %v5885_v46  ;;  %2548 = vmatpush1.bf16.msra.mxu1 %v5888_v17  ;;  %6876 = vst [vmem:[#allocation36_spill] sm:$0xff] %v5959_v26  ;;  %6877 = vst [vmem:[#allocation37_spill] sm:$0xff] %v5962_v6  ;;  %v5965_v63 = vld [vmem:[#allocation2 + $0x4] ss:$16 sps:$4 sm:$0xff]   ;;  %v5968_v8 = vld [vmem:[#allocation2 + $0xc] ss:$16 sps:$4 sm:$0xff]  }
 0x47e   :  { %2508 = vmatprep.subr.bf16.mxu0 %v5891_v22  ;;  %2549 = vmatprep.subr.bf16.mxu1 %v5894_v29  ;;  %6878 = vst [vmem:[#allocation38_spill] sm:$0xff] %v5965_v63  ;;  %6879 = vst [vmem:[#allocation39_spill] sm:$0xff] %v5968_v8  ;;  %v5971_v30 = vld [vmem:[#allocation2] ss:$16 sps:$4 sm:$0xff]   ;;  %v5974_v38 = vld [vmem:[#allocation2 + $0x8] ss:$16 sps:$4 sm:$0xff]  }
 0x47f   :  { %2538 = vmatprep.mubr.bf16.mxu0 %v6791_v24  ;;  %2579 = vmatprep.mubr.bf16.mxu1 %v6791_v24  ;;  %6880 = vst [vmem:[#allocation40_spill] sm:$0xff] %v5971_v30  ;;  %6881 = vst [vmem:[#allocation41_spill] sm:$0xff] %v5974_v38  ;;  %v5979_v2 = vld [vmem:[#allocation4] sm:$0x44]  ;;  %v5981_v10 = vld [vmem:[#allocation4 + $0x10] sm:$0x44] }
 0x480   :  { %v5983_v25 = vld [vmem:[#allocation4 + $0x40] sm:$0x44]  ;;  %v5987_v44 = vld [vmem:[#allocation4 + $0x30] sm:$0x44]  ;;  %v2005_v47 = vunpack.c.l.bf16 %v5979_v2  ;;  %v6007_v42 = vld [vmem:[#allocation4 + $0x48] sm:$0x44] }
 0x481   :  { %2509 = vmatpush1.bf16.msra.mxu0 %v5899_v49  ;;  %2550 = vmatpush1.bf16.msra.mxu1 %v5902_v27  ;;  %v5985_v5 = vld [vmem:[#allocation4 + $0x20] sm:$0x44]  ;;  %v5989_v62 = vld [vmem:[#allocation4 + $0x50] sm:$0x44]  ;;  %v2017_v43 = vunpack.c.l.bf16 %v5987_v44 }
 0x482   :  { %2510 = vmatprep.subr.bf16.mxu0 %v5905_v28  ;;  %2551 = vmatprep.subr.bf16.mxu1 %v5908_v11  ;;  %v5991_v45 = vld [vmem:[#allocation4 + $0x60] sm:$0x44]  ;;  %v5995_v35 = vld [vmem:[#allocation4 + $0x70] sm:$0x44]  ;;  %v2013_v7 = vunpack.c.l.bf16 %v5985_v5  ;;  %v2025_v59 = vunpack.c.l.bf16 %v5989_v62 }
 0x483   :  { %v2029_v1 = vunpack.c.l.bf16 %v5991_v45 }
 0x485   :  { %2511 = vmatpush1.bf16.msra.mxu0 %v5911_v33  ;;  %2552 = vmatpush1.bf16.msra.mxu1 %v5914_v14 }
 0x486   :  { %2512 = vmatprep.subr.bf16.mxu0 %v5917_v51  ;;  %2553 = vmatprep.subr.bf16.mxu1 %v5920_v13 }
 0x489   :  { %2513 = vmatpush1.bf16.msra.mxu0 %v5923_v21  ;;  %2554 = vmatpush1.bf16.msra.mxu1 %v5926_v18  ;;  %v6028_v18 = vld [vmem:[#allocation4 + $0x58] sm:$0x44] }
 0x48a   :  { %2514 = vmatprep.subr.bf16.mxu0 %v5929_v37  ;;  %2555 = vmatprep.subr.bf16.mxu1 %v5932_v48 }
 0x48d   :  { %2515 = vmatpush1.bf16.msra.mxu0 %v5935_v50  ;;  %2556 = vmatpush1.bf16.msra.mxu1 %v5938_v41 }
 0x48e   :  { %2516 = vmatprep.subr.bf16.mxu0 %v5941_v56  ;;  %2557 = vmatprep.subr.bf16.mxu1 %v5944_v36  ;;  %v6024_v36 = vld [vmem:[#allocation4 + $0x38] sm:$0x44]  ;;  %v2023_v56 = vunpack.c.l.bf16 %v6007_v42 }
 0x491   :  { %2517 = vmatpush1.bf16.msra.mxu0 %v5947_v54  ;;  %2558 = vmatpush1.bf16.msra.mxu1 %v5950_v12  ;;  %v6032_v12 = vld [vmem:[#allocation4 + $0x68] sm:$0x44] }
 0x492   :  { %2518 = vmatprep.subr.bf16.mxu0 %v5953_v16  ;;  %2559 = vmatprep.subr.bf16.mxu1 %v5956_v3  ;;  %v6020_v16 = vld [vmem:[#allocation4 + $0x28] sm:$0x44]  ;;  %v2031_v13 = vunpack.c.l.bf16 %v6032_v12 }
 0x495   :  { %2519 = vmatpush1.bf16.msra.mxu0 %v5959_v26  ;;  %2560 = vmatpush1.bf16.msra.mxu1 %v5962_v6  ;;  %v6013_v6 = vld [vmem:[#allocation4 + $0x18] sm:$0x44] }
 0x496   :  { %2520 = vmatprep.subr.bf16.mxu0 %v5965_v63  ;;  %2561 = vmatprep.subr.bf16.mxu1 %v5968_v8  ;;  %v6011_v63 = vld [vmem:[#allocation4 + $0x8] sm:$0x44] }
 0x499   :  { %2521 = vmatpush1.bf16.msra.mxu0 %v5971_v30  ;;  %2562 = vmatpush1.bf16.msra.mxu1 %v5974_v38  ;;  %v2033_v38 = vunpack.c.l.bf16 %v5995_v35 }
 0x49a   :  { %2942 = vmatprep.subr.bf16.mxu0 %v5707_v34  ;;  %2983 = vmatprep.subr.bf16.mxu1 %v5710_v60  ;;  %v2021_v34 = vunpack.c.l.bf16 %v5983_v25  ;;  %v2009_v60 = vunpack.c.l.bf16 %v5981_v10 }
 0x53c   :  { %v2103_v20 = vpop.f32.mrf.mxu0  ;;  %v6002_v0 = vpop.f32.mrf.mxu1 }
 0x53d   :  { %v2155_v39 = vrot.slane %v2103_v20, 4  ;;  %v2159_v53 = vrot.slane %v2103_v20, 5  ;;  %v2163_v19 = vrot.slane %v2103_v20, 6  ;;  %v2167_v30 = vrot.slane %v2103_v20, 7 }
 0x53e   :  { %v2231_v8 = vadd.f32 %v2103_v20, %v2021_v34  ;;  %v6015_v55 = vpop.f32.mrf.mxu0  ;;  %v6018_v9 = vpop.f32.mrf.mxu1  ;;  %v2171_v26 = vrot.slane %v2103_v20, 1  ;;  %v2175_v54 = vrot.slane %v2103_v20, 2  ;;  %v2179_v48 = vrot.slane %v2103_v20, 3  ;;  %v6036_v20 = vld [vmem:[#allocation4 + $0x78] sm:$0x44] }
 0x53f   :  { %v2215_v3 = vadd.f32 %v2155_v39, %v2005_v47  ;;  %v2219_v34 = vadd.f32 %v2159_v53, %v2009_v60  ;;  %v2223_v37 = vadd.f32 %v2163_v19, %v2013_v7  ;;  %v2007_v47 = vunpack.c.l.bf16 %v6011_v63 }
 0x540   :  { %v2107_v50 = vpop.f32.mrf.mxu0  ;;  %v2148_v40 = vpop.f32.mrf.mxu1  ;;  %v2011_v39 = vunpack.c.l.bf16 %v6013_v6  ;;  %v2227_v57 = vadd.f32 %v2167_v30, %v2017_v43  ;;  %4249 = vtanh.f32 %v2231_v8  ;;  %v2015_v60 = vunpack.c.l.bf16 %v6020_v16 }
 0x541   :  { %v2157_v53 = vrot.slane %v6002_v0, 4  ;;  %v2235_v50 = vadd.f32 %v2171_v26, %v2025_v59  ;;  %4251 = vtanh.f32 %v2215_v3  ;;  %v2019_v7 = vunpack.c.l.bf16 %v6024_v36 }
 0x542   :  { %v2108_v21 = vpop.f32.mrf.mxu0  ;;  %v2149_v41 = vpop.f32.mrf.mxu1  ;;  %v2161_v40 = vrot.slane %v6002_v0, 5  ;;  %v2239_v19 = vadd.f32 %v2175_v54, %v2029_v1  ;;  %4253 = vtanh.f32 %v2219_v34  ;;  %v2027_v8 = vunpack.c.l.bf16 %v6028_v18 }
 0x543   :  { %v2165_v30 = vrot.slane %v6002_v0, 6  ;;  %v2243_v43 = vadd.f32 %v2179_v48, %v2033_v38  ;;  %4255 = vtanh.f32 %v2223_v37  ;;  %v2169_v21 = vrot.slane %v6002_v0, 7 }
 0x544   :  { %4257 = vtanh.f32 %v2227_v57  ;;  %v2035_v41 = vunpack.c.l.bf16 %v6036_v20  ;;  %v2217_v3 = vadd.f32 %v2157_v53, %v2007_v47  ;;  %v2022_v26 = vunpack.c.h.bf16 %v5983_v25 }
 0x545   :  { %4259 = vtanh.f32 %v2235_v50  ;;  %v2173_v54 = vrot.slane %v6002_v0, 1  ;;  %v2221_v59 = vadd.f32 %v2161_v40, %v2011_v39  ;;  %v2006_v1 = vunpack.c.h.bf16 %v5979_v2 }
 0x546   :  { %4261 = vtanh.f32 %v2239_v19  ;;  %v2225_v34 = vadd.f32 %v2165_v30, %v2015_v60  ;;  %v2010_v37 = vunpack.c.h.bf16 %v5981_v10  ;;  %v2156_v48 = vrot.slane %v6015_v55, 4 }
 0x547   :  { %4263 = vtanh.f32 %v2243_v43  ;;  %v2229_v38 = vadd.f32 %v2169_v21, %v2019_v7  ;;  %v2014_v57 = vunpack.c.h.bf16 %v5985_v5  ;;  %v2160_v47 = vrot.slane %v6015_v55, 5 }
 0x548   :  { %v2233_v25 = vadd.f32 %v6002_v0, %v2023_v56  ;;  %4265 = vtanh.f32 %v2217_v3  ;;  %v2018_v53 = vunpack.c.h.bf16 %v5987_v44  ;;  %v2164_v39 = vrot.slane %v6015_v55, 6 }
 0x549   :  { %v2237_v2 = vadd.f32 %v2173_v54, %v2027_v8  ;;  %4267 = vtanh.f32 %v2221_v59  ;;  %v2026_v60 = vunpack.c.h.bf16 %v5989_v62  ;;  %v2168_v10 = vrot.slane %v6015_v55, 7 }
 0x54a   :  { %4269 = vtanh.f32 %v2225_v34  ;;  %v2030_v50 = vunpack.c.h.bf16 %v5991_v45  ;;  %v2034_v5 = vunpack.c.h.bf16 %v5995_v35  ;;  %v2216_v7 = vadd.f32 %v2156_v48, %v2006_v1 }
 0x54b   :  { %4271 = vtanh.f32 %v2229_v38  ;;  %v2172_v56 = vrot.slane %v6015_v55, 1  ;;  %v2220_v40 = vadd.f32 %v2160_v47, %v2010_v37  ;;  %v2024_v44 = vunpack.c.h.bf16 %v6007_v42 }
 0x54c   :  { %4273 = vtanh.f32 %v2233_v25  ;;  %v2176_v19 = vrot.slane %v6015_v55, 2  ;;  %v2224_v8 = vadd.f32 %v2164_v39, %v2014_v57  ;;  %v2008_v62 = vunpack.c.h.bf16 %v6011_v63 }
 0x54d   :  { %v4250_v30 = vpop.eup %4249  ;;  %v2177_v43 = vrot.slane %v6002_v0, 2  ;;  %4275 = vtanh.f32 %v2237_v2  ;;  %v2180_v45 = vrot.slane %v6015_v55, 3  ;;  %v2228_v35 = vadd.f32 %v2168_v10, %v2018_v53 }
 0x54e   :  { %v4252_v21 = vpop.eup %4251  ;;  %v2181_v3 = vrot.slane %v6002_v0, 3  ;;  %v2232_v54 = vadd.f32 %v6015_v55, %v2022_v26  ;;  %4277 = vtanh.f32 %v2216_v7  ;;  %v2012_v59 = vunpack.c.h.bf16 %v6013_v6 }
 0x54f   :  { %v4254_v1 = vpop.eup %4253  ;;  %v2236_v34 = vadd.f32 %v2172_v56, %v2026_v60  ;;  %4279 = vtanh.f32 %v2220_v40  ;;  %v2016_v63 = vunpack.c.h.bf16 %v6020_v16  ;;  %v2020_v37 = vunpack.c.h.bf16 %v6024_v36 }
 0x550   :  { %v4256_v48 = vpop.eup %4255  ;;  %v2240_v38 = vadd.f32 %v2176_v19, %v2030_v50  ;;  %4281 = vtanh.f32 %v2224_v8  ;;  %v2028_v57 = vunpack.c.h.bf16 %v6028_v18  ;;  %v2032_v47 = vunpack.c.h.bf16 %v6032_v12 }
 0x551   :  { %v4258_v0 = vpop.eup %4257  ;;  %v2241_v25 = vadd.f32 %v2177_v43, %v2031_v13  ;;  %v2244_v55 = vadd.f32 %v2180_v45, %v2034_v5  ;;  %4283 = vtanh.f32 %v2228_v35  ;;  %v2036_v6 = vunpack.c.h.bf16 %v6036_v20 }
 0x552   :  { %v4260_v26 = vpop.eup %4259  ;;  %v2245_v53 = vadd.f32 %v2181_v3, %v2035_v41  ;;  %4285 = vtanh.f32 %v2232_v54  ;;  %v2158_v16 = vrot.slane %v6018_v9, 4  ;;  %v2162_v36 = vrot.slane %v6018_v9, 5 }
 0x553   :  { %v4262_v39 = vpop.eup %4261  ;;  %v2255_v2 = vmul.f32 0.5, %v4252_v21  ;;  %4287 = vtanh.f32 %v2236_v34  ;;  %v2166_v18 = vrot.slane %v6018_v9, 6  ;;  %v2170_v12 = vrot.slane %v6018_v9, 7 }
 0x554   :  { %v4264_v60 = vpop.eup %4263  ;;  %v2256_v13 = vmul.f32 0.5, %v4254_v1  ;;  %4289 = vtanh.f32 %v2240_v38  ;;  %v2174_v10 = vrot.slane %v6018_v9, 1  ;;  %v2178_v20 = vrot.slane %v6018_v9, 2 }
 0x555   :  { %v4266_v41 = vpop.eup %4265  ;;  %v2257_v50 = vmul.f32 0.5, %v4256_v48  ;;  %v2258_v5 = vmul.f32 0.5, %v4258_v0  ;;  %4291 = vtanh.f32 %v2244_v55  ;;  %v2182_v7 = vrot.slane %v6018_v9, 3 }
 0x556   :  { %v4268_v56 = vpop.eup %4267  ;;  %v2259_v40 = vmul.f32 0.5, %v4250_v30  ;;  %4293 = vtanh.f32 %v2241_v25  ;;  %v2218_v19 = vadd.f32 %v2158_v16, %v2008_v62  ;;  %v2222_v8 = vadd.f32 %v2162_v36, %v2012_v59 }
 0x557   :  { %v4270_v43 = vpop.eup %4269  ;;  %v2260_v45 = vmul.f32 0.5, %v4260_v26  ;;  %v2261_v35 = vmul.f32 0.5, %v4262_v39  ;;  %v2263_v21 = vadd.f32 0.5, %v2255_v2  ;;  %v2226_v3 = vadd.f32 %v2166_v18, %v2016_v63 }
 0x558   :  { %v4272_v54 = vpop.eup %4271  ;;  %v2262_v1 = vmul.f32 0.5, %v4264_v60  ;;  %v2264_v34 = vadd.f32 0.5, %v2256_v13  ;;  %4295 = vtanh.f32 %v2245_v53  ;;  %v2230_v38 = vadd.f32 %v2170_v12, %v2020_v37 }
 0x559   :  { %v4274_v48 = vpop.eup %4273  ;;  %v2265_v0 = vadd.f32 0.5, %v2257_v50  ;;  %v2266_v55 = vadd.f32 0.5, %v2258_v5  ;;  %v2234_v30 = vadd.f32 %v6018_v9, %v2024_v44  ;;  %v2238_v25 = vadd.f32 %v2174_v10, %v2028_v57 }
 0x55a   :  { %v4276_v62 = vpop.eup %4275  ;;  %v2267_v59 = vadd.f32 0.5, %v2259_v40  ;;  %v2242_v16 = vadd.f32 %v2178_v20, %v2032_v47  ;;  %4297 = vtanh.f32 %v2218_v19  ;;  %v2246_v26 = vadd.f32 %v2182_v7, %v2036_v6 }
 0x55b   :  { %v4278_v36 = vpop.eup %4277  ;;  %v2268_v63 = vadd.f32 0.5, %v2260_v45  ;;  %v2269_v39 = vadd.f32 0.5, %v2261_v35  ;;  %v2335_v2 = vmul.f32 %v4266_v41, %v2263_v21  ;;  %4299 = vtanh.f32 %v2222_v8 }
 0x55c   :  { %v4280_v53 = vpop.eup %4279  ;;  %v2270_v37 = vadd.f32 0.5, %v2262_v1  ;;  %v2279_v18 = vmul.f32 0.5, %v4278_v36  ;;  %v2336_v12 = vmul.f32 %v4268_v56, %v2264_v34  ;;  %4301 = vtanh.f32 %v2226_v3 }
 0x55d   :  { %v4282_v60 = vpop.eup %4281  ;;  %v2280_v42 = vmul.f32 0.5, %v4280_v53  ;;  %v2337_v13 = vmul.f32 %v4270_v43, %v2265_v0  ;;  %v2338_v9 = vmul.f32 %v4272_v54, %v2266_v55  ;;  %4303 = vtanh.f32 %v2230_v38 }
 0x55e   :  { %v4284_v44 = vpop.eup %4283  ;;  %v2281_v57 = vmul.f32 0.5, %v4282_v60  ;;  %v2287_v47 = vadd.f32 0.5, %v2279_v18  ;;  %v2339_v10 = vmul.f32 %v4274_v48, %v2267_v59  ;;  %4305 = vtanh.f32 %v2234_v30 }
 0x55f   :  { %v4286_v6 = vpop.eup %4285  ;;  %v2282_v20 = vmul.f32 0.5, %v4284_v44  ;;  %v2288_v50 = vadd.f32 0.5, %v2280_v42  ;;  %v2340_v41 = vmul.f32 %v4276_v62, %v2268_v63  ;;  %4307 = vtanh.f32 %v2238_v25 }
 0x560   :  { %v4288_v5 = vpop.eup %4287  ;;  %v2283_v7 = vmul.f32 0.5, %v4286_v6  ;;  %v2289_v40 = vadd.f32 0.5, %v2281_v57  ;;  %v6882_v56 = vrot.slane %v5823_v58, 7  ;;  %4309 = vtanh.f32 %v2242_v16 }
 0x561   :  { %v4290_v8 = vpop.eup %4289  ;;  %v2284_v43 = vmul.f32 0.5, %v4288_v5  ;;  %v2290_v45 = vadd.f32 0.5, %v2282_v20  ;;  %v6883_v35 = vrot.slane %v5827_v15, 7  ;;  %4311 = vtanh.f32 %v2246_v26 }
 0x562   :  { %v2327_v19 = vmul.f32 %v6882_v56, %v2287_v47  ;;  %v4292_v3 = vpop.eup %4291  ;;  %v2285_v54 = vmul.f32 0.5, %v4290_v8  ;;  %v2291_v1 = vadd.f32 0.5, %v2283_v7  ;;  %v6884_v34 = vrot.slane %v5831_v52, 7 }
 0x563   :  { %v2328_v21 = vmul.f32 %v6883_v35, %v2288_v50  ;;  %v4294_v0 = vpop.eup %4293  ;;  %v2286_v55 = vmul.f32 0.5, %v4292_v3  ;;  %v2292_v58 = vadd.f32 0.5, %v2284_v43  ;;  %v6885_v30 = vrot.slane %v5836_v32, 7 }
 0x564   :  { %v2329_v38 = vmul.f32 %v6884_v34, %v2289_v40  ;;  %v6089_v48 = vadd.f32 %v2335_v2, %v2327_v19  ;;  %v2293_v59 = vadd.f32 0.5, %v2285_v54  ;;  %v6886_v15 = vrot.slane %v5841_v61, 7 }
 0x565   :  { %v2330_v25 = vmul.f32 %v6885_v30, %v2290_v45  ;;  %v6093_v62 = vadd.f32 %v2336_v12, %v2328_v21  ;;  %v4296_v52 = vpop.eup %4295  ;;  %v2294_v36 = vadd.f32 0.5, %v2286_v55  ;;  %v6887_v63 = vrot.slane %v5846_v4, 7 }
 0x566   :  { %v2331_v16 = vmul.f32 %v6886_v15, %v2291_v1  ;;  %v6097_v26 = vadd.f32 %v2337_v13, %v2329_v38  ;;  %4313 = vtanh.f32 %v6089_v48  ;;  %v6888_v32 = vrot.slane %v5849_v31, 7  ;;  %v2402_v38 = vld [vmem:[#allocation10] sm:$0x4] }
 0x567   :  { %v2332_v2 = vmul.f32 %v6887_v63, %v2292_v58  ;;  %v6102_v53 = vadd.f32 %v2338_v9, %v2330_v25  ;;  %4315 = vtanh.f32 %v6093_v62  ;;  %v2341_v12 = vmul.f32 %v4294_v0, %v2269_v39  ;;  %v4298_v61 = vpop.eup %4297 }
 0x568   :  { %v2333_v18 = vmul.f32 %v6888_v32, %v2293_v59  ;;  %v6107_v60 = vadd.f32 %v2339_v10, %v2331_v16  ;;  %4317 = vtanh.f32 %v6097_v26  ;;  %v6889_v42 = vrot.slane %v5852_v23, 7  ;;  %v4300_v4 = vpop.eup %4299  ;;  %v2405_v59 = vld [vmem:[#allocation10 + $0x4] sm:$0x4]  ;;  %v2408_v32 = vld [vmem:[#allocation10 + $0x8] sm:$0x4] }
 0x569   :  { %v2342_v44 = vmul.f32 %v4296_v52, %v2270_v37  ;;  %v6112_v57 = vadd.f32 %v2340_v41, %v2332_v2  ;;  %4319 = vtanh.f32 %v6102_v53  ;;  %v4302_v31 = vpop.eup %4301  ;;  %v2359_v37 = vmul.f32 0.5, %v4298_v61  ;;  %v6903_v2 = vld [vmem:[#allocation34_spill] sm:$0xff] }
 0x56a   :  { %v2334_v13 = vmul.f32 %v6889_v42, %v2294_v36  ;;  %v6115_v9 = vadd.f32 %v2341_v12, %v2333_v18  ;;  %4321 = vtanh.f32 %v6107_v60  ;;  %v4304_v47 = vpop.eup %4303  ;;  %v2360_v20 = vmul.f32 0.5, %v4300_v4 }
 0x56b   :  { %4323 = vtanh.f32 %v6112_v57  ;;  %v4306_v10 = vpop.eup %4305  ;;  %v2361_v41 = vmul.f32 0.5, %v4302_v31  ;;  %v2362_v5 = vmul.f32 0.5, %v4304_v47  ;;  %v2367_v40 = vadd.f32 0.5, %v2359_v37 }
 0x56c   :  { %v6118_v39 = vadd.f32 %v2342_v44, %v2334_v13  ;;  %4325 = vtanh.f32 %v6115_v9  ;;  %v4308_v23 = vpop.eup %4307  ;;  %v2363_v7 = vmul.f32 0.5, %v4306_v10  ;;  %v2368_v8 = vadd.f32 0.5, %v2360_v20  ;;  %v2411_v13 = vld [vmem:[#allocation10 + $0xc] sm:$0x4]  ;;  %v2414_v10 = vld [vmem:[#allocation10 + $0x10] sm:$0x4] }
 0x56d   :  { %v4310_v6 = vpop.eup %4309  ;;  %v2364_v56 = vmul.f32 0.5, %v4308_v23  ;;  %v2369_v21 = vadd.f32 0.5, %v2361_v41  ;;  %v2370_v34 = vadd.f32 0.5, %v2362_v5 }
 0x56e   :  { %4327 = vtanh.f32 %v6118_v39  ;;  %v4312_v50 = vpop.eup %4311  ;;  %v2365_v43 = vmul.f32 0.5, %v4310_v6  ;;  %v2371_v55 = vadd.f32 0.5, %v2363_v7 }
 0x56f   :  { %v2366_v45 = vmul.f32 0.5, %v4312_v50  ;;  %v2372_v58 = vadd.f32 0.5, %v2364_v56  ;;  %v2417_v50 = vld [vmem:[#allocation10 + $0x14] sm:$0x4] }
 0x570   :  { %v2373_v16 = vadd.f32 0.5, %v2365_v43 }
 0x571   :  { %v2374_v52 = vadd.f32 0.5, %v2366_v45 }
 0x573   :  { %v4314_v19 = vpop.eup %4313 }
 0x574   :  { %v4316_v35 = vpop.eup %4315  ;;  %v2383_v3 = vmul.f32 %v4314_v19, %v2367_v40 }
 0x575   :  { %v4318_v54 = vpop.eup %4317  ;;  %v2384_v1 = vmul.f32 %v4316_v35, %v2368_v8  ;;  %v2420_v35 = vld [vmem:[#allocation10 + $0x18] sm:$0x4] }
 0x576   :  { %v4320_v0 = vpop.eup %4319  ;;  %v2385_v30 = vmul.f32 %v4318_v54, %v2369_v21  ;;  %v2391_v25 = vpack.c.bf16 %v2383_v3, %v2383_v3 }
 0x577   :  { %v4322_v15 = vpop.eup %4321  ;;  %v2386_v36 = vmul.f32 %v4320_v0, %v2370_v34  ;;  %v2392_v63 = vpack.c.bf16 %v2384_v1, %v2384_v1  ;;  %v2423_v1 = vld [vmem:[#allocation10 + $0x1c] sm:$0x4] }
 0x578   :  { %v4324_v18 = vpop.eup %4323  ;;  %v2387_v12 = vmul.f32 %v4322_v15, %v2371_v55  ;;  %v2393_v61 = vpack.c.bf16 %v2385_v30, %v2385_v30  ;;  %v2403_v42 = vsel %vm6125_vm1, %v2391_v25, %v2402_v38  ;;  %v2482_v44 = vunpack.c.l.b16 %v2391_v25 }
 0x579   :  { %v2388_v4 = vmul.f32 %v4324_v18, %v2372_v58  ;;  %v2394_v31 = vpack.c.bf16 %v2386_v36, %v2386_v36  ;;  %2404 = vst [vmem:[#allocation10] sm:$0x4] %v2403_v42  ;;  %v2406_v47 = vsel %vm6125_vm1, %v2392_v63, %v2405_v59  ;;  %v2483_v23 = vunpack.c.l.b16 %v2392_v63  ;;  %v4326_v37 = vpop.eup %4325 }
 0x57a   :  { %v2395_v6 = vpack.c.bf16 %v2387_v12, %v2387_v12  ;;  %2407 = vst [vmem:[#allocation10 + $0x4] sm:$0x4] %v2406_v47  ;;  %v2409_v20 = vsel %vm6125_vm1, %v2393_v61, %v2408_v32  ;;  %v2484_v41 = vunpack.c.l.b16 %v2393_v61  ;;  %v2490_v5 = vrot.slane %v2482_v44, 4  ;;  %v6906_v47 = vld [vmem:[#allocation37_spill] sm:$0xff] }
 0x57b   :  { %v4328_v7 = vpop.eup %4327  ;;  %v2389_v40 = vmul.f32 %v4326_v37, %v2373_v16  ;;  %v2396_v56 = vpack.c.bf16 %v2388_v4, %v2388_v4  ;;  %2410 = vst [vmem:[#allocation10 + $0x8] sm:$0x4] %v2409_v20  ;;  %v2412_v19 = vsel %vm6125_vm1, %v2394_v31, %v2411_v13  ;;  %v2485_v8 = vunpack.c.l.b16 %v2394_v31  ;;  %v6904_v4 = vld [vmem:[#allocation35_spill] sm:$0xff]  ;;  %v6905_v31 = vld [vmem:[#allocation36_spill] sm:$0xff] }
 0x57c   :  { %v2390_v43 = vmul.f32 %v4328_v7, %v2374_v52  ;;  %2413 = vst [vmem:[#allocation10 + $0xc] sm:$0x4] %v2412_v19  ;;  %v2415_v45 = vsel %vm6125_vm1, %v2395_v6, %v2414_v10  ;;  %v2491_v21 = vrot.slane %v2483_v23, 3  ;;  %v2493_v38 = vrot.slane %v2484_v41, 2  ;;  %v6907_v10 = vld [vmem:[#allocation38_spill] sm:$0xff]  ;;  %v6908_v23 = vld [vmem:[#allocation39_spill] sm:$0xff] }
 0x57d   :  { %v2397_v3 = vpack.c.bf16 %v2389_v40, %v2389_v40  ;;  %2416 = vst [vmem:[#allocation10 + $0x10] sm:$0x4] %v2415_v45  ;;  %v2418_v54 = vsel %vm6125_vm1, %v2396_v56, %v2417_v50  ;;  %v2487_v34 = vunpack.c.l.b16 %v2396_v56  ;;  %v2495_v58 = vrot.slane %v2485_v8, 1  ;;  %v6909_v37 = vld [vmem:[#allocation40_spill] sm:$0xff]  ;;  %v4633_v20 = vld [vmem:[#allocation2 + $0xe4] ss:$16 sps:$4 sm:$0xff]  }
 0x57e   :  { %v2398_v0 = vpack.c.bf16 %v2390_v43, %v2390_v43  ;;  %2419 = vst [vmem:[#allocation10 + $0x14] sm:$0x4] %v2418_v54  ;;  %v2492_v55 = vsel %vm738_vm2, %v2491_v21, %v2490_v5  ;;  %v2486_v25 = vunpack.c.l.b16 %v2395_v6  ;;  %v6910_v6 = vld [vmem:[#allocation41_spill] sm:$0xff]  ;;  %v4634_v50 = vld [vmem:[#allocation2 + $0xec] ss:$16 sps:$4 sm:$0xff]  }
 0x57f   :  { %v2421_v30 = vsel %vm6125_vm1, %v2397_v3, %v2420_v35  ;;  %v2488_v59 = vunpack.c.l.b16 %v2397_v3  ;;  %v2494_v15 = vsel %vm741_vm4, %v2493_v38, %v2492_v55  ;;  %v2498_v63 = vrot.slane %v2487_v34, 7  ;;  %v6184_v41 = vld [vmem:[#allocation4] sm:$0x44]  ;;  %v6186_v5 = vld [vmem:[#allocation4 + $0x10] sm:$0x44] }
 0x580   :  { %2422 = vst [vmem:[#allocation10 + $0x18] sm:$0x4] %v2421_v30  ;;  %v2424_v16 = vsel %vm6125_vm1, %v2398_v0, %v2423_v1  ;;  %v2489_v52 = vunpack.c.l.b16 %v2398_v0  ;;  %v2496_v36 = vsel %vm744_vm5, %v2495_v58, %v2494_v15  ;;  %v6188_v7 = vld [vmem:[#allocation4 + $0x50] sm:$0x44]  ;;  %v6190_v40 = vld [vmem:[#allocation4 + $0x20] sm:$0x44]  ;;  %v2442_v43 = vunpack.c.l.bf16 %v6184_v41 }
 0x581   :  { %2425 = vst [vmem:[#allocation10 + $0x1c] sm:$0x4] %v2424_v16  ;;  %v2497_v32 = vsel %vm747_vm6, %v2486_v25, %v2496_v36  ;;  %v2500_v18 = vrot.slane %v2488_v59, 6  ;;  %v6192_v56 = vld [vmem:[#allocation4 + $0x30] sm:$0x44]  ;;  %v2462_v45 = vunpack.c.l.bf16 %v6188_v7  ;;  %v2446_v21 = vunpack.c.l.bf16 %v6186_v5 }
 0x582   :  { %v2499_v12 = vsel %vm750_vm7, %v2498_v63, %v2497_v32  ;;  %v2502_v61 = vrot.slane %v2489_v52, 5  ;;  %v6194_v19 = vld [vmem:[#allocation4 + $0x40] sm:$0x44]  ;;  %v6200_v35 = vld [vmem:[#allocation4 + $0x70] sm:$0x44]  ;;  %v2450_v3 = vunpack.c.l.bf16 %v6190_v40  ;;  %v2454_v54 = vunpack.c.l.bf16 %v6192_v56 }
 0x583   :  { %v2501_v42 = vsel %vm753_vm8, %v2500_v18, %v2499_v12  ;;  %v6196_v8 = vld [vmem:[#allocation4 + $0x60] sm:$0x44]  ;;  %v2458_v1 = vunpack.c.l.bf16 %v6194_v19  ;;  %v2748_v55 = vrot.slane %v6089_v48, 7  ;;  %v2749_v58 = vrot.slane %v6093_v62, 7  ;;  %v6212_v16 = vld [vmem:[#allocation4 + $0x58] sm:$0x44] }
 0x584   :  { %v2503_v13 = vsel %vm756_vm9, %v2502_v61, %v2501_v42  ;;  %v2466_v34 = vunpack.c.l.bf16 %v6196_v8  ;;  %v2750_v30 = vrot.slane %v6097_v26, 7  ;;  %v2751_v52 = vrot.slane %v6102_v53, 7  ;;  %v6216_v18 = vld [vmem:[#allocation4 + $0x8] sm:$0x44]  ;;  %v6218_v12 = vld [vmem:[#allocation4 + $0x18] sm:$0x44] }
 0x585   :  { %v2504_v44 = vpack.c.b16 %v2503_v13, %v2503_v13  ;;  %v2470_v36 = vunpack.c.l.bf16 %v6200_v35  ;;  %v2752_v42 = vrot.slane %v6107_v60, 7 }
 0x587   :  { %2539 = vmatmul.mubr.bf16.vlgmr.msra.gmra.mxu0 %v2504_v44  ;;  %2580 = vmatmul.mubr.bf16.vlgmr.msra.gmra.mxu1 %v2504_v44 }
 0x588   :  { %2943 = vmatpush1.bf16.msra.mxu0 %v5885_v46  ;;  %2984 = vmatpush1.bf16.msra.mxu1 %v5888_v17  ;;  %v6892_v46 = vld [vmem:[#allocation23_spill] sm:$0xff]  ;;  %v6893_v17 = vld [vmem:[#allocation24_spill] sm:$0xff] }
 0x589   :  { %2944 = vmatprep.subr.bf16.mxu0 %v5891_v22  ;;  %2985 = vmatprep.subr.bf16.mxu1 %v5894_v29  ;;  %v6894_v22 = vld [vmem:[#allocation25_spill] sm:$0xff]  ;;  %v6895_v29 = vld [vmem:[#allocation26_spill] sm:$0xff] }
 0x58a   :  { %2974 = vmatprep.mubr.bf16.mxu0 %v6791_v24  ;;  %3015 = vmatprep.mubr.bf16.mxu1 %v6791_v24 }
 0x58c   :  { %2945 = vmatpush1.bf16.msra.mxu0 %v5899_v49  ;;  %2986 = vmatpush1.bf16.msra.mxu1 %v5902_v27  ;;  %v6896_v49 = vld [vmem:[#allocation27_spill] sm:$0xff]  ;;  %v6897_v27 = vld [vmem:[#allocation28_spill] sm:$0xff] }
 0x58d   :  { %2946 = vmatprep.subr.bf16.mxu0 %v5905_v28  ;;  %2987 = vmatprep.subr.bf16.mxu1 %v5908_v11  ;;  %v6898_v28 = vld [vmem:[#allocation29_spill] sm:$0xff]  ;;  %v6899_v11 = vld [vmem:[#allocation30_spill] sm:$0xff] }
 0x590   :  { %2947 = vmatpush1.bf16.msra.mxu0 %v5911_v33  ;;  %2988 = vmatpush1.bf16.msra.mxu1 %v5914_v14  ;;  %v6900_v33 = vld [vmem:[#allocation31_spill] sm:$0xff]  ;;  %v6901_v14 = vld [vmem:[#allocation32_spill] sm:$0xff] }
 0x591   :  { %2948 = vmatprep.subr.bf16.mxu0 %v5917_v51  ;;  %2989 = vmatprep.subr.bf16.mxu1 %v6892_v46  ;;  %v6902_v51 = vld [vmem:[#allocation33_spill] sm:$0xff] }
 0x594   :  { %2949 = vmatpush1.bf16.msra.mxu0 %v6893_v17  ;;  %2990 = vmatpush1.bf16.msra.mxu1 %v6894_v22  ;;  %v6225_v17 = vld [vmem:[#allocation4 + $0x28] sm:$0x44]  ;;  %v2753_v22 = vrot.slane %v6112_v57, 7 }
 0x595   :  { %2950 = vmatprep.subr.bf16.mxu0 %v6895_v29  ;;  %2991 = vmatprep.subr.bf16.mxu1 %v6896_v49  ;;  %v2754_v29 = vrot.slane %v6115_v9, 7 }
 0x598   :  { %2951 = vmatpush1.bf16.msra.mxu0 %v6897_v27  ;;  %2992 = vmatpush1.bf16.msra.mxu1 %v6898_v28  ;;  %v6229_v28 = vld [vmem:[#allocation4 + $0x38] sm:$0x44] }
 0x599   :  { %2952 = vmatprep.subr.bf16.mxu0 %v6899_v11  ;;  %2993 = vmatprep.subr.bf16.mxu1 %v6900_v33  ;;  %v2464_v11 = vunpack.c.l.bf16 %v6212_v16  ;;  %v2755_v33 = vrot.slane %v6118_v39, 7 }
 0x59c   :  { %2953 = vmatpush1.bf16.msra.mxu0 %v6901_v14  ;;  %2994 = vmatpush1.bf16.msra.mxu1 %v6902_v51 }
 0x59d   :  { %2954 = vmatprep.subr.bf16.mxu0 %v6903_v2  ;;  %2995 = vmatprep.subr.bf16.mxu1 %v6904_v4 }
 0x5a0   :  { %2955 = vmatpush1.bf16.msra.mxu0 %v6905_v31  ;;  %2996 = vmatpush1.bf16.msra.mxu1 %v6906_v47  ;;  %v6233_v31 = vld [vmem:[#allocation4 + $0x48] sm:$0x44]  ;;  %v2444_v47 = vunpack.c.l.bf16 %v6216_v18 }
 0x5a1   :  { %2956 = vmatprep.subr.bf16.mxu0 %v6907_v10  ;;  %2997 = vmatprep.subr.bf16.mxu1 %v6908_v23  ;;  %v2448_v10 = vunpack.c.l.bf16 %v6218_v12 }
 0x5a4   :  { %2957 = vmatpush1.bf16.msra.mxu0 %v6909_v37  ;;  %2998 = vmatpush1.bf16.msra.mxu1 %v6910_v6  ;;  %v6237_v37 = vld [vmem:[#allocation4 + $0x68] sm:$0x44]  ;;  %v2452_v6 = vunpack.c.l.bf16 %v6225_v17 }
 0x5a5   :  { %3379 = vmatprep.subr.bf16.mxu0 %v4633_v20  ;;  %3420 = vmatprep.subr.bf16.mxu1 %v4634_v50 }
 0x647   :  { %v2540_v38 = vpop.f32.mrf.mxu0  ;;  %v6207_v0 = vpop.f32.mrf.mxu1 }
 0x648   :  { %v2592_v25 = vrot.slane %v2540_v38, 3  ;;  %v2596_v59 = vrot.slane %v2540_v38, 4  ;;  %v2600_v15 = vrot.slane %v2540_v38, 5  ;;  %v2604_v63 = vrot.slane %v2540_v38, 6 }
 0x649   :  { %v2672_v32 = vadd.f32 %v2540_v38, %v2462_v45  ;;  %v6220_v61 = vpop.f32.mrf.mxu0  ;;  %v6223_v13 = vpop.f32.mrf.mxu1  ;;  %v2608_v44 = vrot.slane %v2540_v38, 7  ;;  %v2612_v49 = vrot.slane %v2540_v38, 1  ;;  %v2616_v2 = vrot.slane %v2540_v38, 2 }
 0x64a   :  { %v2652_v46 = vadd.f32 %v2592_v25, %v2442_v43  ;;  %v2656_v27 = vadd.f32 %v2596_v59, %v2446_v21  ;;  %v2660_v4 = vadd.f32 %v2600_v15, %v2450_v3  ;;  %v2664_v23 = vadd.f32 %v2604_v63, %v2454_v54  ;;  %v6243_v25 = vld [vmem:[#allocation4 + $0x78] sm:$0x44] }
 0x64b   :  { %v2544_v14 = vpop.f32.mrf.mxu0  ;;  %v2585_v51 = vpop.f32.mrf.mxu1  ;;  %4329 = vtanh.f32 %v2672_v32  ;;  %v2594_v20 = vrot.slane %v6207_v0, 3  ;;  %v2668_v45 = vadd.f32 %v2608_v44, %v2458_v1  ;;  %v2456_v21 = vunpack.c.l.bf16 %v6229_v28 }
 0x64c   :  { %4331 = vtanh.f32 %v2652_v46  ;;  %v2598_v3 = vrot.slane %v6207_v0, 4  ;;  %v2676_v38 = vadd.f32 %v2612_v49, %v2466_v34  ;;  %v2460_v54 = vunpack.c.l.bf16 %v6233_v31 }
 0x64d   :  { %v2545_v50 = vpop.f32.mrf.mxu0  ;;  %v2586_v43 = vpop.f32.mrf.mxu1  ;;  %4333 = vtanh.f32 %v2656_v27  ;;  %v2602_v59 = vrot.slane %v6207_v0, 5  ;;  %v2680_v15 = vadd.f32 %v2616_v2, %v2470_v36  ;;  %v2468_v63 = vunpack.c.l.bf16 %v6237_v37 }
 0x64e   :  { %4335 = vtanh.f32 %v2660_v4  ;;  %v2606_v32 = vrot.slane %v6207_v0, 6  ;;  %v2610_v1 = vrot.slane %v6207_v0, 7  ;;  %v2654_v44 = vadd.f32 %v2594_v20, %v2444_v47 }
 0x64f   :  { %4337 = vtanh.f32 %v2664_v23  ;;  %v2463_v46 = vunpack.c.h.bf16 %v6188_v7  ;;  %v2472_v34 = vunpack.c.l.bf16 %v6243_v25  ;;  %v2658_v49 = vadd.f32 %v2598_v3, %v2448_v10 }
 0x650   :  { %4339 = vtanh.f32 %v2668_v45  ;;  %v2443_v27 = vunpack.c.h.bf16 %v6184_v41  ;;  %v2662_v14 = vadd.f32 %v2602_v59, %v2452_v6  ;;  %v2447_v36 = vunpack.c.h.bf16 %v6186_v5 }
 0x651   :  { %4341 = vtanh.f32 %v2676_v38  ;;  %v2593_v51 = vrot.slane %v6220_v61, 3  ;;  %v2666_v2 = vadd.f32 %v2606_v32, %v2456_v21  ;;  %v2451_v4 = vunpack.c.h.bf16 %v6190_v40 }
 0x652   :  { %4343 = vtanh.f32 %v2680_v15  ;;  %v2597_v47 = vrot.slane %v6220_v61, 4  ;;  %v2670_v23 = vadd.f32 %v2610_v1, %v2460_v54  ;;  %v2455_v7 = vunpack.c.h.bf16 %v6192_v56 }
 0x653   :  { %4345 = vtanh.f32 %v2654_v44  ;;  %v2601_v10 = vrot.slane %v6220_v61, 5  ;;  %v2674_v41 = vadd.f32 %v6207_v0, %v2464_v11  ;;  %v2459_v6 = vunpack.c.h.bf16 %v6194_v19 }
 0x654   :  { %4347 = vtanh.f32 %v2658_v49  ;;  %v2605_v5 = vrot.slane %v6220_v61, 6  ;;  %v2467_v20 = vunpack.c.h.bf16 %v6196_v8  ;;  %v2609_v40 = vrot.slane %v6220_v61, 7 }
 0x655   :  { %4349 = vtanh.f32 %v2662_v14  ;;  %v2653_v50 = vadd.f32 %v2593_v51, %v2443_v27  ;;  %v2471_v43 = vunpack.c.h.bf16 %v6200_v35  ;;  %v2657_v45 = vadd.f32 %v2597_v47, %v2447_v36 }
 0x656   :  { %4351 = vtanh.f32 %v2666_v2  ;;  %v2465_v56 = vunpack.c.h.bf16 %v6212_v16  ;;  %v2613_v11 = vrot.slane %v6220_v61, 1  ;;  %v2661_v21 = vadd.f32 %v2601_v10, %v2451_v4 }
 0x657   :  { %4353 = vtanh.f32 %v2670_v23  ;;  %v2445_v19 = vunpack.c.h.bf16 %v6216_v18  ;;  %v2614_v38 = vrot.slane %v6207_v0, 1  ;;  %v2617_v8 = vrot.slane %v6220_v61, 2 }
 0x658   :  { %v4330_v3 = vpop.eup %4329  ;;  %4355 = vtanh.f32 %v2674_v41  ;;  %v2665_v54 = vadd.f32 %v2605_v5, %v2455_v7  ;;  %v2618_v15 = vrot.slane %v6207_v0, 2  ;;  %v2669_v35 = vadd.f32 %v2609_v40, %v2459_v6 }
 0x659   :  { %v4332_v59 = vpop.eup %4331  ;;  %4357 = vtanh.f32 %v2653_v50  ;;  %v2449_v32 = vunpack.c.h.bf16 %v6218_v12  ;;  %v2673_v44 = vadd.f32 %v6220_v61, %v2463_v46  ;;  %v2453_v18 = vunpack.c.h.bf16 %v6225_v17 }
 0x65a   :  { %v4334_v1 = vpop.eup %4333  ;;  %4359 = vtanh.f32 %v2657_v45  ;;  %v2457_v49 = vunpack.c.h.bf16 %v6229_v28  ;;  %v2677_v14 = vadd.f32 %v2613_v11, %v2467_v20  ;;  %v2461_v36 = vunpack.c.h.bf16 %v6233_v31 }
 0x65b   :  { %v4336_v27 = vpop.eup %4335  ;;  %4361 = vtanh.f32 %v2661_v21  ;;  %v2469_v51 = vunpack.c.h.bf16 %v6237_v37  ;;  %v2678_v2 = vadd.f32 %v2614_v38, %v2468_v63  ;;  %v2681_v4 = vadd.f32 %v2617_v8, %v2471_v43 }
 0x65c   :  { %v4338_v0 = vpop.eup %4337  ;;  %4363 = vtanh.f32 %v2665_v54  ;;  %v2473_v12 = vunpack.c.h.bf16 %v6243_v25  ;;  %v2682_v61 = vadd.f32 %v2618_v15, %v2472_v34  ;;  %v2595_v17 = vrot.slane %v6223_v13, 3 }
 0x65d   :  { %v4340_v47 = vpop.eup %4339  ;;  %4365 = vtanh.f32 %v2669_v35  ;;  %v2599_v28 = vrot.slane %v6223_v13, 4  ;;  %v2692_v23 = vmul.f32 0.5, %v4332_v59  ;;  %v2603_v31 = vrot.slane %v6223_v13, 5 }
 0x65e   :  { %v4342_v46 = vpop.eup %4341  ;;  %4367 = vtanh.f32 %v2673_v44  ;;  %v2607_v37 = vrot.slane %v6223_v13, 6  ;;  %v2693_v63 = vmul.f32 0.5, %v4334_v1  ;;  %v2611_v10 = vrot.slane %v6223_v13, 7 }
 0x65f   :  { %v4344_v7 = vpop.eup %4343  ;;  %4369 = vtanh.f32 %v2677_v14  ;;  %v2615_v25 = vrot.slane %v6223_v13, 1  ;;  %v2694_v41 = vmul.f32 0.5, %v4336_v27  ;;  %v2695_v6 = vmul.f32 0.5, %v4338_v0 }
 0x660   :  { %v4346_v34 = vpop.eup %4345  ;;  %4371 = vtanh.f32 %v2681_v4  ;;  %v2619_v5 = vrot.slane %v6223_v13, 2  ;;  %v2696_v40 = vmul.f32 0.5, %v4340_v47  ;;  %v2697_v50 = vmul.f32 0.5, %v4330_v3 }
 0x661   :  { %v4348_v20 = vpop.eup %4347  ;;  %v2655_v43 = vadd.f32 %v2595_v17, %v2445_v19  ;;  %v2659_v45 = vadd.f32 %v2599_v28, %v2449_v32  ;;  %v2698_v21 = vmul.f32 0.5, %v4342_v46  ;;  %v2700_v38 = vadd.f32 0.5, %v2692_v23 }
 0x662   :  { %v4350_v11 = vpop.eup %4349  ;;  %4373 = vtanh.f32 %v2678_v2  ;;  %v2663_v8 = vadd.f32 %v2603_v31, %v2453_v18  ;;  %v2699_v59 = vmul.f32 0.5, %v4344_v7  ;;  %v2701_v15 = vadd.f32 0.5, %v2693_v63 }
 0x663   :  { %v4352_v54 = vpop.eup %4351  ;;  %4375 = vtanh.f32 %v2682_v61  ;;  %v2667_v35 = vadd.f32 %v2607_v37, %v2457_v49  ;;  %v2702_v44 = vadd.f32 0.5, %v2694_v41  ;;  %v2703_v27 = vadd.f32 0.5, %v2695_v6 }
 0x664   :  { %v4354_v1 = vpop.eup %4353  ;;  %v2671_v14 = vadd.f32 %v2611_v10, %v2461_v36  ;;  %v2675_v3 = vadd.f32 %v6223_v13, %v2465_v56  ;;  %v2704_v32 = vadd.f32 0.5, %v2696_v40  ;;  %v2705_v0 = vadd.f32 0.5, %v2697_v50 }
 0x665   :  { %v4356_v19 = vpop.eup %4355  ;;  %v2679_v4 = vadd.f32 %v2615_v25, %v2469_v51  ;;  %4377 = vtanh.f32 %v2655_v43  ;;  %v2706_v18 = vadd.f32 0.5, %v2698_v21  ;;  %v2772_v47 = vmul.f32 %v4346_v34, %v2700_v38 }
 0x666   :  { %v4358_v2 = vpop.eup %4357  ;;  %4379 = vtanh.f32 %v2659_v45  ;;  %v2683_v17 = vadd.f32 %v2619_v5, %v2473_v12  ;;  %v2707_v49 = vadd.f32 0.5, %v2699_v59  ;;  %v2773_v46 = vmul.f32 %v4348_v20, %v2701_v15 }
 0x667   :  { %v4360_v61 = vpop.eup %4359  ;;  %v2716_v28 = vmul.f32 0.5, %v4358_v2  ;;  %4381 = vtanh.f32 %v2663_v8  ;;  %v2774_v16 = vmul.f32 %v4350_v11, %v2702_v44  ;;  %v2775_v31 = vmul.f32 %v4352_v54, %v2703_v27 }
 0x668   :  { %v4362_v36 = vpop.eup %4361  ;;  %v2717_v23 = vmul.f32 0.5, %v4360_v61  ;;  %4383 = vtanh.f32 %v2667_v35  ;;  %v2776_v51 = vmul.f32 %v4354_v1, %v2704_v32  ;;  %v2777_v25 = vmul.f32 %v4356_v19, %v2705_v0 }
 0x669   :  { %v4364_v13 = vpop.eup %4363  ;;  %v2718_v56 = vmul.f32 0.5, %v4362_v36  ;;  %v2724_v37 = vadd.f32 0.5, %v2716_v28  ;;  %4385 = vtanh.f32 %v2671_v14 }
 0x66a   :  { %v4366_v7 = vpop.eup %4365  ;;  %v2719_v63 = vmul.f32 0.5, %v4364_v13  ;;  %v2725_v10 = vadd.f32 0.5, %v2717_v23  ;;  %4387 = vtanh.f32 %v2675_v3 }
 0x66b   :  { %v4368_v12 = vpop.eup %4367  ;;  %v2720_v34 = vmul.f32 0.5, %v4366_v7  ;;  %v2726_v41 = vadd.f32 0.5, %v2718_v56  ;;  %v2764_v6 = vmul.f32 %v2748_v55, %v2724_v37  ;;  %4389 = vtanh.f32 %v2679_v4 }
 0x66c   :  { %v4370_v5 = vpop.eup %4369  ;;  %v2721_v20 = vmul.f32 0.5, %v4368_v12  ;;  %v2727_v40 = vadd.f32 0.5, %v2719_v63  ;;  %v2765_v50 = vmul.f32 %v2749_v58, %v2725_v10  ;;  %4391 = vtanh.f32 %v2683_v17 }
 0x66d   :  { %v4372_v43 = vpop.eup %4371  ;;  %v2722_v45 = vmul.f32 0.5, %v4370_v5  ;;  %v2728_v11 = vadd.f32 0.5, %v2720_v34  ;;  %v2766_v21 = vmul.f32 %v2750_v30, %v2726_v41  ;;  %v6294_v38 = vadd.f32 %v2772_v47, %v2764_v6 }
 0x66e   :  { %v2723_v8 = vmul.f32 0.5, %v4372_v43  ;;  %v2729_v54 = vadd.f32 0.5, %v2721_v20  ;;  %v2767_v48 = vmul.f32 %v2751_v52, %v2727_v40  ;;  %v6298_v55 = vadd.f32 %v2773_v46, %v2765_v50  ;;  %v2838_v40 = vld [vmem:[#allocation10] sm:$0x4]  ;;  %v4637_v20 = vld [vmem:[#allocation2 + $0xc4] ss:$16 sps:$4 sm:$0xff]  }
 0x66f   :  { %v4374_v59 = vpop.eup %4373  ;;  %v2730_v15 = vadd.f32 0.5, %v2722_v45  ;;  %v2768_v62 = vmul.f32 %v2752_v42, %v2728_v11  ;;  %v6302_v58 = vadd.f32 %v2774_v16, %v2766_v21  ;;  %4393 = vtanh.f32 %v6294_v38  ;;  %v2841_v21 = vld [vmem:[#allocation10 + $0x4] sm:$0x4] }
 0x670   :  { %v4376_v26 = vpop.eup %4375  ;;  %v2731_v30 = vadd.f32 0.5, %v2723_v8  ;;  %v2769_v35 = vmul.f32 %v2753_v22, %v2729_v54  ;;  %v6307_v1 = vadd.f32 %v2775_v31, %v2767_v48  ;;  %4395 = vtanh.f32 %v6298_v55 }
 0x671   :  { %v2770_v53 = vmul.f32 %v2754_v29, %v2730_v15  ;;  %v2778_v52 = vmul.f32 %v4374_v59, %v2706_v18  ;;  %v6312_v44 = vadd.f32 %v2776_v51, %v2768_v62  ;;  %4397 = vtanh.f32 %v6302_v58  ;;  %v2844_v15 = vld [vmem:[#allocation10 + $0x8] sm:$0x4] }
 0x672   :  { %v4378_v60 = vpop.eup %4377  ;;  %v2771_v42 = vmul.f32 %v2755_v33, %v2731_v30  ;;  %v2779_v27 = vmul.f32 %v4376_v26, %v2707_v49  ;;  %v6317_v14 = vadd.f32 %v2777_v25, %v2769_v35  ;;  %4399 = vtanh.f32 %v6307_v1 }
 0x673   :  { %v4380_v57 = vpop.eup %4379  ;;  %v6320_v22 = vadd.f32 %v2778_v52, %v2770_v53  ;;  %4401 = vtanh.f32 %v6312_v44  ;;  %v2796_v33 = vmul.f32 0.5, %v4378_v60  ;;  %v2847_v53 = vld [vmem:[#allocation10 + $0xc] sm:$0x4] }
 0x674   :  { %v4382_v9 = vpop.eup %4381  ;;  %v6323_v29 = vadd.f32 %v2779_v27, %v2771_v42  ;;  %4403 = vtanh.f32 %v6317_v14  ;;  %v2797_v0 = vmul.f32 0.5, %v4380_v57 }
 0x675   :  { %v4384_v3 = vpop.eup %4383  ;;  %4405 = vtanh.f32 %v6320_v22  ;;  %v2798_v2 = vmul.f32 0.5, %v4382_v9  ;;  %v2804_v47 = vadd.f32 0.5, %v2796_v33 }
 0x676   :  { %v4386_v19 = vpop.eup %4385  ;;  %4407 = vtanh.f32 %v6323_v29  ;;  %v2799_v18 = vmul.f32 0.5, %v4384_v3  ;;  %v2805_v28 = vadd.f32 0.5, %v2797_v0  ;;  %v2850_v3 = vld [vmem:[#allocation10 + $0x10] sm:$0x4] }
 0x677   :  { %v4388_v39 = vpop.eup %4387  ;;  %v2800_v17 = vmul.f32 0.5, %v4386_v19  ;;  %v2806_v16 = vadd.f32 0.5, %v2798_v2 }
 0x678   :  { %v4390_v32 = vpop.eup %4389  ;;  %v2801_v61 = vmul.f32 0.5, %v4388_v39  ;;  %v2807_v37 = vadd.f32 0.5, %v2799_v18 }
 0x679   :  { %v4392_v4 = vpop.eup %4391  ;;  %v2802_v46 = vmul.f32 0.5, %v4390_v32  ;;  %v2808_v7 = vadd.f32 0.5, %v2800_v17  ;;  %v2853_v32 = vld [vmem:[#allocation10 + $0x14] sm:$0x4] }
 0x67a   :  { %v2803_v36 = vmul.f32 0.5, %v4392_v4  ;;  %v2809_v63 = vadd.f32 0.5, %v2801_v61  ;;  %v2856_v61 = vld [vmem:[#allocation10 + $0x18] sm:$0x4] }
 0x67b   :  { %v2810_v34 = vadd.f32 0.5, %v2802_v46 }
 0x67c   :  { %v4394_v49 = vpop.eup %4393  ;;  %v2811_v41 = vadd.f32 0.5, %v2803_v36  ;;  %v2859_v36 = vld [vmem:[#allocation10 + $0x1c] sm:$0x4] }
 0x67d   :  { %v4396_v23 = vpop.eup %4395  ;;  %v2820_v31 = vmul.f32 %v4394_v49, %v2804_v47 }
 0x67e   :  { %v4398_v13 = vpop.eup %4397  ;;  %v2821_v56 = vmul.f32 %v4396_v23, %v2805_v28 }
 0x67f   :  { %v4400_v51 = vpop.eup %4399  ;;  %v2822_v10 = vmul.f32 %v4398_v13, %v2806_v16  ;;  %v2828_v25 = vpack.c.bf16 %v2820_v31, %v2820_v31 }
 0x680   :  { %v4402_v12 = vpop.eup %4401  ;;  %v2823_v6 = vmul.f32 %v4400_v51, %v2807_v37  ;;  %v2829_v5 = vpack.c.bf16 %v2821_v56, %v2821_v56 }
 0x681   :  { %v4404_v50 = vpop.eup %4403  ;;  %v2824_v43 = vmul.f32 %v4402_v12, %v2808_v7  ;;  %v2830_v45 = vpack.c.bf16 %v2822_v10, %v2822_v10  ;;  %v2839_v11 = vsel %vm6329_vm10, %v2828_v25, %v2838_v40  ;;  %v2918_v8 = vunpack.c.l.b16 %v2828_v25  ;;  %v4638_v40 = vld [vmem:[#allocation2 + $0xcc] ss:$16 sps:$4 sm:$0xff]  }
 0x682   :  { %v2825_v54 = vmul.f32 %v4404_v50, %v2809_v63  ;;  %v2831_v48 = vpack.c.bf16 %v2823_v6, %v2823_v6  ;;  %2840 = vst [vmem:[#allocation10] sm:$0x4] %v2839_v11  ;;  %v2842_v59 = vsel %vm6329_vm10, %v2829_v5, %v2841_v21  ;;  %v2919_v62 = vunpack.c.l.b16 %v2829_v5  ;;  %v4406_v26 = vpop.eup %4405  ;;  %v4635_v6 = vld [vmem:[#allocation2 + $0xe0] ss:$16 sps:$4 sm:$0xff]   ;;  %v4636_v5 = vld [vmem:[#allocation2 + $0xe8] ss:$16 sps:$4 sm:$0xff]  }
 0x683   :  { %v2832_v30 = vpack.c.bf16 %v2824_v43, %v2824_v43  ;;  %2843 = vst [vmem:[#allocation10 + $0x4] sm:$0x4] %v2842_v59  ;;  %v2845_v35 = vsel %vm6329_vm10, %v2830_v45, %v2844_v15  ;;  %v2920_v52 = vunpack.c.l.b16 %v2830_v45  ;;  %v2926_v60 = vrot.slane %v2918_v8, 5  ;;  %v4408_v42 = vpop.eup %4407  ;;  %v4639_v50 = vld [vmem:[#allocation2 + $0xc0] ss:$16 sps:$4 sm:$0xff]  }
 0x684   :  { %v2826_v27 = vmul.f32 %v4406_v26, %v2810_v34  ;;  %v2833_v57 = vpack.c.bf16 %v2825_v54, %v2825_v54  ;;  %2846 = vst [vmem:[#allocation10 + $0x8] sm:$0x4] %v2845_v35  ;;  %v2848_v9 = vsel %vm6329_vm10, %v2831_v48, %v2847_v53  ;;  %v2921_v19 = vunpack.c.l.b16 %v2831_v48  ;;  %v4640_v43 = vld [vmem:[#allocation2 + $0xc8] ss:$16 sps:$4 sm:$0xff]   ;;  %v4641_v45 = vld [vmem:[#allocation2 + $0xa4] ss:$16 sps:$4 sm:$0xff]  }
 0x685   :  { %v2827_v39 = vmul.f32 %v4408_v42, %v2811_v41  ;;  %2849 = vst [vmem:[#allocation10 + $0xc] sm:$0x4] %v2848_v9  ;;  %v2851_v33 = vsel %vm6329_vm10, %v2832_v30, %v2850_v3  ;;  %v2922_v0 = vunpack.c.l.b16 %v2832_v30  ;;  %v2927_v4 = vrot.slane %v2919_v62, 4  ;;  %v4642_v11 = vld [vmem:[#allocation2 + $0xac] ss:$16 sps:$4 sm:$0xff]  }
 0x686   :  { %v2834_v2 = vpack.c.bf16 %v2826_v27, %v2826_v27  ;;  %2852 = vst [vmem:[#allocation10 + $0x10] sm:$0x4] %v2851_v33  ;;  %v2854_v18 = vsel %vm6329_vm10, %v2833_v57, %v2853_v32  ;;  %v2929_v47 = vrot.slane %v2920_v52, 3  ;;  %v2931_v28 = vrot.slane %v2921_v19, 2  ;;  %v4643_v21 = vld [vmem:[#allocation2 + $0xa0] ss:$16 sps:$4 sm:$0xff]  }
 0x687   :  { %v2835_v17 = vpack.c.bf16 %v2827_v39, %v2827_v39  ;;  %2855 = vst [vmem:[#allocation10 + $0x14] sm:$0x4] %v2854_v18  ;;  %v2928_v49 = vsel %vm738_vm2, %v2927_v4, %v2926_v60  ;;  %v2933_v31 = vrot.slane %v2922_v0, 1  ;;  %v2923_v56 = vunpack.c.l.b16 %v2833_v57  ;;  %v4644_v8 = vld [vmem:[#allocation2 + $0xa8] ss:$16 sps:$4 sm:$0xff]  }
 0x688   :  { %v2857_v46 = vsel %vm6329_vm10, %v2834_v2, %v2856_v61  ;;  %v2924_v23 = vunpack.c.l.b16 %v2834_v2  ;;  %v2930_v16 = vsel %vm741_vm4, %v2929_v47, %v2928_v49  ;;  %v4645_v54 = vld [vmem:[#allocation2 + $0x84] ss:$16 sps:$4 sm:$0xff]   ;;  %v4646_v48 = vld [vmem:[#allocation2 + $0x8c] ss:$16 sps:$4 sm:$0xff]   ;;  %v4647_v59 = vld [vmem:[#allocation2 + $0x80] ss:$16 sps:$4 sm:$0xff]  }
 0x689   :  { %2858 = vst [vmem:[#allocation10 + $0x18] sm:$0x4] %v2857_v46  ;;  %v2860_v13 = vsel %vm6329_vm10, %v2835_v17, %v2859_v36  ;;  %v2925_v37 = vunpack.c.l.b16 %v2835_v17  ;;  %v2932_v51 = vsel %vm744_vm5, %v2931_v28, %v2930_v16  ;;  %v4648_v15 = vld [vmem:[#allocation2 + $0x88] ss:$16 sps:$4 sm:$0xff]   ;;  %v4650_v62 = vld [vmem:[#allocation2 + $0x6c] ss:$16 sps:$4 sm:$0xff]  }
 0x68a   :  { %2861 = vst [vmem:[#allocation10 + $0x1c] sm:$0x4] %v2860_v13  ;;  %v2934_v7 = vsel %vm747_vm6, %v2933_v31, %v2932_v51  ;;  %v2936_v63 = vrot.slane %v2924_v23, 7  ;;  %v4651_v26 = vld [vmem:[#allocation2 + $0x60] ss:$16 sps:$4 sm:$0xff]   ;;  %v3185_v51 = vrot.slane %v6298_v55, 7 }
 0x68b   :  { %v2935_v10 = vsel %vm750_vm7, %v2923_v56, %v2934_v7  ;;  %v2938_v25 = vrot.slane %v2925_v37, 6  ;;  %v4652_v30 = vld [vmem:[#allocation2 + $0x68] ss:$16 sps:$4 sm:$0xff]   ;;  %v4653_v35 = vld [vmem:[#allocation2 + $0x44] ss:$16 sps:$4 sm:$0xff]   ;;  %v3184_v37 = vrot.slane %v6294_v38, 7 }
 0x68c   :  { %v2937_v12 = vsel %vm753_vm8, %v2936_v63, %v2935_v10  ;;  %v4654_v53 = vld [vmem:[#allocation2 + $0x4c] ss:$16 sps:$4 sm:$0xff]   ;;  %v4655_v52 = vld [vmem:[#allocation2 + $0x40] ss:$16 sps:$4 sm:$0xff]   ;;  %v4656_v60 = vld [vmem:[#allocation2 + $0x48] ss:$16 sps:$4 sm:$0xff]  }
 0x68d   :  { %v2939_v34 = vsel %vm756_vm9, %v2938_v25, %v2937_v12  ;;  %v4657_v42 = vld [vmem:[#allocation2 + $0x24] ss:$16 sps:$4 sm:$0xff]   ;;  %v4658_v27 = vld [vmem:[#allocation2 + $0x2c] ss:$16 sps:$4 sm:$0xff]   ;;  %v4659_v57 = vld [vmem:[#allocation2 + $0x20] ss:$16 sps:$4 sm:$0xff]  }
 0x68e   :  { %v2940_v41 = vpack.c.b16 %v2939_v34, %v2939_v34  ;;  %v4660_v9 = vld [vmem:[#allocation2 + $0x28] ss:$16 sps:$4 sm:$0xff]   ;;  %v4661_v3 = vld [vmem:[#allocation2 + $0x4] ss:$16 sps:$4 sm:$0xff]   ;;  %v4662_v19 = vld [vmem:[#allocation2 + $0xc] ss:$16 sps:$4 sm:$0xff]  }
 0x68f   :  { %v4663_v39 = vld [vmem:[#allocation2] ss:$16 sps:$4 sm:$0xff]   ;;  %v4664_v33 = vld [vmem:[#allocation2 + $0x8] ss:$16 sps:$4 sm:$0xff]   ;;  %v3186_v7 = vrot.slane %v6302_v58, 7  ;;  %v3187_v34 = vrot.slane %v6307_v1, 7 }
 0x690   :  { %2975 = vmatmul.mubr.bf16.vlgmr.msra.gmra.mxu0 %v2940_v41  ;;  %3016 = vmatmul.mubr.bf16.vlgmr.msra.gmra.mxu1 %v2940_v41  ;;  %v6358_v32 = vld [vmem:[#allocation4] sm:$0x88]  ;;  %v6360_v0 = vld [vmem:[#allocation4 + $0x10] sm:$0x88]  ;;  %v6386_v12 = vld [vmem:[#allocation4 + $0x68] sm:$0x88] }
 0x691   :  { %3380 = vmatpush1.bf16.msra.mxu0 %v4635_v6  ;;  %3421 = vmatpush1.bf16.msra.mxu1 %v4636_v5  ;;  %v6362_v4 = vld [vmem:[#allocation4 + $0x60] sm:$0x88]  ;;  %v6366_v18 = vld [vmem:[#allocation4 + $0x30] sm:$0x88]  ;;  %v2878_v61 = vunpack.c.l.bf16 %v6358_v32  ;;  %v2882_v46 = vunpack.c.l.bf16 %v6360_v0 }
 0x692   :  { %3381 = vmatprep.subr.bf16.mxu0 %v4637_v20  ;;  %3422 = vmatprep.subr.bf16.mxu1 %v4638_v40  ;;  %v6364_v2 = vld [vmem:[#allocation4 + $0x20] sm:$0x88]  ;;  %v6370_v17 = vld [vmem:[#allocation4 + $0x50] sm:$0x88]  ;;  %v2902_v49 = vunpack.c.l.bf16 %v6362_v4  ;;  %v2890_v23 = vunpack.c.l.bf16 %v6366_v18  ;;  %v6390_v20 = vld [vmem:[#allocation4 + $0x8] sm:$0x88] }
 0x693   :  { %3411 = vmatprep.mubr.bf16.mxu0 %v6791_v24  ;;  %3452 = vmatprep.mubr.bf16.mxu1 %v6791_v24  ;;  %v4649_v24 = vld [vmem:[#allocation2 + $0x64] ss:$16 sps:$4 sm:$0xff]   ;;  %v2886_v36 = vunpack.c.l.bf16 %v6364_v2  ;;  %v2898_v31 = vunpack.c.l.bf16 %v6370_v17  ;;  %v6392_v40 = vld [vmem:[#allocation4 + $0x18] sm:$0x88] }
 0x694   :  { %v6368_v47 = vld [vmem:[#allocation4 + $0x40] sm:$0x88]  ;;  %v6374_v28 = vld [vmem:[#allocation4 + $0x70] sm:$0x88] }
 0x695   :  { %3382 = vmatpush1.bf16.msra.mxu0 %v4639_v50  ;;  %3423 = vmatpush1.bf16.msra.mxu1 %v4640_v43  ;;  %v2894_v16 = vunpack.c.l.bf16 %v6368_v47  ;;  %v2906_v41 = vunpack.c.l.bf16 %v6374_v28  ;;  %v3188_v43 = vrot.slane %v6312_v44, 7 }
 0x696   :  { %3383 = vmatprep.subr.bf16.mxu0 %v4641_v45  ;;  %3424 = vmatprep.subr.bf16.mxu1 %v4642_v11 }
 0x699   :  { %3384 = vmatpush1.bf16.msra.mxu0 %v4643_v21  ;;  %3425 = vmatpush1.bf16.msra.mxu1 %v4644_v8  ;;  %v6399_v8 = vld [vmem:[#allocation4 + $0x28] sm:$0x88] }
 0x69a   :  { %3385 = vmatprep.subr.bf16.mxu0 %v4645_v54  ;;  %3426 = vmatprep.subr.bf16.mxu1 %v4646_v48  ;;  %v3189_v54 = vrot.slane %v6317_v14, 7  ;;  %v3190_v48 = vrot.slane %v6320_v22, 7 }
 0x69d   :  { %3386 = vmatpush1.bf16.msra.mxu0 %v4647_v59  ;;  %3427 = vmatpush1.bf16.msra.mxu1 %v4648_v15 }
 0x69e   :  { %3387 = vmatprep.subr.bf16.mxu0 %v4649_v24  ;;  %3428 = vmatprep.subr.bf16.mxu1 %v4650_v62  ;;  %v6403_v24 = vld [vmem:[#allocation4 + $0x38] sm:$0x88]  ;;  %v2904_v62 = vunpack.c.l.bf16 %v6386_v12 }
 0x6a1   :  { %3388 = vmatpush1.bf16.msra.mxu0 %v4651_v26  ;;  %3429 = vmatpush1.bf16.msra.mxu1 %v4652_v30  ;;  %v3191_v26 = vrot.slane %v6323_v29, 7 }
 0x6a2   :  { %3389 = vmatprep.subr.bf16.mxu0 %v4653_v35  ;;  %3430 = vmatprep.subr.bf16.mxu1 %v4654_v53 }
 0x6a5   :  { %3390 = vmatpush1.bf16.msra.mxu0 %v4655_v52  ;;  %3431 = vmatpush1.bf16.msra.mxu1 %v4656_v60  ;;  %v6407_v60 = vld [vmem:[#allocation4 + $0x48] sm:$0x88] }
 0x6a6   :  { %3391 = vmatprep.subr.bf16.mxu0 %v4657_v42  ;;  %3432 = vmatprep.subr.bf16.mxu1 %v4658_v27  ;;  %v2880_v42 = vunpack.c.l.bf16 %v6390_v20  ;;  %v2884_v27 = vunpack.c.l.bf16 %v6392_v40 }
 0x6a9   :  { %3392 = vmatpush1.bf16.msra.mxu0 %v4659_v57  ;;  %3433 = vmatpush1.bf16.msra.mxu1 %v4660_v9  ;;  %v6411_v9 = vld [vmem:[#allocation4 + $0x58] sm:$0x88] }
 0x6aa   :  { %3393 = vmatprep.subr.bf16.mxu0 %v4661_v3  ;;  %3434 = vmatprep.subr.bf16.mxu1 %v4662_v19  ;;  %v2888_v3 = vunpack.c.l.bf16 %v6399_v8 }
 0x6ad   :  { %3394 = vmatpush1.bf16.msra.mxu0 %v4663_v39  ;;  %3435 = vmatpush1.bf16.msra.mxu1 %v4664_v33 }
 0x750   :  { %v2976_v13 = vpop.f32.mrf.mxu0  ;;  %v6381_v56 = vpop.f32.mrf.mxu1 }
 0x751   :  { %v3028_v63 = vrot.slane %v2976_v13, 2  ;;  %v3032_v10 = vrot.slane %v2976_v13, 3  ;;  %v3036_v25 = vrot.slane %v2976_v13, 4  ;;  %v3040_v6 = vrot.slane %v2976_v13, 5 }
 0x752   :  { %v3112_v5 = vadd.f32 %v2976_v13, %v2902_v49  ;;  %v6394_v50 = vpop.f32.mrf.mxu0  ;;  %v6397_v45 = vpop.f32.mrf.mxu1  ;;  %v3044_v11 = vrot.slane %v2976_v13, 6  ;;  %v3048_v59 = vrot.slane %v2976_v13, 7  ;;  %v3052_v53 = vrot.slane %v2976_v13, 1  ;;  %v6417_v13 = vld [vmem:[#allocation4 + $0x78] sm:$0x88] }
 0x753   :  { %v3088_v21 = vadd.f32 %v3028_v63, %v2878_v61  ;;  %v3092_v15 = vadd.f32 %v3032_v10, %v2882_v46  ;;  %v3096_v52 = vadd.f32 %v3036_v25, %v2886_v36  ;;  %v3100_v57 = vadd.f32 %v3040_v6, %v2890_v23 }
 0x754   :  { %v2980_v30 = vpop.f32.mrf.mxu0  ;;  %v3021_v35 = vpop.f32.mrf.mxu1  ;;  %4409 = vtanh.f32 %v3112_v5  ;;  %v3030_v19 = vrot.slane %v6381_v56, 2  ;;  %v3104_v61 = vadd.f32 %v3044_v11, %v2894_v16  ;;  %v2892_v49 = vunpack.c.l.bf16 %v6403_v24 }
 0x755   :  { %4411 = vtanh.f32 %v3088_v21  ;;  %v3034_v46 = vrot.slane %v6381_v56, 3  ;;  %v3108_v36 = vadd.f32 %v3048_v59, %v2898_v31  ;;  %v2896_v23 = vunpack.c.l.bf16 %v6407_v60 }
 0x756   :  { %v2981_v39 = vpop.f32.mrf.mxu0  ;;  %v3022_v33 = vpop.f32.mrf.mxu1  ;;  %4413 = vtanh.f32 %v3092_v15  ;;  %v3038_v63 = vrot.slane %v6381_v56, 4  ;;  %v3116_v10 = vadd.f32 %v3052_v53, %v2906_v41  ;;  %v2900_v25 = vunpack.c.l.bf16 %v6411_v9 }
 0x757   :  { %4415 = vtanh.f32 %v3096_v52  ;;  %v3042_v6 = vrot.slane %v6381_v56, 5  ;;  %v3046_v16 = vrot.slane %v6381_v56, 6  ;;  %v3090_v5 = vadd.f32 %v3030_v19, %v2880_v42 }
 0x758   :  { %4417 = vtanh.f32 %v3100_v57  ;;  %v2903_v11 = vunpack.c.h.bf16 %v6362_v4  ;;  %v2908_v31 = vunpack.c.l.bf16 %v6417_v13  ;;  %v3050_v21 = vrot.slane %v6381_v56, 7 }
 0x759   :  { %4419 = vtanh.f32 %v3104_v61  ;;  %v3094_v59 = vadd.f32 %v3034_v46, %v2884_v27  ;;  %v3098_v15 = vadd.f32 %v3038_v63, %v2888_v3  ;;  %v2879_v41 = vunpack.c.h.bf16 %v6358_v32 }
 0x75a   :  { %4421 = vtanh.f32 %v3108_v36  ;;  %v3029_v30 = vrot.slane %v6394_v50, 2  ;;  %v3102_v35 = vadd.f32 %v3042_v6, %v2892_v49  ;;  %v2883_v53 = vunpack.c.h.bf16 %v6360_v0 }
 0x75b   :  { %4423 = vtanh.f32 %v3116_v10  ;;  %v3033_v52 = vrot.slane %v6394_v50, 3  ;;  %v3106_v42 = vadd.f32 %v3046_v16, %v2896_v23  ;;  %v2887_v4 = vunpack.c.h.bf16 %v6364_v2 }
 0x75c   :  { %4425 = vtanh.f32 %v3090_v5  ;;  %v3037_v57 = vrot.slane %v6394_v50, 4  ;;  %v3110_v19 = vadd.f32 %v3050_v21, %v2900_v25  ;;  %v2891_v27 = vunpack.c.h.bf16 %v6366_v18 }
 0x75d   :  { %4427 = vtanh.f32 %v3094_v59  ;;  %v3041_v32 = vrot.slane %v6394_v50, 5  ;;  %v2895_v3 = vunpack.c.h.bf16 %v6368_v47  ;;  %v3045_v39 = vrot.slane %v6394_v50, 6 }
 0x75e   :  { %4429 = vtanh.f32 %v3098_v15  ;;  %v3089_v0 = vadd.f32 %v3029_v30, %v2879_v41  ;;  %v2899_v33 = vunpack.c.h.bf16 %v6370_v17  ;;  %v3049_v61 = vrot.slane %v6394_v50, 7 }
 0x75f   :  { %4431 = vtanh.f32 %v3102_v35  ;;  %v3093_v2 = vadd.f32 %v3033_v52, %v2883_v53  ;;  %v2907_v49 = vunpack.c.h.bf16 %v6374_v28  ;;  %v3097_v46 = vadd.f32 %v3037_v57, %v2887_v4 }
 0x760   :  { %4433 = vtanh.f32 %v3106_v42  ;;  %v2905_v18 = vunpack.c.h.bf16 %v6386_v12  ;;  %v3053_v23 = vrot.slane %v6394_v50, 1  ;;  %v3101_v47 = vadd.f32 %v3041_v32, %v2891_v27 }
 0x761   :  { %v4410_v36 = vpop.eup %4409  ;;  %4435 = vtanh.f32 %v3110_v19  ;;  %v2881_v63 = vunpack.c.h.bf16 %v6390_v20  ;;  %v3054_v25 = vrot.slane %v6381_v56, 1  ;;  %v3105_v17 = vadd.f32 %v3045_v39, %v2895_v3 }
 0x762   :  { %v4412_v10 = vpop.eup %4411  ;;  %4437 = vtanh.f32 %v3089_v0  ;;  %v2885_v6 = vunpack.c.h.bf16 %v6392_v40  ;;  %v3109_v5 = vadd.f32 %v3049_v61, %v2899_v33  ;;  %v2889_v28 = vunpack.c.h.bf16 %v6399_v8 }
 0x763   :  { %v4414_v16 = vpop.eup %4413  ;;  %4439 = vtanh.f32 %v3093_v2  ;;  %v2893_v21 = vunpack.c.h.bf16 %v6403_v24  ;;  %v3113_v15 = vadd.f32 %v6394_v50, %v2903_v11  ;;  %v2897_v20 = vunpack.c.h.bf16 %v6407_v60 }
 0x764   :  { %v4416_v59 = vpop.eup %4415  ;;  %4441 = vtanh.f32 %v3097_v46  ;;  %v2901_v41 = vunpack.c.h.bf16 %v6411_v9  ;;  %v3114_v40 = vadd.f32 %v6381_v56, %v2904_v62  ;;  %v3117_v35 = vadd.f32 %v3053_v23, %v2907_v49 }
 0x765   :  { %v4418_v30 = vpop.eup %4417  ;;  %4443 = vtanh.f32 %v3101_v47  ;;  %v2909_v53 = vunpack.c.h.bf16 %v6417_v13  ;;  %v3118_v52 = vadd.f32 %v3054_v25, %v2908_v31  ;;  %v3031_v24 = vrot.slane %v6397_v45, 2 }
 0x766   :  { %v4420_v8 = vpop.eup %4419  ;;  %4445 = vtanh.f32 %v3105_v17  ;;  %v3035_v50 = vrot.slane %v6397_v45, 3  ;;  %v3128_v60 = vmul.f32 0.5, %v4412_v10  ;;  %v3039_v9 = vrot.slane %v6397_v45, 4 }
 0x767   :  { %v4422_v11 = vpop.eup %4421  ;;  %4447 = vtanh.f32 %v3109_v5  ;;  %v3043_v42 = vrot.slane %v6397_v45, 5  ;;  %v3129_v56 = vmul.f32 0.5, %v4414_v16  ;;  %v3047_v62 = vrot.slane %v6397_v45, 6 }
 0x768   :  { %v4424_v4 = vpop.eup %4423  ;;  %4449 = vtanh.f32 %v3113_v15  ;;  %v3051_v13 = vrot.slane %v6397_v45, 7  ;;  %v3130_v57 = vmul.f32 0.5, %v4416_v59  ;;  %v3131_v19 = vmul.f32 0.5, %v4418_v30 }
 0x769   :  { %v4426_v31 = vpop.eup %4425  ;;  %4451 = vtanh.f32 %v3117_v35  ;;  %v3055_v27 = vrot.slane %v6397_v45, 1  ;;  %v3132_v3 = vmul.f32 0.5, %v4420_v8  ;;  %v3134_v39 = vmul.f32 0.5, %v4410_v36 }
 0x76a   :  { %v4428_v32 = vpop.eup %4427  ;;  %v3091_v0 = vadd.f32 %v3031_v24, %v2881_v63  ;;  %v3095_v33 = vadd.f32 %v3035_v50, %v2885_v6  ;;  %v3133_v2 = vmul.f32 0.5, %v4422_v11  ;;  %v3136_v49 = vadd.f32 0.5, %v3128_v60 }
 0x76b   :  { %v4430_v61 = vpop.eup %4429  ;;  %4453 = vtanh.f32 %v3114_v40  ;;  %v3099_v46 = vadd.f32 %v3039_v9, %v2889_v28  ;;  %v3135_v47 = vmul.f32 0.5, %v4424_v4  ;;  %v3137_v10 = vadd.f32 0.5, %v3129_v56 }
 0x76c   :  { %v4432_v23 = vpop.eup %4431  ;;  %4455 = vtanh.f32 %v3118_v52  ;;  %v3103_v25 = vadd.f32 %v3043_v42, %v2893_v21  ;;  %v3138_v16 = vadd.f32 0.5, %v3130_v57  ;;  %v3139_v5 = vadd.f32 0.5, %v3131_v19 }
 0x76d   :  { %v4434_v17 = vpop.eup %4433  ;;  %v3107_v59 = vadd.f32 %v3047_v62, %v2897_v20  ;;  %v3111_v15 = vadd.f32 %v3051_v13, %v2901_v41  ;;  %v3140_v35 = vadd.f32 0.5, %v3132_v3  ;;  %v3142_v36 = vadd.f32 0.5, %v3134_v39 }
 0x76e   :  { %v4436_v30 = vpop.eup %4435  ;;  %v3115_v63 = vadd.f32 %v6397_v45, %v2905_v18  ;;  %4457 = vtanh.f32 %v3091_v0  ;;  %v3141_v28 = vadd.f32 0.5, %v3133_v2  ;;  %v3208_v40 = vmul.f32 %v4426_v31, %v3136_v49 }
 0x76f   :  { %v4438_v6 = vpop.eup %4437  ;;  %4459 = vtanh.f32 %v3095_v33  ;;  %v3119_v8 = vadd.f32 %v3055_v27, %v2909_v53  ;;  %v3143_v21 = vadd.f32 0.5, %v3135_v47  ;;  %v3209_v50 = vmul.f32 %v4428_v32, %v3137_v10 }
 0x770   :  { %v4440_v52 = vpop.eup %4439  ;;  %v3152_v24 = vmul.f32 0.5, %v4438_v6  ;;  %4461 = vtanh.f32 %v3099_v46  ;;  %v3210_v11 = vmul.f32 %v4430_v61, %v3138_v16  ;;  %v3211_v60 = vmul.f32 %v4432_v23, %v3139_v5 }
 0x771   :  { %v4442_v20 = vpop.eup %4441  ;;  %v3153_v41 = vmul.f32 0.5, %v4440_v52  ;;  %4463 = vtanh.f32 %v3103_v25  ;;  %v3212_v45 = vmul.f32 %v4434_v17, %v3140_v35  ;;  %v3213_v62 = vmul.f32 %v4436_v30, %v3141_v28 }
 0x772   :  { %v4444_v9 = vpop.eup %4443  ;;  %v3154_v12 = vmul.f32 0.5, %v4442_v20  ;;  %v3160_v42 = vadd.f32 0.5, %v3152_v24  ;;  %4465 = vtanh.f32 %v3107_v59 }
 0x773   :  { %v4446_v18 = vpop.eup %4445  ;;  %v3155_v4 = vmul.f32 0.5, %v4444_v9  ;;  %v3161_v56 = vadd.f32 0.5, %v3153_v41  ;;  %4467 = vtanh.f32 %v3111_v15 }
 0x774   :  { %v4448_v53 = vpop.eup %4447  ;;  %v3156_v13 = vmul.f32 0.5, %v4446_v18  ;;  %v3162_v31 = vadd.f32 0.5, %v3154_v12  ;;  %v3200_v57 = vmul.f32 %v3184_v37, %v3160_v42  ;;  %4469 = vtanh.f32 %v3115_v63  ;;  %v3275_v42 = vld [vmem:[#allocation10] sm:$0x8] }
 0x775   :  { %v4450_v19 = vpop.eup %4449  ;;  %v3157_v27 = vmul.f32 0.5, %v4448_v53  ;;  %v3163_v32 = vadd.f32 0.5, %v3155_v4  ;;  %v3201_v3 = vmul.f32 %v3185_v51, %v3161_v56  ;;  %4471 = vtanh.f32 %v3119_v8  ;;  %v3278_v53 = vld [vmem:[#allocation10 + $0x4] sm:$0x8] }
 0x776   :  { %v4452_v39 = vpop.eup %4451  ;;  %v3158_v0 = vmul.f32 0.5, %v4450_v19  ;;  %v3164_v33 = vadd.f32 0.5, %v3156_v13  ;;  %v3202_v61 = vmul.f32 %v3186_v7, %v3162_v31  ;;  %v6470_v2 = vadd.f32 %v3208_v40, %v3200_v57 }
 0x777   :  { %v3159_v49 = vmul.f32 0.5, %v4452_v39  ;;  %v3165_v46 = vadd.f32 0.5, %v3157_v27  ;;  %v3203_v38 = vmul.f32 %v3187_v34, %v3163_v32  ;;  %v6474_v37 = vadd.f32 %v3209_v50, %v3201_v3  ;;  %v3281_v3 = vld [vmem:[#allocation10 + $0x8] sm:$0x8]  ;;  %v6543_v32 = vld [vmem:[#allocation4 + $0x40] sm:$0x88] }
 0x778   :  { %v4454_v23 = vpop.eup %4453  ;;  %v3166_v47 = vadd.f32 0.5, %v3158_v0  ;;  %v3204_v55 = vmul.f32 %v3188_v43, %v3164_v33  ;;  %v6478_v51 = vadd.f32 %v3210_v11, %v3202_v61  ;;  %4473 = vtanh.f32 %v6470_v2  ;;  %v3284_v61 = vld [vmem:[#allocation10 + $0xc] sm:$0x8] }
 0x779   :  { %v4456_v58 = vpop.eup %4455  ;;  %v3167_v7 = vadd.f32 0.5, %v3159_v49  ;;  %v3205_v10 = vmul.f32 %v3189_v54, %v3165_v46  ;;  %v6483_v25 = vadd.f32 %v3211_v60, %v3203_v38  ;;  %4475 = vtanh.f32 %v6474_v37 }
 0x77a   :  { %v3206_v1 = vmul.f32 %v3190_v48, %v3166_v47  ;;  %v3214_v34 = vmul.f32 %v4454_v23, %v3142_v36  ;;  %v6488_v17 = vadd.f32 %v3212_v45, %v3204_v55  ;;  %4477 = vtanh.f32 %v6478_v51 }
 0x77b   :  { %v4458_v44 = vpop.eup %4457  ;;  %v3207_v43 = vmul.f32 %v3191_v26, %v3167_v7  ;;  %v3215_v16 = vmul.f32 %v4456_v58, %v3143_v21  ;;  %v6493_v5 = vadd.f32 %v3213_v62, %v3205_v10  ;;  %4479 = vtanh.f32 %v6483_v25  ;;  %v3287_v58 = vld [vmem:[#allocation10 + $0x10] sm:$0x8] }
 0x77c   :  { %v4460_v14 = vpop.eup %4459  ;;  %v6496_v54 = vadd.f32 %v3214_v34, %v3206_v1  ;;  %4481 = vtanh.f32 %v6488_v17  ;;  %v3232_v15 = vmul.f32 0.5, %v4458_v44 }
 0x77d   :  { %v4462_v22 = vpop.eup %4461  ;;  %v6499_v48 = vadd.f32 %v3215_v16, %v3207_v43  ;;  %4483 = vtanh.f32 %v6493_v5  ;;  %v3233_v35 = vmul.f32 0.5, %v4460_v14  ;;  %v3290_v43 = vld [vmem:[#allocation10 + $0x14] sm:$0x8] }
 0x77e   :  { %v4464_v59 = vpop.eup %4463  ;;  %4485 = vtanh.f32 %v6496_v54  ;;  %v3234_v63 = vmul.f32 0.5, %v4462_v22  ;;  %v3240_v28 = vadd.f32 0.5, %v3232_v15 }
 0x77f   :  { %v4466_v29 = vpop.eup %4465  ;;  %4487 = vtanh.f32 %v6499_v48  ;;  %v3235_v6 = vmul.f32 0.5, %v4464_v59  ;;  %v3241_v21 = vadd.f32 0.5, %v3233_v35  ;;  %v3296_v35 = vld [vmem:[#allocation10 + $0x1c] sm:$0x8] }
 0x780   :  { %v4468_v26 = vpop.eup %4467  ;;  %v3236_v40 = vmul.f32 0.5, %v4466_v29  ;;  %v3242_v41 = vadd.f32 0.5, %v3234_v63  ;;  %v3293_v29 = vld [vmem:[#allocation10 + $0x18] sm:$0x8] }
 0x781   :  { %v4470_v30 = vpop.eup %4469  ;;  %v3237_v8 = vmul.f32 0.5, %v4468_v26  ;;  %v3243_v12 = vadd.f32 0.5, %v3235_v6 }
 0x782   :  { %v4472_v36 = vpop.eup %4471  ;;  %v3238_v24 = vmul.f32 0.5, %v4470_v30  ;;  %v3244_v18 = vadd.f32 0.5, %v3236_v40 }
 0x783   :  { %v3239_v50 = vmul.f32 0.5, %v4472_v36  ;;  %v3245_v4 = vadd.f32 0.5, %v3237_v8 }
 0x784   :  { %v3246_v31 = vadd.f32 0.5, %v3238_v24 }
 0x785   :  { %v4474_v52 = vpop.eup %4473  ;;  %v3247_v57 = vadd.f32 0.5, %v3239_v50 }
 0x786   :  { %v4476_v20 = vpop.eup %4475  ;;  %v3256_v11 = vmul.f32 %v4474_v52, %v3240_v28 }
 0x787   :  { %v4478_v60 = vpop.eup %4477  ;;  %v3257_v9 = vmul.f32 %v4476_v20, %v3241_v21 }
 0x788   :  { %v4480_v45 = vpop.eup %4479  ;;  %v3258_v56 = vmul.f32 %v4478_v60, %v3242_v41  ;;  %v3264_v62 = vpack.c.bf16 %v3256_v11, %v3256_v11 }
 0x789   :  { %v4482_v13 = vpop.eup %4481  ;;  %v3259_v19 = vmul.f32 %v4480_v45, %v3243_v12  ;;  %v3265_v27 = vpack.c.bf16 %v3257_v9, %v3257_v9 }
 0x78a   :  { %v4484_v39 = vpop.eup %4483  ;;  %v3260_v0 = vmul.f32 %v4482_v13, %v3244_v18  ;;  %v3266_v33 = vpack.c.bf16 %v3258_v56, %v3258_v56  ;;  %v3355_v49 = vunpack.c.l.b16 %v3264_v62  ;;  %v3276_v46 = vsel %vm6506_vm12, %v3264_v62, %v3275_v42  ;;  %v6533_v13 = vld [vmem:[#allocation4] sm:$0x88] }
 0x78b   :  { %v4486_v38 = vpop.eup %4485  ;;  %v3261_v23 = vmul.f32 %v4484_v39, %v3245_v4  ;;  %v3267_v47 = vpack.c.bf16 %v3259_v19, %v3259_v19  ;;  %v3279_v55 = vsel %vm6506_vm12, %v3265_v27, %v3278_v53  ;;  %v3356_v7 = vunpack.c.l.b16 %v3265_v27  ;;  %3277 = vst [vmem:[#allocation10] sm:$0x8] %v3276_v46  ;;  %v6539_v19 = vld [vmem:[#allocation4 + $0x20] sm:$0x88]  ;;  %v6541_v27 = vld [vmem:[#allocation4 + $0x30] sm:$0x88] }
 0x78c   :  { %v4488_v10 = vpop.eup %4487  ;;  %v3262_v1 = vmul.f32 %v4486_v38, %v3246_v31  ;;  %v3268_v34 = vpack.c.bf16 %v3260_v0, %v3260_v0  ;;  %3280 = vst [vmem:[#allocation10 + $0x4] sm:$0x8] %v3279_v55  ;;  %v3282_v44 = vsel %vm6506_vm12, %v3266_v33, %v3281_v3  ;;  %v3357_v16 = vunpack.c.l.b16 %v3266_v33  ;;  %v6535_v31 = vld [vmem:[#allocation4 + $0x10] sm:$0x88]  ;;  %v6549_v33 = vld [vmem:[#allocation4 + $0x60] sm:$0x88] }
 0x78d   :  { %v3263_v14 = vmul.f32 %v4488_v10, %v3247_v57  ;;  %v3269_v22 = vpack.c.bf16 %v3261_v23, %v3261_v23  ;;  %3283 = vst [vmem:[#allocation10 + $0x8] sm:$0x8] %v3282_v44  ;;  %v3285_v59 = vsel %vm6506_vm12, %v3267_v47, %v3284_v61  ;;  %v3358_v26 = vunpack.c.l.b16 %v3267_v47  ;;  %v6537_v57 = vld [vmem:[#allocation4 + $0x70] sm:$0x88] }
 0x78e   :  { %v3270_v15 = vpack.c.bf16 %v3262_v1, %v3262_v1  ;;  %3286 = vst [vmem:[#allocation10 + $0xc] sm:$0x8] %v3285_v59  ;;  %v3288_v30 = vsel %vm6506_vm12, %v3268_v34, %v3287_v58  ;;  %v3359_v36 = vunpack.c.l.b16 %v3268_v34  ;;  %v3363_v63 = vrot.slane %v3355_v49, 6  ;;  %v6545_v3 = vld [vmem:[#allocation4 + $0x50] sm:$0x88] }
 0x78f   :  { %v3271_v6 = vpack.c.bf16 %v3263_v14, %v3263_v14  ;;  %3289 = vst [vmem:[#allocation10 + $0x10] sm:$0x8] %v3288_v30  ;;  %v3291_v28 = vsel %vm6506_vm12, %v3269_v22, %v3290_v43  ;;  %v3360_v40 = vunpack.c.l.b16 %v3269_v22  ;;  %v3364_v8 = vrot.slane %v3356_v7, 5  ;;  %v6561_v43 = vld [vmem:[#allocation4 + $0x78] sm:$0x88] }
 0x790   :  { %3292 = vst [vmem:[#allocation10 + $0x14] sm:$0x8] %v3291_v28  ;;  %v3294_v52 = vsel %vm6506_vm12, %v3270_v15, %v3293_v29  ;;  %v3366_v21 = vrot.slane %v3357_v16, 4  ;;  %v3368_v41 = vrot.slane %v3358_v26, 3  ;;  %v3370_v60 = vrot.slane %v3359_v36, 2 }
 0x791   :  { %3295 = vst [vmem:[#allocation10 + $0x18] sm:$0x8] %v3294_v52  ;;  %v3297_v24 = vsel %vm6506_vm12, %v3271_v6, %v3296_v35  ;;  %v3362_v50 = vunpack.c.l.b16 %v3271_v6  ;;  %v3365_v20 = vsel %vm738_vm2, %v3364_v8, %v3363_v63  ;;  %v3372_v12 = vrot.slane %v3360_v40, 1  ;;  %v6565_v29 = vld [vmem:[#allocation4 + $0x18] sm:$0x88] }
 0x792   :  { %3298 = vst [vmem:[#allocation10 + $0x1c] sm:$0x8] %v3297_v24  ;;  %v3367_v11 = vsel %vm741_vm4, %v3366_v21, %v3365_v20  ;;  %v3361_v42 = vunpack.c.l.b16 %v3270_v15  ;;  %v3315_v39 = vunpack.c.l.bf16 %v6533_v13  ;;  %v3343_v0 = vunpack.c.l.bf16 %v6537_v57  ;;  %v6567_v26 = vld [vmem:[#allocation4 + $0x28] sm:$0x88]  ;;  %v6574_v6 = vld [vmem:[#allocation4 + $0x38] sm:$0x88] }
 0x793   :  { %v3369_v9 = vsel %vm744_vm5, %v3368_v41, %v3367_v11  ;;  %v3375_v4 = vrot.slane %v3362_v50, 7  ;;  %v3319_v61 = vunpack.c.l.bf16 %v6535_v31  ;;  %v3323_v49 = vunpack.c.l.bf16 %v6539_v19  ;;  %v6578_v21 = vld [vmem:[#allocation4 + $0x48] sm:$0x88] }
 0x794   :  { %v3371_v45 = vsel %vm747_vm6, %v3370_v60, %v3369_v9  ;;  %v3327_v46 = vunpack.c.l.bf16 %v6541_v27  ;;  %v3331_v38 = vunpack.c.l.bf16 %v6543_v32  ;;  %v3335_v23 = vunpack.c.l.bf16 %v6545_v3  ;;  %v6582_v9 = vld [vmem:[#allocation4 + $0x58] sm:$0x88] }
 0x795   :  { %v3373_v18 = vsel %vm750_vm7, %v3372_v12, %v3371_v45  ;;  %v3622_v58 = vrot.slane %v6474_v37, 7  ;;  %v3623_v7 = vrot.slane %v6478_v51, 7  ;;  %v3624_v10 = vrot.slane %v6483_v25, 7 }
 0x796   :  { %v3374_v56 = vsel %vm753_vm8, %v3361_v42, %v3373_v18  ;;  %v3625_v16 = vrot.slane %v6488_v17, 7  ;;  %v3339_v14 = vunpack.c.l.bf16 %v6549_v33  ;;  %v3626_v30 = vrot.slane %v6493_v5, 7  ;;  %v6586_v18 = vld [vmem:[#allocation4 + $0x68] sm:$0x88] }
 0x797   :  { %v3376_v62 = vsel %vm756_vm9, %v3375_v4, %v3374_v56  ;;  %v3627_v28 = vrot.slane %v6496_v54, 7  ;;  %v3628_v40 = vrot.slane %v6499_v48, 7  ;;  %v3345_v24 = vunpack.c.l.bf16 %v6561_v43 }
 0x798   :  { %v3377_v53 = vpack.c.b16 %v3376_v62, %v3376_v62  ;;  %v3621_v41 = vrot.slane %v6470_v2, 7  ;;  %v3321_v12 = vunpack.c.l.bf16 %v6565_v29  ;;  %v3325_v42 = vunpack.c.l.bf16 %v6567_v26 }
 0x799   :  { %v3329_v4 = vunpack.c.l.bf16 %v6574_v6  ;;  %vm3709_vm9 = vsmask.f32 7950 }
 0x79a   :  { %3412 = vmatmul.mubr.bf16.vlgmr.msra.gmra.mxu0 %v3377_v53  ;;  %3453 = vmatmul.mubr.bf16.vlgmr.msra.gmra.mxu1 %v3377_v53  ;;  %vm6667_vm13 = vmand %vm744_vm5, %vm3709_vm9 }
 0x85a   :  { %v3413_v47 = vpop.f32.mrf.mxu0  ;;  %v6556_v55 = vpop.f32.mrf.mxu1 }
 0x85b   :  { %v3465_v1 = vrot.slane %v3413_v47, 1  ;;  %v3469_v34 = vrot.slane %v3413_v47, 2  ;;  %v3473_v44 = vrot.slane %v3413_v47, 3  ;;  %v3477_v22 = vrot.slane %v3413_v47, 4 }
 0x85c   :  { %v3553_v59 = vadd.f32 %v3413_v47, %v3343_v0  ;;  %v6569_v15 = vpop.f32.mrf.mxu0  ;;  %v6572_v35 = vpop.f32.mrf.mxu1  ;;  %v3481_v36 = vrot.slane %v3413_v47, 5  ;;  %v3485_v8 = vrot.slane %v3413_v47, 6  ;;  %v3489_v11 = vrot.slane %v3413_v47, 7 }
 0x85d   :  { %v3525_v63 = vadd.f32 %v3465_v1, %v3315_v39  ;;  %v3529_v52 = vadd.f32 %v3469_v34, %v3319_v61  ;;  %v3533_v60 = vadd.f32 %v3473_v44, %v3323_v49  ;;  %v3537_v45 = vadd.f32 %v3477_v22, %v3327_v46 }
 0x85e   :  { %v3417_v50 = vpop.f32.mrf.mxu0  ;;  %v3458_v20 = vpop.f32.mrf.mxu1  ;;  %4489 = vtanh.f32 %v3553_v59  ;;  %v3471_v56 = vrot.slane %v6556_v55, 2  ;;  %v3541_v39 = vadd.f32 %v3481_v36, %v3331_v38  ;;  %v3333_v0 = vunpack.c.l.bf16 %v6578_v21 }
 0x85f   :  { %4491 = vtanh.f32 %v3525_v63  ;;  %v3475_v61 = vrot.slane %v6556_v55, 3  ;;  %v3545_v49 = vadd.f32 %v3485_v8, %v3335_v23  ;;  %v3337_v47 = vunpack.c.l.bf16 %v6582_v9 }
 0x860   :  { %v3418_v62 = vpop.f32.mrf.mxu0  ;;  %v3459_v53 = vpop.f32.mrf.mxu1  ;;  %4493 = vtanh.f32 %v3529_v52  ;;  %v3479_v46 = vrot.slane %v6556_v55, 4  ;;  %v3549_v1 = vadd.f32 %v3489_v11, %v3339_v14  ;;  %v3341_v34 = vunpack.c.l.bf16 %v6586_v18 }
 0x861   :  { %4495 = vtanh.f32 %v3533_v60  ;;  %v3483_v44 = vrot.slane %v6556_v55, 5  ;;  %v3487_v38 = vrot.slane %v6556_v55, 6  ;;  %v3531_v22 = vadd.f32 %v3471_v56, %v3321_v12 }
 0x862   :  { %4497 = vtanh.f32 %v3537_v45  ;;  %v3344_v59 = vunpack.c.h.bf16 %v6537_v57  ;;  %v3535_v36 = vadd.f32 %v3475_v61, %v3325_v42  ;;  %v3316_v23 = vunpack.c.h.bf16 %v6533_v13 }
 0x863   :  { %4499 = vtanh.f32 %v3541_v39  ;;  %v3466_v63 = vrot.slane %v6569_v15, 1  ;;  %v3539_v8 = vadd.f32 %v3479_v46, %v3329_v4  ;;  %v3320_v14 = vunpack.c.h.bf16 %v6535_v31 }
 0x864   :  { %4501 = vtanh.f32 %v3545_v49  ;;  %v3470_v52 = vrot.slane %v6569_v15, 2  ;;  %v3543_v50 = vadd.f32 %v3483_v44, %v3333_v0  ;;  %v3324_v20 = vunpack.c.h.bf16 %v6539_v19  ;;  %v6614_v0 = vld [vmem:[#allocation4 + $0x8] sm:$0x88] }
 0x865   :  { %4503 = vtanh.f32 %v3549_v1  ;;  %v3474_v11 = vrot.slane %v6569_v15, 3  ;;  %v3547_v60 = vadd.f32 %v3487_v38, %v3337_v47  ;;  %v3328_v57 = vunpack.c.h.bf16 %v6541_v27 }
 0x866   :  { %4505 = vtanh.f32 %v3531_v22  ;;  %v3478_v13 = vrot.slane %v6569_v15, 4  ;;  %v3332_v12 = vunpack.c.h.bf16 %v6543_v32  ;;  %v3482_v42 = vrot.slane %v6569_v15, 5 }
 0x867   :  { %4507 = vtanh.f32 %v3535_v36  ;;  %v3526_v31 = vadd.f32 %v3466_v63, %v3316_v23  ;;  %v3336_v45 = vunpack.c.h.bf16 %v6545_v3  ;;  %v3486_v4 = vrot.slane %v6569_v15, 6 }
 0x868   :  { %4509 = vtanh.f32 %v3539_v8  ;;  %v3530_v19 = vadd.f32 %v3470_v52, %v3320_v14  ;;  %v3340_v56 = vunpack.c.h.bf16 %v6549_v33  ;;  %v3490_v62 = vrot.slane %v6569_v15, 7 }
 0x869   :  { %4511 = vtanh.f32 %v3543_v50  ;;  %v3534_v27 = vadd.f32 %v3474_v11, %v3324_v20  ;;  %v3538_v53 = vadd.f32 %v3478_v13, %v3328_v57  ;;  %v3322_v39 = vunpack.c.h.bf16 %v6565_v29 }
 0x86a   :  { %4513 = vtanh.f32 %v3547_v60  ;;  %v3326_v32 = vunpack.c.h.bf16 %v6567_v26  ;;  %v3491_v3 = vrot.slane %v6556_v55, 7  ;;  %v3542_v49 = vadd.f32 %v3482_v42, %v3332_v12 }
 0x86b   :  { %v4490_v61 = vpop.eup %4489  ;;  %4515 = vtanh.f32 %v3526_v31  ;;  %v3330_v47 = vunpack.c.h.bf16 %v6574_v6  ;;  %v3546_v33 = vadd.f32 %v3486_v4, %v3336_v45  ;;  %v3334_v1 = vunpack.c.h.bf16 %v6578_v21 }
 0x86c   :  { %v4492_v46 = vpop.eup %4491  ;;  %4517 = vtanh.f32 %v3530_v19  ;;  %v3338_v44 = vunpack.c.h.bf16 %v6582_v9  ;;  %v3550_v29 = vadd.f32 %v3490_v62, %v3340_v56  ;;  %v3317_v26 = vunpack.c.l.bf16 %v6614_v0 }
 0x86d   :  { %v4494_v38 = vpop.eup %4493  ;;  %4519 = vtanh.f32 %v3534_v27  ;;  %v3346_v22 = vunpack.c.h.bf16 %v6561_v43  ;;  %v3554_v23 = vadd.f32 %v6569_v15, %v3344_v59  ;;  %v3472_v6 = vrot.slane %v6572_v35, 2 }
 0x86e   :  { %v4496_v36 = vpop.eup %4495  ;;  %4521 = vtanh.f32 %v3538_v53  ;;  %v3318_v63 = vunpack.c.h.bf16 %v6614_v0  ;;  %v3551_v14 = vadd.f32 %v3491_v3, %v3341_v34  ;;  %v3476_v21 = vrot.slane %v6572_v35, 3 }
 0x86f   :  { %v4498_v8 = vpop.eup %4497  ;;  %4523 = vtanh.f32 %v3542_v49  ;;  %v3342_v9 = vunpack.c.h.bf16 %v6586_v18  ;;  %v3467_v50 = vrot.slane %v6556_v55, 1  ;;  %v3555_v20 = vadd.f32 %v6556_v55, %v3345_v24 }
 0x870   :  { %v4500_v52 = vpop.eup %4499  ;;  %4525 = vtanh.f32 %v3546_v33  ;;  %v3480_v15 = vrot.slane %v6572_v35, 4  ;;  %v3566_v11 = vmul.f32 0.5, %v4494_v38  ;;  %v3484_v34 = vrot.slane %v6572_v35, 5 }
 0x871   :  { %v4502_v59 = vpop.eup %4501  ;;  %4527 = vtanh.f32 %v3550_v29  ;;  %v3488_v60 = vrot.slane %v6572_v35, 6  ;;  %v3567_v13 = vmul.f32 0.5, %v4496_v36  ;;  %v3492_v18 = vrot.slane %v6572_v35, 7 }
 0x872   :  { %v4504_v57 = vpop.eup %4503  ;;  %4529 = vtanh.f32 %v3554_v23  ;;  %v3532_v12 = vadd.f32 %v3472_v6, %v3322_v39  ;;  %v3568_v43 = vmul.f32 0.5, %v4498_v8  ;;  %v3572_v31 = vmul.f32 0.5, %v4490_v61 }
 0x873   :  { %v4506_v42 = vpop.eup %4505  ;;  %4531 = vtanh.f32 %v3551_v14  ;;  %v3536_v55 = vadd.f32 %v3476_v21, %v3326_v32  ;;  %v3565_v45 = vmul.f32 0.5, %v4492_v46  ;;  %v3569_v4 = vmul.f32 0.5, %v4500_v52 }
 0x874   :  { %v4508_v24 = vpop.eup %4507  ;;  %v3468_v19 = vrot.slane %v6572_v35, 1  ;;  %v3527_v56 = vadd.f32 %v3467_v50, %v3317_v26  ;;  %v3570_v27 = vmul.f32 0.5, %v4502_v59  ;;  %v3574_v53 = vadd.f32 0.5, %v3566_v11 }
 0x875   :  { %v4510_v62 = vpop.eup %4509  ;;  %v3540_v0 = vadd.f32 %v3480_v15, %v3330_v47  ;;  %v3544_v3 = vadd.f32 %v3484_v34, %v3334_v1  ;;  %v3571_v33 = vmul.f32 0.5, %v4504_v57  ;;  %v3575_v38 = vadd.f32 0.5, %v3567_v13 }
 0x876   :  { %v4512_v49 = vpop.eup %4511  ;;  %4533 = vtanh.f32 %v3555_v20  ;;  %v3548_v39 = vadd.f32 %v3488_v60, %v3338_v44  ;;  %v3576_v61 = vadd.f32 0.5, %v3568_v43  ;;  %v6636_v36 = vadd.f32 0.5, %v3572_v31 }
 0x877   :  { %v4514_v29 = vpop.eup %4513  ;;  %4535 = vtanh.f32 %v3532_v12  ;;  %v3552_v32 = vadd.f32 %v3492_v18, %v3342_v9  ;;  %v6638_v23 = vadd.f32 0.5, %v3565_v45  ;;  %v3577_v26 = vadd.f32 0.5, %v3569_v4 }
 0x878   :  { %v4516_v46 = vpop.eup %4515  ;;  %v3528_v6 = vadd.f32 %v3468_v19, %v3318_v63  ;;  %4537 = vtanh.f32 %v3527_v56  ;;  %v3578_v47 = vadd.f32 0.5, %v3570_v27  ;;  %v3646_v1 = vmul.f32 %v4506_v42, %v3574_v53 }
 0x879   :  { %v4518_v8 = vpop.eup %4517  ;;  %4539 = vtanh.f32 %v3536_v55  ;;  %v3556_v14 = vadd.f32 %v6572_v35, %v3346_v22  ;;  %v3579_v44 = vadd.f32 0.5, %v3571_v33  ;;  %v3647_v50 = vmul.f32 %v4508_v24, %v3575_v38 }
 0x87a   :  { %v4520_v21 = vpop.eup %4519  ;;  %v3590_v52 = vmul.f32 0.5, %v4518_v8  ;;  %4541 = vtanh.f32 %v3540_v0  ;;  %v3589_v15 = vmul.f32 0.5, %v4516_v46  ;;  %v3648_v59 = vmul.f32 %v4510_v62, %v3576_v61 }
 0x87b   :  { %v4522_v20 = vpop.eup %4521  ;;  %v3591_v9 = vmul.f32 0.5, %v4520_v21  ;;  %4543 = vtanh.f32 %v3544_v3  ;;  %v3649_v60 = vmul.f32 %v4512_v49, %v3577_v26  ;;  %v3650_v12 = vmul.f32 %v4514_v29, %v3578_v47 }
 0x87c   :  { %v4524_v11 = vpop.eup %4523  ;;  %v3592_v34 = vmul.f32 0.5, %v4522_v20  ;;  %v3598_v63 = vadd.f32 0.5, %v3590_v52  ;;  %4545 = vtanh.f32 %v3548_v39  ;;  %v3597_v24 = vadd.f32 0.5, %v3589_v15 }
 0x87d   :  { %v4526_v57 = vpop.eup %4525  ;;  %v3593_v13 = vmul.f32 0.5, %v4524_v11  ;;  %v3599_v18 = vadd.f32 0.5, %v3591_v9  ;;  %4547 = vtanh.f32 %v3528_v6 }
 0x87e   :  { %v4528_v35 = vpop.eup %4527  ;;  %v3594_v22 = vmul.f32 0.5, %v4526_v57  ;;  %v3600_v42 = vadd.f32 0.5, %v3592_v34  ;;  %v3638_v43 = vmul.f32 %v3622_v58, %v3598_v63  ;;  %4549 = vtanh.f32 %v3552_v32 }
 0x87f   :  { %v4530_v31 = vpop.eup %4529  ;;  %v3595_v55 = vmul.f32 0.5, %v4528_v35  ;;  %v3601_v45 = vadd.f32 0.5, %v3593_v13  ;;  %v3639_v4 = vmul.f32 %v3623_v7, %v3599_v18  ;;  %4551 = vtanh.f32 %v3556_v14 }
 0x880   :  { %v4532_v19 = vpop.eup %4531  ;;  %v3596_v56 = vmul.f32 0.5, %v4530_v31  ;;  %v3602_v62 = vadd.f32 0.5, %v3594_v22  ;;  %v3640_v27 = vmul.f32 %v3624_v10, %v3600_v42  ;;  %v3654_v53 = vadd.f32 %v3646_v1, %v3638_v43 }
 0x881   :  { %v3603_v0 = vadd.f32 0.5, %v3595_v55  ;;  %v3641_v37 = vmul.f32 %v3625_v16, %v3601_v45  ;;  %v3655_v58 = vadd.f32 %v3647_v50, %v3639_v4  ;;  %v3651_v38 = vmul.f32 %v4532_v19, %v3579_v44 }
 0x882   :  { %v3604_v3 = vadd.f32 0.5, %v3596_v56  ;;  %v3642_v49 = vmul.f32 %v3626_v30, %v3602_v62  ;;  %v3656_v33 = vadd.f32 %v3648_v59, %v3640_v27  ;;  %4553 = vtanh.f32 %v3654_v53 }
 0x883   :  { %v4534_v51 = vpop.eup %4533  ;;  %v3643_v7 = vmul.f32 %v3627_v28, %v3603_v0  ;;  %v3657_v25 = vadd.f32 %v3649_v60, %v3641_v37  ;;  %4555 = vtanh.f32 %v3655_v58  ;;  %v3637_v39 = vmul.f32 %v3621_v41, %v3597_v24  ;;  %v3714_v37 = vld [vmem:[#allocation10 + $0x4] sm:$0x8] }
 0x884   :  { %v4536_v10 = vpop.eup %4535  ;;  %v3644_v17 = vmul.f32 %v3628_v40, %v3604_v3  ;;  %v3658_v16 = vadd.f32 %v3650_v12, %v3642_v49  ;;  %4557 = vtanh.f32 %v3656_v33  ;;  %v3652_v29 = vmul.f32 %v4534_v51, %v6636_v36  ;;  %v3717_v51 = vld [vmem:[#allocation10 + $0x8] sm:$0x8] }
 0x885   :  { %v4538_v5 = vpop.eup %4537  ;;  %v3659_v30 = vadd.f32 %v3651_v38, %v3643_v7  ;;  %4559 = vtanh.f32 %v3657_v25  ;;  %v3768_v48 = vrot.slane %v3654_v53, 7  ;;  %v3769_v6 = vrot.slane %v3655_v58, 6 }
 0x886   :  { %v4540_v61 = vpop.eup %4539  ;;  %v3645_v54 = vmul.f32 %v4538_v5, %v6638_v23  ;;  %v3660_v32 = vadd.f32 %v3652_v29, %v3644_v17  ;;  %4561 = vtanh.f32 %v3658_v16  ;;  %v3670_v2 = vmul.f32 0.5, %v4536_v10  ;;  %v3720_v17 = vld [vmem:[#allocation10 + $0xc] sm:$0x8] }
 0x887   :  { %v4542_v28 = vpop.eup %4541  ;;  %4563 = vtanh.f32 %v3659_v30  ;;  %v3771_v41 = vrot.slane %v3656_v33, 5  ;;  %v3671_v1 = vmul.f32 0.5, %v4540_v61  ;;  %v3770_v36 = vsel %vm738_vm2, %v3769_v6, %v3768_v48 }
 0x888   :  { %v4544_v46 = vpop.eup %4543  ;;  %v3653_v26 = vadd.f32 %v3645_v54, %v3637_v39  ;;  %v3773_v23 = vrot.slane %v3657_v25, 4  ;;  %v3672_v14 = vmul.f32 0.5, %v4542_v28  ;;  %v3775_v44 = vrot.slane %v3658_v16, 3  ;;  %v3723_v54 = vld [vmem:[#allocation10 + $0x10] sm:$0x8] }
 0x889   :  { %v4546_v40 = vpop.eup %4545  ;;  %v3772_v21 = vsel %vm741_vm4, %v3771_v41, %v3770_v36  ;;  %v3673_v52 = vmul.f32 0.5, %v4544_v46  ;;  %v3777_v20 = vrot.slane %v3659_v30, 2  ;;  %v3678_v59 = vadd.f32 0.5, %v3670_v2  ;;  %v3726_v36 = vld [vmem:[#allocation10 + $0x14] sm:$0x8] }
 0x88a   :  { %v4548_v8 = vpop.eup %4547  ;;  %4565 = vtanh.f32 %v3653_v26  ;;  %3783 = vst [vmem:[#allocation13 - $0x7] sm:$0x80] %v3653_v26  ;;  %v3774_v50 = vsel %vm744_vm5, %v3773_v23, %v3772_v21  ;;  %v3674_v9 = vmul.f32 0.5, %v4546_v40  ;;  %v3779_v34 = vrot.slane %v3660_v32, 1 }
 0x88b   :  { %v4550_v47 = vpop.eup %4549  ;;  %4567 = vtanh.f32 %v3660_v32  ;;  %v3776_v11 = vsel %vm747_vm6, %v3775_v44, %v3774_v50  ;;  %v3679_v60 = vadd.f32 0.5, %v3671_v1  ;;  %v3680_v12 = vadd.f32 0.5, %v3672_v14  ;;  %v3729_v44 = vld [vmem:[#allocation10 + $0x18] sm:$0x8] }
 0x88c   :  { %v4552_v15 = vpop.eup %4551  ;;  %v3778_v57 = vsel %vm750_vm7, %v3777_v20, %v3776_v11  ;;  %v3675_v18 = vmul.f32 0.5, %v4550_v47  ;;  %v3669_v43 = vmul.f32 0.5, %v4548_v8  ;;  %v3681_v31 = vadd.f32 0.5, %v3673_v52  ;;  %v3711_v20 = vld [vmem:[#allocation10] sm:$0x8] }
 0x88d   :  { %v3780_v22 = vsel %vm753_vm8, %v3779_v34, %v3778_v57  ;;  %v3682_v45 = vadd.f32 0.5, %v3674_v9  ;;  %v3676_v62 = vmul.f32 0.5, %v4552_v15  ;;  %v3732_v34 = vld [vmem:[#allocation10 + $0x1c] sm:$0x8] }
 0x88e   :  { %3784 = vst [vmem:[#allocation13 + $0x1] sm:$0x7f] %v3780_v22  ;;  %v3683_v3 = vadd.f32 0.5, %v3675_v18  ;;  %v3677_v30 = vadd.f32 0.5, %v3669_v43 }
 0x88f   :  { %v4554_v63 = vpop.eup %4553  ;;  %v3684_v46 = vadd.f32 0.5, %v3676_v62 }
 0x890   :  { %v4556_v13 = vpop.eup %4555  ;;  %v3694_v35 = vmul.f32 %v4554_v63, %v3678_v59 }
 0x891   :  { %v4558_v42 = vpop.eup %4557  ;;  %v3695_v55 = vmul.f32 %v4556_v13, %v3679_v60 }
 0x892   :  { %v4560_v24 = vpop.eup %4559  ;;  %v3696_v4 = vmul.f32 %v4558_v42, %v3680_v12  ;;  %v3702_v19 = vpack.c.bf16 %v3694_v35, %v3694_v35  ;;  %v3743_v56 = vrot.slane %v3694_v35, 7 }
 0x893   :  { %v3697_v27 = vmul.f32 %v4560_v24, %v3681_v31  ;;  %v3703_v53 = vpack.c.bf16 %v3695_v55, %v3695_v55  ;;  %v3744_v58 = vrot.slane %v3695_v55, 6  ;;  %v4562_v38 = vpop.eup %4561 }
 0x894   :  { %v3704_v49 = vpack.c.bf16 %v3696_v4, %v3696_v4  ;;  %v3715_v33 = vsel %vm6667_vm13, %v3702_v19, %v3714_v37  ;;  %v3746_v7 = vrot.slane %v3696_v4, 5  ;;  %v4564_v5 = vpop.eup %4563  ;;  %v3698_v29 = vmul.f32 %v4562_v38, %v3682_v45 }
 0x895   :  { %v3705_v25 = vpack.c.bf16 %v3697_v27, %v3697_v27  ;;  %3716 = vst [vmem:[#allocation10 + $0x4] sm:$0x8] %v3715_v33  ;;  %v3718_v10 = vsel %vm6667_vm13, %v3703_v53, %v3717_v51  ;;  %v3745_v16 = vsel %vm738_vm2, %v3744_v58, %v3743_v56  ;;  %v3748_v39 = vrot.slane %v3697_v27, 4 }
 0x896   :  { %3719 = vst [vmem:[#allocation10 + $0x8] sm:$0x8] %v3718_v10  ;;  %v3721_v61 = vsel %vm6667_vm13, %v3704_v49, %v3720_v17  ;;  %v3747_v28 = vsel %vm741_vm4, %v3746_v7, %v3745_v16  ;;  %v3699_v26 = vmul.f32 %v4564_v5, %v3683_v3  ;;  %v3706_v2 = vpack.c.bf16 %v3698_v29, %v3698_v29 }
 0x897   :  { %v4566_v32 = vpop.eup %4565  ;;  %3722 = vst [vmem:[#allocation10 + $0xc] sm:$0x8] %v3721_v61  ;;  %v3724_v48 = vsel %vm6667_vm13, %v3705_v25, %v3723_v54  ;;  %v3749_v40 = vsel %vm744_vm5, %v3748_v39, %v3747_v28  ;;  %v3750_v41 = vrot.slane %v3698_v29, 3 }
 0x898   :  { %v4568_v6 = vpop.eup %4567  ;;  %v3693_v8 = vmul.f32 %v4566_v32, %v3677_v30  ;;  %3725 = vst [vmem:[#allocation10 + $0x10] sm:$0x8] %v3724_v48  ;;  %v3707_v1 = vpack.c.bf16 %v3699_v26, %v3699_v26  ;;  %v3752_v23 = vrot.slane %v3699_v26, 2  ;;  %v3727_v21 = vsel %vm6667_vm13, %v3706_v2, %v3726_v36 }
 0x899   :  { %v3700_v47 = vmul.f32 %v4568_v6, %v3684_v46  ;;  %v3751_v52 = vsel %vm747_vm6, %v3750_v41, %v3749_v40  ;;  %3728 = vst [vmem:[#allocation10 + $0x14] sm:$0x8] %v3727_v21 }
 0x89a   :  { %v3701_v14 = vpack.c.bf16 %v3693_v8, %v3693_v8  ;;  %3758 = vst [vmem:[#allocation11 - $0x7] sm:$0x80] %v3693_v8  ;;  %v3730_v15 = vsel %vm6667_vm13, %v3707_v1, %v3729_v44  ;;  %v3753_v9 = vsel %vm750_vm7, %v3752_v23, %v3751_v52 }
 0x89b   :  { %v3708_v50 = vpack.c.bf16 %v3700_v47, %v3700_v47  ;;  %v3754_v59 = vrot.slane %v3700_v47, 1  ;;  %3731 = vst [vmem:[#allocation10 + $0x18] sm:$0x8] %v3730_v15 }
 0x89c   :  { %v3712_v11 = vsel %vm6667_vm13, %v3701_v14, %v3711_v20 }
 0x89d   :  { %3713 = vst [vmem:[#allocation10] sm:$0x8] %v3712_v11  ;;  %v3733_v63 = vsel %vm6667_vm13, %v3708_v50, %v3732_v34  ;;  %v3755_v60 = vsel %vm753_vm8, %v3754_v59, %v3753_v9 }
 0x89e   :  { %3734 = vst [vmem:[#allocation10 + $0x1c] sm:$0x8] %v3733_v63  ;;  %3759 = vst [vmem:[#allocation11 + $0x1] sm:$0x7f] %v3755_v60 }
 0x89f   :  { %4756 = shalt.err (!%p4753_p10)
}
 0x8a0   :  { %3806 = dma.vmem_to_hbm [thread:$0]  %s3804_s3, 128, %s6707_s5, [#allocation12]  }
 0x8a1   :  { %s4765_s24 = scalar_lea.vmem %s3791_s18, 512  ;;  %p4770_p12 = scmp.lt.s32.totalorder %s3791_s18, %s3791_s18 }
 0x8a2   :  { %p4766_p11 = scmp.ne.s32.totalorder %s3791_s18, %s4765_s24  ;;  %p4771_p13 = scmp.lt.s32.totalorder %s4765_s24, %s4765_s24 }
 0x8a4   :  { %p4772_p0 = por %p4771_p13, %p4770_p12 }
 0x8a6   :  { %p4773_p1 = pnand %p4772_p0, %p4766_p11 }
 0x8a8   :  { %4776 = shalt.err (!%p4773_p1)
}
 0x8a9   :  { %s4825_s25 = smov 64   ;;  %s4826_s26 = smov 4  }
 0x8aa   :  { %3796 = dma.vmem_to_hbm [thread:$0]  %s3791_s18, 512, %s6706_s4, [#allocation6], %s4825_s25, %s4825_s25, %s4826_s26  }
 0x8ab   :  { %s4785_s29 = scalar_lea.vmem %s3814_s20, 128  ;;  %p4790_p3 = scmp.lt.s32.totalorder %s3814_s20, %s3814_s20 }
 0x8ac   :  { %p4786_p2 = scmp.ne.s32.totalorder %s3814_s20, %s4785_s29  ;;  %p4791_p4 = scmp.lt.s32.totalorder %s4785_s29, %s4785_s29 }
 0x8ae   :  { %p4792_p5 = por %p4791_p4, %p4790_p3 }
 0x8b0   :  { %p4793_p6 = pnand %p4792_p5, %p4786_p2 }
 0x8b2   :  { %4796 = shalt.err (!%p4793_p6)
}
 0x8b3   :  { %3816 = dma.vmem_to_hbm [thread:$0]  %s3814_s20, 128, %s6708_s6, [#allocation12]  }
 0x8b4   :  { %4811 = dma.done.wait [#allocation6], 512  }
 0x8b5   :  { %4812 = vsyncadd [#allocation6], 4294966784 }
 0x8b6   :  { %4813 = dma.done.wait [#allocation12], 256  }
 0x8b7   :  { %4814 = vsyncadd [#allocation12], 4294967040 }
 0x8b8   :  { %3826 = vsyncpa [#allocation5], 1 }
 0x8b9   :  { %3827 = vsyncpa [#allocation8], 1 }
 0x8ba   :  { %3828 = vsyncpa [#allocation6], 1 }
 0x8bb   :  { %3829 = vsyncpa [#allocation12], 1 }
 0x8bc   :  { %3830 = vsyncmov [#allocation3] }
 0x8bf   :  { %s3831_s4 = vpop.sfrf %3830 }
 0x8c0   :  { %p3868_p7 = scmp.ne.s32.totalorder %s3831_s4, 0 }
 0x8c2   :  { %3835 = shalt.err (%p3868_p7)  }

</bundles_post_ra>
